<compile_context>
chip_gen: v6e
topology: v6e:2x2x1
jax: 0.10.0
libtpu: 0.0.40
codegen_flags: <defaults>
</compile_context>

<pallas_src>
import functools

import jax
import jax.numpy as jnp
from jax.experimental import pallas as pl
from jax.experimental.pallas import tpu as pltpu


# -----------------------------------------------------------------------------
# Host-side layout helpers (XLA glue)
# -----------------------------------------------------------------------------
def space_to_depth_pad(x):
    """(N, H, W, C) NHWC -> (N, H//2, W//2 + 1, 4C).

    Channel groups are ordered (py, px, c) so group g = 2*py + px.  The extra
    zero column at w-index 0 implements the conv's left padding."""
    n, h, w, c = x.shape
    assert h % 2 == 0 and w % 2 == 0, "spatial dims must be even"
    t = x.reshape(n, h // 2, 2, w // 2, 2, c)
    t = jnp.transpose(t, (0, 1, 3, 2, 4, 5))            # (n, i, j, py, px, c)
    t = t.reshape(n, h // 2, w // 2, 4 * c)
    return jnp.pad(t, ((0, 0), (0, 0), (1, 0), (0, 0)))


_TAP = {(0, 1): 0, (1, 0): 1, (1, 1): 2}   # (block offset d, parity p) -> 3x3 tap index


def make_s2d_weights(w_oihw):
    """PyTorch conv weight (Cout, Cin, 3, 3) -> (4, 4*Cin, Cout).

    Tap g = 2*dy + dx of the equivalent 2x2/stride-1 conv over the s2d input;
    rows follow the (py, px, ci) channel order produced by space_to_depth_pad.
    Incompatible (offset, parity) slots stay zero (those taps read padding)."""
    cout, cin = w_oihw.shape[:2]
    w = jnp.transpose(w_oihw, (2, 3, 1, 0))             # (ky, kx, Cin, Cout)
    w2 = jnp.zeros((2, 2, 4, cin, cout), w.dtype)
    for dy in (0, 1):
        for dx in (0, 1):
            for py in (0, 1):
                for px in (0, 1):
                    ky = _TAP.get((dy, py))
                    kx = _TAP.get((dx, px))
                    if ky is None or kx is None:
                        continue
                    w2 = w2.at[dy, dx, 2 * py + px].set(w[ky, kx])
    return w2.reshape(4, 4 * cin, cout)


# -----------------------------------------------------------------------------
# VMEM sizing helpers (padding-aware, per review)
# -----------------------------------------------------------------------------
def _rup(n, m):
    return -(-int(n) // m) * m


def _vbytes(shape, dtype):
    """Padded VMEM footprint of one buffer (last dim -> 128 lanes, 2nd-last ->
    sublane multiple for the dtype)."""
    bs = jnp.dtype(dtype).itemsize
    sub = max(8, 32 // bs)
    lead = 1
    for d in shape[:-2]:
        lead *= int(d)
    return lead * _rup(shape[-2], sub) * _rup(shape[-1], 128) * bs


def _vmem_limit(nbytes):
    return int(min(max(nbytes + (8 << 20), 24 << 20), 48 << 20))


def _pick_bm(h, target):
    if h <= target:
        return h
    bm = target
    while h % bm:
        bm -= 1
    return bm


# -----------------------------------------------------------------------------
# Pallas kernels
# -----------------------------------------------------------------------------
def _conv_s2d_kernel(alpha_ref, x_ref, w_ref, b_ref, o_ref, carry_ref,
                     *, bm, ws, c4, cout):
    """One row band of: conv3x3/s2 (as 4 shifted matmuls over the s2d input)
    + bias + PReLU.  The 1-row top halo is carried in `carry_ref`."""
    j = pl.program_id(1)

    @pl.when(j == 0)
    def _():
        carry_ref[...] = jnp.zeros_like(carry_ref)   # top padding of the image

    x = x_ref[0]                                     # (bm, ws+1, 4C) bf16
    if bm > 1:
        x_prev = jnp.concatenate([carry_ref[...], x[: bm - 1]], axis=0)
    else:
        x_prev = carry_ref[...]
    carry_ref[...] = x[bm - 1: bm]                   # halo row for the next band

    rows = bm * ws
    acc = jnp.zeros((rows, cout), jnp.float32)
    for dy, slab in ((0, x_prev), (1, x)):
        for dx in (0, 1):
            lhs = slab[:, dx: dx + ws, :].reshape(rows, c4)
            acc = acc + jnp.dot(lhs, w_ref[2 * dy + dx],
                                preferred_element_type=jnp.float32)

    y = acc + b_ref[...]                             # (1, Cout) broadcast (f32)
    a = alpha_ref[0]                                 # shared PReLU alpha (SMEM)
    y = jnp.where(y > 0.0, y, a * y)
    o_ref[...] = y[None].astype(o_ref.dtype)


def _conv4_pool_fc_kernel(x_ref, w_ref, b_ref, wfc_ref, bfc_ref, o_ref,
                          *, hs, ws, c4):
    """Fused conv4 (4 shifted matmuls) -> global average pool -> FC -> sigmoid,
    one whole image per grid step (conv4 activation never hits HBM)."""
    x = x_ref[0]                                     # (hs, ws+1, 4C) bf16
    zero_row = jnp.zeros((1, ws + 1, c4), x.dtype)
    if hs > 1:
        x_prev = jnp.concatenate([zero_row, x[: hs - 1]], axis=0)
    else:
        x_prev = zero_row

    rows = hs * ws
    cout = w_ref.shape[-1]
    acc = jnp.zeros((rows, cout), jnp.float32)
    for dy, slab in ((0, x_prev), (1, x)):
        for dx in (0, 1):
            lhs = slab[:, dx: dx + ws, :].reshape(rows, c4)
            acc = acc + jnp.dot(lhs, w_ref[2 * dy + dx],
                                preferred_element_type=jnp.float32)

    pooled = jnp.mean(acc, axis=0, keepdims=True) + b_ref[...]         # (1, 128)
    z = jnp.dot(pooled, wfc_ref[...], preferred_element_type=jnp.float32)
    z = z + bfc_ref[...]
    o_ref[...] = jax.nn.sigmoid(z)[None]                               # (1, 1, P)


# -----------------------------------------------------------------------------
# pallas_call wrappers
# -----------------------------------------------------------------------------
def conv_s2d_prelu(x_s2d, w2, bias, alpha, *, cout, bm_target):
    """x_s2d: (N, Hs, Ws+1, 4C) bf16 -> (N, Hs*Ws, Cout) bf16."""
    n, hs, ws1, c4 = x_s2d.shape
    ws = ws1 - 1
    bm = _pick_bm(hs, bm_target)
    nj = hs // bm
    rows = bm * ws

    need = (3 * _vbytes((bm, ws1, c4), jnp.bfloat16)       # 2x input bufs + halo concat
            + 2 * _vbytes((rows, c4), jnp.bfloat16)        # tap operands
            + 3 * _vbytes((rows, cout), jnp.float32)       # f32 accumulator (lane padded)
            + 2 * _vbytes((rows, cout), jnp.bfloat16)      # 2x output bufs
            + _vbytes((ws1, c4), jnp.bfloat16)             # carry scratch
            + 4 * _vbytes((c4, cout), jnp.bfloat16))       # resident weights

    kernel = functools.partial(_conv_s2d_kernel, bm=bm, ws=ws, c4=c4, cout=cout)
    out = pl.pallas_call(
        kernel,
        out_shape=jax.ShapeDtypeStruct((n, hs * ws, cout), jnp.bfloat16),
        grid=(n, nj),
        in_specs=[
            pl.BlockSpec(memory_space=pltpu.MemorySpace.SMEM),            # PReLU alpha
            pl.BlockSpec((1, bm, ws1, c4), lambda i, j: (i, j, 0, 0)),    # s2d input band
            pl.BlockSpec((4, c4, cout), lambda i, j: (0, 0, 0)),          # resident W
            pl.BlockSpec((1, cout), lambda i, j: (0, 0)),                 # resident b
        ],
        out_specs=pl.BlockSpec((1, rows, cout), lambda i, j: (i, j, 0)),
        scratch_shapes=[pltpu.VMEM((1, ws1, c4), jnp.bfloat16)],          # halo carry
        compiler_params=pltpu.CompilerParams(
            dimension_semantics=("parallel", "arbitrary"),
            vmem_limit_bytes=_vmem_limit(need),
        ),
    )(alpha, x_s2d, w2, bias.reshape(1, cout).astype(jnp.float32))
    return out


def conv4_pool_fc_sigmoid(x_s2d, w2, bias, wfc, bfc):
    """x_s2d: (N, Hs, Ws+1, 256) bf16 -> sigmoid(mean(conv4) @ wfc + bfc): (N, P)."""
    n, hs, ws1, c4 = x_s2d.shape
    ws = ws1 - 1
    cout = w2.shape[-1]
    p = wfc.shape[-1]
    rows = hs * ws

    need = (3 * _vbytes((hs, ws1, c4), jnp.bfloat16)
            + 2 * _vbytes((rows, c4), jnp.bfloat16)
            + 3 * _vbytes((rows, cout), jnp.float32)
            + 4 * _vbytes((c4, cout), jnp.bfloat16)
            + _vbytes((cout, p), jnp.float32))

    kernel = functools.partial(_conv4_pool_fc_kernel, hs=hs, ws=ws, c4=c4)
    out = pl.pallas_call(
        kernel,
        out_shape=jax.ShapeDtypeStruct((n, 1, p), jnp.float32),
        grid=(n,),
        in_specs=[
            pl.BlockSpec((1, hs, ws1, c4), lambda i: (i, 0, 0, 0)),       # whole image
            pl.BlockSpec((4, c4, cout), lambda i: (0, 0, 0)),             # conv4 W
            pl.BlockSpec((1, cout), lambda i: (0, 0)),                    # conv4 b
            pl.BlockSpec((cout, p), lambda i: (0, 0)),                    # fc W
            pl.BlockSpec((1, p), lambda i: (0, 0)),                       # fc b
        ],
        out_specs=pl.BlockSpec((1, 1, p), lambda i: (i, 0, 0)),
        compiler_params=pltpu.CompilerParams(
            dimension_semantics=("parallel",),
            vmem_limit_bytes=_vmem_limit(need),
        ),
    )(x_s2d, w2, bias.reshape(1, cout).astype(jnp.float32),
      wfc.astype(jnp.float32), bfc.reshape(1, p).astype(jnp.float32))
    return out.reshape(n, p)


# -----------------------------------------------------------------------------
# Parameter construction (deterministic, PyTorch-like fan_in uniform init)
# -----------------------------------------------------------------------------
def _uniform(key, shape, fan_in):
    bound = 1.0 / jnp.sqrt(jnp.asarray(fan_in, jnp.float32))
    return jax.random.uniform(key, shape, jnp.float32, -bound, bound)


def init_params(key, num_points=10):
    ks = jax.random.split(key, 10)
    params = {}
    conv_defs = [("conv1", 3, 16), ("conv2", 16, 32), ("conv3", 32, 64), ("conv4", 64, 128)]
    i = 0
    for name, cin, cout in conv_defs:
        fan_in = cin * 9
        params[name + "_w"] = _uniform(ks[i], (cout, cin, 3, 3), fan_in); i += 1
        params[name + "_b"] = _uniform(ks[i], (cout,), fan_in); i += 1
    params["fc_w"] = _uniform(ks[i], (num_points * 2, 128), 128); i += 1
    params["fc_b"] = _uniform(ks[i], (num_points * 2,), 128); i += 1
    # nn.PReLU() default: a single shared parameter initialized to 0.25
    params["prelu1"] = jnp.array([0.25], jnp.float32)
    params["prelu2"] = jnp.array([0.25], jnp.float32)
    params["prelu3"] = jnp.array([0.25], jnp.float32)
    return params


# -----------------------------------------------------------------------------
# Forward pass
# -----------------------------------------------------------------------------
_CONV_DEFS = (("conv1", "prelu1", 16, 16),
              ("conv2", "prelu2", 32, 32),
              ("conv3", "prelu3", 64, 64))   # (name, prelu, Cout, row-band size)


@functools.partial(jax.jit, static_argnums=(2,))
def point_gen_forward(x_nchw, params, num_points=10):
    n, _, h, w = x_nchw.shape
    assert h % 16 == 0 and w % 16 == 0, "image size must be a multiple of 16"

    x = jnp.transpose(x_nchw, (0, 2, 3, 1)).astype(jnp.bfloat16)       # NHWC bf16

    # conv1..conv3 with PReLU (3x3/s2 conv == 2x2/s1 conv over the s2d tensor)
    for name, pkey, cout, bm_target in _CONV_DEFS:
        s = space_to_depth_pad(x)                                      # (N, H/2, W/2+1, 4Cin)
        hs, ws = s.shape[1], s.shape[2] - 1
        w2 = make_s2d_weights(params[name + "_w"]).astype(jnp.bfloat16)
        y = conv_s2d_prelu(s, w2, params[name + "_b"], params[pkey],
                           cout=cout, bm_target=bm_target)
        x = y.reshape(n, hs, ws, cout)                                 # free reshape

    # conv4 + global average pool + FC + sigmoid, fused (one image per step)
    s4 = space_to_depth_pad(x)                                         # (N, H/16, W/16+1, 256)
    w4 = make_s2d_weights(params["conv4_w"]).astype(jnp.bfloat16)
    wfc = jnp.transpose(params["fc_w"], (1, 0))                        # (128, 2*num_points)
    out = conv4_pool_fc_sigmoid(s4, w4, params["conv4_b"], wfc, params["fc_b"])
    return out.reshape(n, num_points, 2)


# -----------------------------------------------------------------------------
# Main
# -----------------------------------------------------------------------------
if __name__ == "__main__":
    num_points = 10
    batch, image_size = 2, 32   # small test size; the module default is 1024

    key = jax.random.PRNGKey(0)
    k_x, k_p = jax.random.split(key)
    x = jax.random.normal(k_x, (batch, 3, image_size, image_size), jnp.float32)
    params = init_params(k_p, num_points=num_points)

    out = point_gen_forward(x, params, num_points)
    out = jax.block_until_ready(out)

    assert out.shape == (batch, num_points, 2), out.shape
    assert bool(jnp.all((out >= 0.0) & (out <= 1.0)))
    assert bool(jnp.all(jnp.isfinite(out)))
    print("KERNEL_OK")
</pallas_src>

<mosaic_0001>
module attributes {stable_mosaic.version = 11 : i64} {
  func.func @_conv_s2d_kernel(%arg0: i32, %arg1: i32, %arg2: memref<1xf32, #tpu.memory_space<smem>>, %arg3: memref<1x16x17x12xbf16, #tpu.memory_space<vmem>>, %arg4: memref<4x12x16xbf16, #tpu.memory_space<vmem>>, %arg5: memref<1x16xf32, #tpu.memory_space<vmem>>, %arg6: memref<1x256x16xbf16, #tpu.memory_space<vmem>>, %arg7: memref<1x17x12xbf16, #tpu.memory_space<vmem>>) attributes {dimension_semantics = [#tpu.dimension_semantics<parallel>, #tpu.dimension_semantics<arbitrary>], iteration_bounds = array<i64: 2, 1>, scalar_prefetch = 0 : i64, scratch_operands = 1 : i64, tpu.core_type = #tpu.core_type<tc>, window_params = [{transform_indices = @transform_0, window_bounds = array<i64: 1>}, {transform_indices = @transform_1, window_bounds = array<i64: 1, 16, 17, 12>}, {pipeline_mode = #tpu.pipeline_mode<synchronous>, transform_indices = @transform_2, window_bounds = array<i64: 4, 12, 16>}, {pipeline_mode = #tpu.pipeline_mode<synchronous>, transform_indices = @transform_3, window_bounds = array<i64: 1, 16>}, {transform_indices = @transform_4, window_bounds = array<i64: 1, 256, 16>}]} {
    %c0_i32 = arith.constant 0 : i32
    %0 = arith.cmpi eq, %arg1, %c0_i32 : i32
    %1 = arith.extui %0 : i1 to i32
    %c0_i32_0 = arith.constant 0 : i32
    %2 = arith.cmpi ne, %1, %c0_i32_0 : i32
    scf.if %2 {
      %cst_30 = arith.constant 0.000000e+00 : bf16
      %47 = vector.broadcast %cst_30 : bf16 to vector<1x17x12xbf16>
      %c0_31 = arith.constant 0 : index
      %c0_32 = arith.constant 0 : index
      %c0_33 = arith.constant 0 : index
      %48 = vector.load %arg7[%c0_31, %c0_32, %c0_33] : memref<1x17x12xbf16, #tpu.memory_space<vmem>>, vector<1x17x12xbf16>
      tpu.vector_store %arg7[%c0_31, %c0_32, %c0_33], %47 {strides = array<i32>} : memref<1x17x12xbf16, #tpu.memory_space<vmem>>, vector<1x17x12xbf16>,
    } else {
    }
    %c0 = arith.constant 0 : index
    %c0_1 = arith.constant 0 : index
    %c0_2 = arith.constant 0 : index
    %c0_3 = arith.constant 0 : index
    %3 = vector.load %arg3[%c0, %c0_1, %c0_2, %c0_3] : memref<1x16x17x12xbf16, #tpu.memory_space<vmem>>, vector<1x16x17x12xbf16>
    %4 = vector.shape_cast %3 : vector<1x16x17x12xbf16> to vector<16x17x12xbf16>
    %c0_4 = arith.constant 0 : index
    %c0_5 = arith.constant 0 : index
    %c0_6 = arith.constant 0 : index
    %5 = vector.load %arg7[%c0_4, %c0_5, %c0_6] : memref<1x17x12xbf16, #tpu.memory_space<vmem>>, vector<1x17x12xbf16>
    %6 = vector.extract_strided_slice %4 {offsets = [0, 0, 0], sizes = [15, 17, 12], strides = [1, 1, 1]} : vector<16x17x12xbf16> to vector<15x17x12xbf16>
    %7 = tpu.concatenate %5, %6 in 0 : vector<1x17x12xbf16>, vector<15x17x12xbf16> -> vector<16x17x12xbf16>
    %8 = vector.extract_strided_slice %4 {offsets = [15, 0, 0], sizes = [1, 17, 12], strides = [1, 1, 1]} : vector<16x17x12xbf16> to vector<1x17x12xbf16>
    %c0_7 = arith.constant 0 : index
    %c0_8 = arith.constant 0 : index
    %c0_9 = arith.constant 0 : index
    %9 = vector.load %arg7[%c0_7, %c0_8, %c0_9] : memref<1x17x12xbf16, #tpu.memory_space<vmem>>, vector<1x17x12xbf16>
    tpu.vector_store %arg7[%c0_7, %c0_8, %c0_9], %8 {strides = array<i32>} : memref<1x17x12xbf16, #tpu.memory_space<vmem>>, vector<1x17x12xbf16>,
    %cst = arith.constant 0.000000e+00 : f32
    %10 = vector.broadcast %cst : f32 to vector<256x16xf32>
    %11 = vector.extract_strided_slice %7 {offsets = [0, 0, 0], sizes = [16, 16, 12], strides = [1, 1, 1]} : vector<16x17x12xbf16> to vector<16x16x12xbf16>
    %12 = vector.shape_cast %11 : vector<16x16x12xbf16> to vector<256x12xbf16>
    %c0_10 = arith.constant 0 : index
    %c0_11 = arith.constant 0 : index
    %c0_12 = arith.constant 0 : index
    %13 = vector.load %arg4[%c0_10, %c0_11, %c0_12] : memref<4x12x16xbf16, #tpu.memory_space<vmem>>, vector<1x12x16xbf16>
    %14 = vector.shape_cast %13 : vector<1x12x16xbf16> to vector<12x16xbf16>
    %cst_13 = arith.constant dense<0.000000e+00> : vector<256x16xf32>
    %15 = tpu.matmul %12, %14, %cst_13 {dimension_numbers = #tpu.dot_dimension_numbers<[1], [0], [0], [1], [0, 0, 1, 1], [], []>} : vector<256x12xbf16>, vector<12x16xbf16>, vector<256x16xf32> -> vector<256x16xf32>
    %16 = arith.addf %10, %15 : vector<256x16xf32>
    %17 = vector.extract_strided_slice %7 {offsets = [0, 1, 0], sizes = [16, 16, 12], strides = [1, 1, 1]} : vector<16x17x12xbf16> to vector<16x16x12xbf16>
    %18 = vector.shape_cast %17 : vector<16x16x12xbf16> to vector<256x12xbf16>
    %c1 = arith.constant 1 : index
    %c0_14 = arith.constant 0 : index
    %c0_15 = arith.constant 0 : index
    %19 = vector.load %arg4[%c1, %c0_14, %c0_15] : memref<4x12x16xbf16, #tpu.memory_space<vmem>>, vector<1x12x16xbf16>
    %20 = vector.shape_cast %19 : vector<1x12x16xbf16> to vector<12x16xbf16>
    %cst_16 = arith.constant dense<0.000000e+00> : vector<256x16xf32>
    %21 = tpu.matmul %18, %20, %cst_16 {dimension_numbers = #tpu.dot_dimension_numbers<[1], [0], [0], [1], [0, 0, 1, 1], [], []>} : vector<256x12xbf16>, vector<12x16xbf16>, vector<256x16xf32> -> vector<256x16xf32>
    %22 = arith.addf %16, %21 : vector<256x16xf32>
    %23 = vector.extract_strided_slice %4 {offsets = [0, 0, 0], sizes = [16, 16, 12], strides = [1, 1, 1]} : vector<16x17x12xbf16> to vector<16x16x12xbf16>
    %24 = vector.shape_cast %23 : vector<16x16x12xbf16> to vector<256x12xbf16>
    %c2 = arith.constant 2 : index
    %c0_17 = arith.constant 0 : index
    %c0_18 = arith.constant 0 : index
    %25 = vector.load %arg4[%c2, %c0_17, %c0_18] : memref<4x12x16xbf16, #tpu.memory_space<vmem>>, vector<1x12x16xbf16>
    %26 = vector.shape_cast %25 : vector<1x12x16xbf16> to vector<12x16xbf16>
    %cst_19 = arith.constant dense<0.000000e+00> : vector<256x16xf32>
    %27 = tpu.matmul %24, %26, %cst_19 {dimension_numbers = #tpu.dot_dimension_numbers<[1], [0], [0], [1], [0, 0, 1, 1], [], []>} : vector<256x12xbf16>, vector<12x16xbf16>, vector<256x16xf32> -> vector<256x16xf32>
    %28 = arith.addf %22, %27 : vector<256x16xf32>
    %29 = vector.extract_strided_slice %4 {offsets = [0, 1, 0], sizes = [16, 16, 12], strides = [1, 1, 1]} : vector<16x17x12xbf16> to vector<16x16x12xbf16>
    %30 = vector.shape_cast %29 : vector<16x16x12xbf16> to vector<256x12xbf16>
    %c3 = arith.constant 3 : index
    %c0_20 = arith.constant 0 : index
    %c0_21 = arith.constant 0 : index
    %31 = vector.load %arg4[%c3, %c0_20, %c0_21] : memref<4x12x16xbf16, #tpu.memory_space<vmem>>, vector<1x12x16xbf16>
    %32 = vector.shape_cast %31 : vector<1x12x16xbf16> to vector<12x16xbf16>
    %cst_22 = arith.constant dense<0.000000e+00> : vector<256x16xf32>
    %33 = tpu.matmul %30, %32, %cst_22 {dimension_numbers = #tpu.dot_dimension_numbers<[1], [0], [0], [1], [0, 0, 1, 1], [], []>} : vector<256x12xbf16>, vector<12x16xbf16>, vector<256x16xf32> -> vector<256x16xf32>
    %34 = arith.addf %28, %33 : vector<256x16xf32>
    %c0_23 = arith.constant 0 : index
    %c0_24 = arith.constant 0 : index
    %35 = vector.load %arg5[%c0_23, %c0_24] : memref<1x16xf32, #tpu.memory_space<vmem>>, vector<1x16xf32>
    %36 = vector.broadcast %35 : vector<1x16xf32> to vector<256x16xf32>
    %37 = arith.addf %34, %36 : vector<256x16xf32>
    %c0_25 = arith.constant 0 : index
    %38 = memref.load %arg2[%c0_25] : memref<1xf32, #tpu.memory_space<smem>>
    %cst_26 = arith.constant 0.000000e+00 : f32
    %39 = vector.broadcast %cst_26 : f32 to vector<256x16xf32>
    %40 = arith.cmpf ogt, %37, %39 : vector<256x16xf32>
    %41 = vector.broadcast %38 : f32 to vector<256x16xf32>
    %42 = arith.mulf %41, %37 : vector<256x16xf32>
    %43 = arith.select %40, %37, %42 : vector<256x16xi1>, vector<256x16xf32>
    %44 = vector.shape_cast %43 : vector<256x16xf32> to vector<1x256x16xf32>
    %45 = arith.truncf %44 : vector<1x256x16xf32> to vector<1x256x16xbf16>
    %c0_27 = arith.constant 0 : index
    %c0_28 = arith.constant 0 : index
    %c0_29 = arith.constant 0 : index
    %46 = vector.load %arg6[%c0_27, %c0_28, %c0_29] : memref<1x256x16xbf16, #tpu.memory_space<vmem>>, vector<1x256x16xbf16>
    tpu.vector_store %arg6[%c0_27, %c0_28, %c0_29], %45 {strides = array<i32>} : memref<1x256x16xbf16, #tpu.memory_space<vmem>>, vector<1x256x16xbf16>,
    return
  }
  func.func @transform_0(%arg0: i32, %arg1: i32) -> i32 {
    %c0_i32 = arith.constant 0 : i32
    %c0_i32_0 = arith.constant 0 : i32
    return %c0_i32 : i32
  }
  func.func @transform_1(%arg0: i32, %arg1: i32) -> (i32, i32, i32, i32) {
    %c0_i32 = arith.constant 0 : i32
    %c0_i32_0 = arith.constant 0 : i32
    %c0_i32_1 = arith.constant 0 : i32
    return %arg0, %arg1, %c0_i32, %c0_i32_0 : i32, i32, i32, i32
  }
  func.func @transform_2(%arg0: i32, %arg1: i32) -> (i32, i32, i32) {
    %c0_i32 = arith.constant 0 : i32
    %c0_i32_0 = arith.constant 0 : i32
    %c0_i32_1 = arith.constant 0 : i32
    %c0_i32_2 = arith.constant 0 : i32
    return %c0_i32, %c0_i32_0, %c0_i32_1 : i32, i32, i32
  }
  func.func @transform_3(%arg0: i32, %arg1: i32) -> (i32, i32) {
    %c0_i32 = arith.constant 0 : i32
    %c0_i32_0 = arith.constant 0 : i32
    %c0_i32_1 = arith.constant 0 : i32
    return %c0_i32, %c0_i32_0 : i32, i32
  }
  func.func @transform_4(%arg0: i32, %arg1: i32) -> (i32, i32, i32) {
    %c0_i32 = arith.constant 0 : i32
    %c0_i32_0 = arith.constant 0 : i32
    return %arg0, %arg1, %c0_i32 : i32, i32, i32
  }
}

module attributes {stable_mosaic.version = 11 : i64} {
  func.func @_conv_s2d_kernel(%arg0: i32, %arg1: i32, %arg2: memref<1xf32, #tpu.memory_space<smem>>, %arg3: memref<1x8x9x64xbf16, #tpu.memory_space<vmem>>, %arg4: memref<4x64x32xbf16, #tpu.memory_space<vmem>>, %arg5: memref<1x32xf32, #tpu.memory_space<vmem>>, %arg6: memref<1x64x32xbf16, #tpu.memory_space<vmem>>, %arg7: memref<1x9x64xbf16, #tpu.memory_space<vmem>>) attributes {dimension_semantics = [#tpu.dimension_semantics<parallel>, #tpu.dimension_semantics<arbitrary>], iteration_bounds = array<i64: 2, 1>, scalar_prefetch = 0 : i64, scratch_operands = 1 : i64, tpu.core_type = #tpu.core_type<tc>, window_params = [{transform_indices = @transform_0, window_bounds = array<i64: 1>}, {transform_indices = @transform_1, window_bounds = array<i64: 1, 8, 9, 64>}, {pipeline_mode = #tpu.pipeline_mode<synchronous>, transform_indices = @transform_2, window_bounds = array<i64: 4, 64, 32>}, {pipeline_mode = #tpu.pipeline_mode<synchronous>, transform_indices = @transform_3, window_bounds = array<i64: 1, 32>}, {transform_indices = @transform_4, window_bounds = array<i64: 1, 64, 32>}]} {
    %c0_i32 = arith.constant 0 : i32
    %0 = arith.cmpi eq, %arg1, %c0_i32 : i32
    %1 = arith.extui %0 : i1 to i32
    %c0_i32_0 = arith.constant 0 : i32
    %2 = arith.cmpi ne, %1, %c0_i32_0 : i32
    scf.if %2 {
      %cst_30 = arith.constant 0.000000e+00 : bf16
      %47 = vector.broadcast %cst_30 : bf16 to vector<1x9x64xbf16>
      %c0_31 = arith.constant 0 : index
      %c0_32 = arith.constant 0 : index
      %c0_33 = arith.constant 0 : index
      %48 = vector.load %arg7[%c0_31, %c0_32, %c0_33] : memref<1x9x64xbf16, #tpu.memory_space<vmem>>, vector<1x9x64xbf16>
      tpu.vector_store %arg7[%c0_31, %c0_32, %c0_33], %47 {strides = array<i32>} : memref<1x9x64xbf16, #tpu.memory_space<vmem>>, vector<1x9x64xbf16>,
    } else {
    }
    %c0 = arith.constant 0 : index
    %c0_1 = arith.constant 0 : index
    %c0_2 = arith.constant 0 : index
    %c0_3 = arith.constant 0 : index
    %3 = vector.load %arg3[%c0, %c0_1, %c0_2, %c0_3] : memref<1x8x9x64xbf16, #tpu.memory_space<vmem>>, vector<1x8x9x64xbf16>
    %4 = vector.shape_cast %3 : vector<1x8x9x64xbf16> to vector<8x9x64xbf16>
    %c0_4 = arith.constant 0 : index
    %c0_5 = arith.constant 0 : index
    %c0_6 = arith.constant 0 : index
    %5 = vector.load %arg7[%c0_4, %c0_5, %c0_6] : memref<1x9x64xbf16, #tpu.memory_space<vmem>>, vector<1x9x64xbf16>
    %6 = vector.extract_strided_slice %4 {offsets = [0, 0, 0], sizes = [7, 9, 64], strides = [1, 1, 1]} : vector<8x9x64xbf16> to vector<7x9x64xbf16>
    %7 = tpu.concatenate %5, %6 in 0 : vector<1x9x64xbf16>, vector<7x9x64xbf16> -> vector<8x9x64xbf16>
    %8 = vector.extract_strided_slice %4 {offsets = [7, 0, 0], sizes = [1, 9, 64], strides = [1, 1, 1]} : vector<8x9x64xbf16> to vector<1x9x64xbf16>
    %c0_7 = arith.constant 0 : index
    %c0_8 = arith.constant 0 : index
    %c0_9 = arith.constant 0 : index
    %9 = vector.load %arg7[%c0_7, %c0_8, %c0_9] : memref<1x9x64xbf16, #tpu.memory_space<vmem>>, vector<1x9x64xbf16>
    tpu.vector_store %arg7[%c0_7, %c0_8, %c0_9], %8 {strides = array<i32>} : memref<1x9x64xbf16, #tpu.memory_space<vmem>>, vector<1x9x64xbf16>,
    %cst = arith.constant 0.000000e+00 : f32
    %10 = vector.broadcast %cst : f32 to vector<64x32xf32>
    %11 = vector.extract_strided_slice %7 {offsets = [0, 0, 0], sizes = [8, 8, 64], strides = [1, 1, 1]} : vector<8x9x64xbf16> to vector<8x8x64xbf16>
    %12 = vector.shape_cast %11 : vector<8x8x64xbf16> to vector<64x64xbf16>
    %c0_10 = arith.constant 0 : index
    %c0_11 = arith.constant 0 : index
    %c0_12 = arith.constant 0 : index
    %13 = vector.load %arg4[%c0_10, %c0_11, %c0_12] : memref<4x64x32xbf16, #tpu.memory_space<vmem>>, vector<1x64x32xbf16>
    %14 = vector.shape_cast %13 : vector<1x64x32xbf16> to vector<64x32xbf16>
    %cst_13 = arith.constant dense<0.000000e+00> : vector<64x32xf32>
    %15 = tpu.matmul %12, %14, %cst_13 {dimension_numbers = #tpu.dot_dimension_numbers<[1], [0], [0], [1], [0, 0, 1, 1], [], []>} : vector<64x64xbf16>, vector<64x32xbf16>, vector<64x32xf32> -> vector<64x32xf32>
    %16 = arith.addf %10, %15 : vector<64x32xf32>
    %17 = vector.extract_strided_slice %7 {offsets = [0, 1, 0], sizes = [8, 8, 64], strides = [1, 1, 1]} : vector<8x9x64xbf16> to vector<8x8x64xbf16>
    %18 = vector.shape_cast %17 : vector<8x8x64xbf16> to vector<64x64xbf16>
    %c1 = arith.constant 1 : index
    %c0_14 = arith.constant 0 : index
    %c0_15 = arith.constant 0 : index
    %19 = vector.load %arg4[%c1, %c0_14, %c0_15] : memref<4x64x32xbf16, #tpu.memory_space<vmem>>, vector<1x64x32xbf16>
    %20 = vector.shape_cast %19 : vector<1x64x32xbf16> to vector<64x32xbf16>
    %cst_16 = arith.constant dense<0.000000e+00> : vector<64x32xf32>
    %21 = tpu.matmul %18, %20, %cst_16 {dimension_numbers = #tpu.dot_dimension_numbers<[1], [0], [0], [1], [0, 0, 1, 1], [], []>} : vector<64x64xbf16>, vector<64x32xbf16>, vector<64x32xf32> -> vector<64x32xf32>
    %22 = arith.addf %16, %21 : vector<64x32xf32>
    %23 = vector.extract_strided_slice %4 {offsets = [0, 0, 0], sizes = [8, 8, 64], strides = [1, 1, 1]} : vector<8x9x64xbf16> to vector<8x8x64xbf16>
    %24 = vector.shape_cast %23 : vector<8x8x64xbf16> to vector<64x64xbf16>
    %c2 = arith.constant 2 : index
    %c0_17 = arith.constant 0 : index
    %c0_18 = arith.constant 0 : index
    %25 = vector.load %arg4[%c2, %c0_17, %c0_18] : memref<4x64x32xbf16, #tpu.memory_space<vmem>>, vector<1x64x32xbf16>
    %26 = vector.shape_cast %25 : vector<1x64x32xbf16> to vector<64x32xbf16>
    %cst_19 = arith.constant dense<0.000000e+00> : vector<64x32xf32>
    %27 = tpu.matmul %24, %26, %cst_19 {dimension_numbers = #tpu.dot_dimension_numbers<[1], [0], [0], [1], [0, 0, 1, 1], [], []>} : vector<64x64xbf16>, vector<64x32xbf16>, vector<64x32xf32> -> vector<64x32xf32>
    %28 = arith.addf %22, %27 : vector<64x32xf32>
    %29 = vector.extract_strided_slice %4 {offsets = [0, 1, 0], sizes = [8, 8, 64], strides = [1, 1, 1]} : vector<8x9x64xbf16> to vector<8x8x64xbf16>
    %30 = vector.shape_cast %29 : vector<8x8x64xbf16> to vector<64x64xbf16>
    %c3 = arith.constant 3 : index
    %c0_20 = arith.constant 0 : index
    %c0_21 = arith.constant 0 : index
    %31 = vector.load %arg4[%c3, %c0_20, %c0_21] : memref<4x64x32xbf16, #tpu.memory_space<vmem>>, vector<1x64x32xbf16>
    %32 = vector.shape_cast %31 : vector<1x64x32xbf16> to vector<64x32xbf16>
    %cst_22 = arith.constant dense<0.000000e+00> : vector<64x32xf32>
    %33 = tpu.matmul %30, %32, %cst_22 {dimension_numbers = #tpu.dot_dimension_numbers<[1], [0], [0], [1], [0, 0, 1, 1], [], []>} : vector<64x64xbf16>, vector<64x32xbf16>, vector<64x32xf32> -> vector<64x32xf32>
    %34 = arith.addf %28, %33 : vector<64x32xf32>
    %c0_23 = arith.constant 0 : index
    %c0_24 = arith.constant 0 : index
    %35 = vector.load %arg5[%c0_23, %c0_24] : memref<1x32xf32, #tpu.memory_space<vmem>>, vector<1x32xf32>
    %36 = vector.broadcast %35 : vector<1x32xf32> to vector<64x32xf32>
    %37 = arith.addf %34, %36 : vector<64x32xf32>
    %c0_25 = arith.constant 0 : index
    %38 = memref.load %arg2[%c0_25] : memref<1xf32, #tpu.memory_space<smem>>
    %cst_26 = arith.constant 0.000000e+00 : f32
    %39 = vector.broadcast %cst_26 : f32 to vector<64x32xf32>
    %40 = arith.cmpf ogt, %37, %39 : vector<64x32xf32>
    %41 = vector.broadcast %38 : f32 to vector<64x32xf32>
    %42 = arith.mulf %41, %37 : vector<64x32xf32>
    %43 = arith.select %40, %37, %42 : vector<64x32xi1>, vector<64x32xf32>
    %44 = vector.shape_cast %43 : vector<64x32xf32> to vector<1x64x32xf32>
    %45 = arith.truncf %44 : vector<1x64x32xf32> to vector<1x64x32xbf16>
    %c0_27 = arith.constant 0 : index
    %c0_28 = arith.constant 0 : index
    %c0_29 = arith.constant 0 : index
    %46 = vector.load %arg6[%c0_27, %c0_28, %c0_29] : memref<1x64x32xbf16, #tpu.memory_space<vmem>>, vector<1x64x32xbf16>
    tpu.vector_store %arg6[%c0_27, %c0_28, %c0_29], %45 {strides = array<i32>} : memref<1x64x32xbf16, #tpu.memory_space<vmem>>, vector<1x64x32xbf16>,
    return
  }
  func.func @transform_0(%arg0: i32, %arg1: i32) -> i32 {
    %c0_i32 = arith.constant 0 : i32
    %c0_i32_0 = arith.constant 0 : i32
    return %c0_i32 : i32
  }
  func.func @transform_1(%arg0: i32, %arg1: i32) -> (i32, i32, i32, i32) {
    %c0_i32 = arith.constant 0 : i32
    %c0_i32_0 = arith.constant 0 : i32
    %c0_i32_1 = arith.constant 0 : i32
    return %arg0, %arg1, %c0_i32, %c0_i32_0 : i32, i32, i32, i32
  }
  func.func @transform_2(%arg0: i32, %arg1: i32) -> (i32, i32, i32) {
    %c0_i32 = arith.constant 0 : i32
    %c0_i32_0 = arith.constant 0 : i32
    %c0_i32_1 = arith.constant 0 : i32
    %c0_i32_2 = arith.constant 0 : i32
    return %c0_i32, %c0_i32_0, %c0_i32_1 : i32, i32, i32
  }
  func.func @transform_3(%arg0: i32, %arg1: i32) -> (i32, i32) {
    %c0_i32 = arith.constant 0 : i32
    %c0_i32_0 = arith.constant 0 : i32
    %c0_i32_1 = arith.constant 0 : i32
    return %c0_i32, %c0_i32_0 : i32, i32
  }
  func.func @transform_4(%arg0: i32, %arg1: i32) -> (i32, i32, i32) {
    %c0_i32 = arith.constant 0 : i32
    %c0_i32_0 = arith.constant 0 : i32
    return %arg0, %arg1, %c0_i32 : i32, i32, i32
  }
}

module attributes {stable_mosaic.version = 11 : i64} {
  func.func @_conv_s2d_kernel(%arg0: i32, %arg1: i32, %arg2: memref<1xf32, #tpu.memory_space<smem>>, %arg3: memref<1x4x5x128xbf16, #tpu.memory_space<vmem>>, %arg4: memref<4x128x64xbf16, #tpu.memory_space<vmem>>, %arg5: memref<1x64xf32, #tpu.memory_space<vmem>>, %arg6: memref<1x16x64xbf16, #tpu.memory_space<vmem>>, %arg7: memref<1x5x128xbf16, #tpu.memory_space<vmem>>) attributes {dimension_semantics = [#tpu.dimension_semantics<parallel>, #tpu.dimension_semantics<arbitrary>], iteration_bounds = array<i64: 2, 1>, scalar_prefetch = 0 : i64, scratch_operands = 1 : i64, tpu.core_type = #tpu.core_type<tc>, window_params = [{transform_indices = @transform_0, window_bounds = array<i64: 1>}, {transform_indices = @transform_1, window_bounds = array<i64: 1, 4, 5, 128>}, {pipeline_mode = #tpu.pipeline_mode<synchronous>, transform_indices = @transform_2, window_bounds = array<i64: 4, 128, 64>}, {pipeline_mode = #tpu.pipeline_mode<synchronous>, transform_indices = @transform_3, window_bounds = array<i64: 1, 64>}, {transform_indices = @transform_4, window_bounds = array<i64: 1, 16, 64>}]} {
    %c0_i32 = arith.constant 0 : i32
    %0 = arith.cmpi eq, %arg1, %c0_i32 : i32
    %1 = arith.extui %0 : i1 to i32
    %c0_i32_0 = arith.constant 0 : i32
    %2 = arith.cmpi ne, %1, %c0_i32_0 : i32
    scf.if %2 {
      %cst_30 = arith.constant 0.000000e+00 : bf16
      %47 = vector.broadcast %cst_30 : bf16 to vector<1x5x128xbf16>
      %c0_31 = arith.constant 0 : index
      %c0_32 = arith.constant 0 : index
      %c0_33 = arith.constant 0 : index
      %48 = vector.load %arg7[%c0_31, %c0_32, %c0_33] : memref<1x5x128xbf16, #tpu.memory_space<vmem>>, vector<1x5x128xbf16>
      tpu.vector_store %arg7[%c0_31, %c0_32, %c0_33], %47 {strides = array<i32>} : memref<1x5x128xbf16, #tpu.memory_space<vmem>>, vector<1x5x128xbf16>,
    } else {
    }
    %c0 = arith.constant 0 : index
    %c0_1 = arith.constant 0 : index
    %c0_2 = arith.constant 0 : index
    %c0_3 = arith.constant 0 : index
    %3 = vector.load %arg3[%c0, %c0_1, %c0_2, %c0_3] : memref<1x4x5x128xbf16, #tpu.memory_space<vmem>>, vector<1x4x5x128xbf16>
    %4 = vector.shape_cast %3 : vector<1x4x5x128xbf16> to vector<4x5x128xbf16>
    %c0_4 = arith.constant 0 : index
    %c0_5 = arith.constant 0 : index
    %c0_6 = arith.constant 0 : index
    %5 = vector.load %arg7[%c0_4, %c0_5, %c0_6] : memref<1x5x128xbf16, #tpu.memory_space<vmem>>, vector<1x5x128xbf16>
    %6 = vector.extract_strided_slice %4 {offsets = [0, 0, 0], sizes = [3, 5, 128], strides = [1, 1, 1]} : vector<4x5x128xbf16> to vector<3x5x128xbf16>
    %7 = tpu.concatenate %5, %6 in 0 : vector<1x5x128xbf16>, vector<3x5x128xbf16> -> vector<4x5x128xbf16>
    %8 = vector.extract_strided_slice %4 {offsets = [3, 0, 0], sizes = [1, 5, 128], strides = [1, 1, 1]} : vector<4x5x128xbf16> to vector<1x5x128xbf16>
    %c0_7 = arith.constant 0 : index
    %c0_8 = arith.constant 0 : index
    %c0_9 = arith.constant 0 : index
    %9 = vector.load %arg7[%c0_7, %c0_8, %c0_9] : memref<1x5x128xbf16, #tpu.memory_space<vmem>>, vector<1x5x128xbf16>
    tpu.vector_store %arg7[%c0_7, %c0_8, %c0_9], %8 {strides = array<i32>} : memref<1x5x128xbf16, #tpu.memory_space<vmem>>, vector<1x5x128xbf16>,
    %cst = arith.constant 0.000000e+00 : f32
    %10 = vector.broadcast %cst : f32 to vector<16x64xf32>
    %11 = vector.extract_strided_slice %7 {offsets = [0, 0, 0], sizes = [4, 4, 128], strides = [1, 1, 1]} : vector<4x5x128xbf16> to vector<4x4x128xbf16>
    %12 = vector.shape_cast %11 : vector<4x4x128xbf16> to vector<16x128xbf16>
    %c0_10 = arith.constant 0 : index
    %c0_11 = arith.constant 0 : index
    %c0_12 = arith.constant 0 : index
    %13 = vector.load %arg4[%c0_10, %c0_11, %c0_12] : memref<4x128x64xbf16, #tpu.memory_space<vmem>>, vector<1x128x64xbf16>
    %14 = vector.shape_cast %13 : vector<1x128x64xbf16> to vector<128x64xbf16>
    %cst_13 = arith.constant dense<0.000000e+00> : vector<16x64xf32>
    %15 = tpu.matmul %12, %14, %cst_13 {dimension_numbers = #tpu.dot_dimension_numbers<[1], [0], [0], [1], [0, 0, 1, 1], [], []>} : vector<16x128xbf16>, vector<128x64xbf16>, vector<16x64xf32> -> vector<16x64xf32>
    %16 = arith.addf %10, %15 : vector<16x64xf32>
    %17 = vector.extract_strided_slice %7 {offsets = [0, 1, 0], sizes = [4, 4, 128], strides = [1, 1, 1]} : vector<4x5x128xbf16> to vector<4x4x128xbf16>
    %18 = vector.shape_cast %17 : vector<4x4x128xbf16> to vector<16x128xbf16>
    %c1 = arith.constant 1 : index
    %c0_14 = arith.constant 0 : index
    %c0_15 = arith.constant 0 : index
    %19 = vector.load %arg4[%c1, %c0_14, %c0_15] : memref<4x128x64xbf16, #tpu.memory_space<vmem>>, vector<1x128x64xbf16>
    %20 = vector.shape_cast %19 : vector<1x128x64xbf16> to vector<128x64xbf16>
    %cst_16 = arith.constant dense<0.000000e+00> : vector<16x64xf32>
    %21 = tpu.matmul %18, %20, %cst_16 {dimension_numbers = #tpu.dot_dimension_numbers<[1], [0], [0], [1], [0, 0, 1, 1], [], []>} : vector<16x128xbf16>, vector<128x64xbf16>, vector<16x64xf32> -> vector<16x64xf32>
    %22 = arith.addf %16, %21 : vector<16x64xf32>
    %23 = vector.extract_strided_slice %4 {offsets = [0, 0, 0], sizes = [4, 4, 128], strides = [1, 1, 1]} : vector<4x5x128xbf16> to vector<4x4x128xbf16>
    %24 = vector.shape_cast %23 : vector<4x4x128xbf16> to vector<16x128xbf16>
    %c2 = arith.constant 2 : index
    %c0_17 = arith.constant 0 : index
    %c0_18 = arith.constant 0 : index
    %25 = vector.load %arg4[%c2, %c0_17, %c0_18] : memref<4x128x64xbf16, #tpu.memory_space<vmem>>, vector<1x128x64xbf16>
    %26 = vector.shape_cast %25 : vector<1x128x64xbf16> to vector<128x64xbf16>
    %cst_19 = arith.constant dense<0.000000e+00> : vector<16x64xf32>
    %27 = tpu.matmul %24, %26, %cst_19 {dimension_numbers = #tpu.dot_dimension_numbers<[1], [0], [0], [1], [0, 0, 1, 1], [], []>} : vector<16x128xbf16>, vector<128x64xbf16>, vector<16x64xf32> -> vector<16x64xf32>
    %28 = arith.addf %22, %27 : vector<16x64xf32>
    %29 = vector.extract_strided_slice %4 {offsets = [0, 1, 0], sizes = [4, 4, 128], strides = [1, 1, 1]} : vector<4x5x128xbf16> to vector<4x4x128xbf16>
    %30 = vector.shape_cast %29 : vector<4x4x128xbf16> to vector<16x128xbf16>
    %c3 = arith.constant 3 : index
    %c0_20 = arith.constant 0 : index
    %c0_21 = arith.constant 0 : index
    %31 = vector.load %arg4[%c3, %c0_20, %c0_21] : memref<4x128x64xbf16, #tpu.memory_space<vmem>>, vector<1x128x64xbf16>
    %32 = vector.shape_cast %31 : vector<1x128x64xbf16> to vector<128x64xbf16>
    %cst_22 = arith.constant dense<0.000000e+00> : vector<16x64xf32>
    %33 = tpu.matmul %30, %32, %cst_22 {dimension_numbers = #tpu.dot_dimension_numbers<[1], [0], [0], [1], [0, 0, 1, 1], [], []>} : vector<16x128xbf16>, vector<128x64xbf16>, vector<16x64xf32> -> vector<16x64xf32>
    %34 = arith.addf %28, %33 : vector<16x64xf32>
    %c0_23 = arith.constant 0 : index
    %c0_24 = arith.constant 0 : index
    %35 = vector.load %arg5[%c0_23, %c0_24] : memref<1x64xf32, #tpu.memory_space<vmem>>, vector<1x64xf32>
    %36 = vector.broadcast %35 : vector<1x64xf32> to vector<16x64xf32>
    %37 = arith.addf %34, %36 : vector<16x64xf32>
    %c0_25 = arith.constant 0 : index
    %38 = memref.load %arg2[%c0_25] : memref<1xf32, #tpu.memory_space<smem>>
    %cst_26 = arith.constant 0.000000e+00 : f32
    %39 = vector.broadcast %cst_26 : f32 to vector<16x64xf32>
    %40 = arith.cmpf ogt, %37, %39 : vector<16x64xf32>
    %41 = vector.broadcast %38 : f32 to vector<16x64xf32>
    %42 = arith.mulf %41, %37 : vector<16x64xf32>
    %43 = arith.select %40, %37, %42 : vector<16x64xi1>, vector<16x64xf32>
    %44 = vector.shape_cast %43 : vector<16x64xf32> to vector<1x16x64xf32>
    %45 = arith.truncf %44 : vector<1x16x64xf32> to vector<1x16x64xbf16>
    %c0_27 = arith.constant 0 : index
    %c0_28 = arith.constant 0 : index
    %c0_29 = arith.constant 0 : index
    %46 = vector.load %arg6[%c0_27, %c0_28, %c0_29] : memref<1x16x64xbf16, #tpu.memory_space<vmem>>, vector<1x16x64xbf16>
    tpu.vector_store %arg6[%c0_27, %c0_28, %c0_29], %45 {strides = array<i32>} : memref<1x16x64xbf16, #tpu.memory_space<vmem>>, vector<1x16x64xbf16>,
    return
  }
  func.func @transform_0(%arg0: i32, %arg1: i32) -> i32 {
    %c0_i32 = arith.constant 0 : i32
    %c0_i32_0 = arith.constant 0 : i32
    return %c0_i32 : i32
  }
  func.func @transform_1(%arg0: i32, %arg1: i32) -> (i32, i32, i32, i32) {
    %c0_i32 = arith.constant 0 : i32
    %c0_i32_0 = arith.constant 0 : i32
    %c0_i32_1 = arith.constant 0 : i32
    return %arg0, %arg1, %c0_i32, %c0_i32_0 : i32, i32, i32, i32
  }
  func.func @transform_2(%arg0: i32, %arg1: i32) -> (i32, i32, i32) {
    %c0_i32 = arith.constant 0 : i32
    %c0_i32_0 = arith.constant 0 : i32
    %c0_i32_1 = arith.constant 0 : i32
    %c0_i32_2 = arith.constant 0 : i32
    return %c0_i32, %c0_i32_0, %c0_i32_1 : i32, i32, i32
  }
  func.func @transform_3(%arg0: i32, %arg1: i32) -> (i32, i32) {
    %c0_i32 = arith.constant 0 : i32
    %c0_i32_0 = arith.constant 0 : i32
    %c0_i32_1 = arith.constant 0 : i32
    return %c0_i32, %c0_i32_0 : i32, i32
  }
  func.func @transform_4(%arg0: i32, %arg1: i32) -> (i32, i32, i32) {
    %c0_i32 = arith.constant 0 : i32
    %c0_i32_0 = arith.constant 0 : i32
    return %arg0, %arg1, %c0_i32 : i32, i32, i32
  }
}

module attributes {stable_mosaic.version = 11 : i64} {
  func.func @_conv4_pool_fc_kernel(%arg0: i32, %arg1: memref<1x2x3x256xbf16, #tpu.memory_space<vmem>>, %arg2: memref<4x256x128xbf16, #tpu.memory_space<vmem>>, %arg3: memref<1x128xf32, #tpu.memory_space<vmem>>, %arg4: memref<128x20xf32, #tpu.memory_space<vmem>>, %arg5: memref<1x20xf32, #tpu.memory_space<vmem>>, %arg6: memref<1x1x20xf32, #tpu.memory_space<vmem>>) attributes {dimension_semantics = [#tpu.dimension_semantics<parallel>], iteration_bounds = array<i64: 2>, scalar_prefetch = 0 : i64, scratch_operands = 0 : i64, tpu.core_type = #tpu.core_type<tc>, window_params = [{transform_indices = @transform_0, window_bounds = array<i64: 1, 2, 3, 256>}, {pipeline_mode = #tpu.pipeline_mode<synchronous>, transform_indices = @transform_1, window_bounds = array<i64: 4, 256, 128>}, {pipeline_mode = #tpu.pipeline_mode<synchronous>, transform_indices = @transform_2, window_bounds = array<i64: 1, 128>}, {pipeline_mode = #tpu.pipeline_mode<synchronous>, transform_indices = @transform_3, window_bounds = array<i64: 128, 20>}, {pipeline_mode = #tpu.pipeline_mode<synchronous>, transform_indices = @transform_4, window_bounds = array<i64: 1, 20>}, {transform_indices = @transform_5, window_bounds = array<i64: 1, 1, 20>}]} {
    %c0 = arith.constant 0 : index
    %c0_0 = arith.constant 0 : index
    %c0_1 = arith.constant 0 : index
    %c0_2 = arith.constant 0 : index
    %0 = vector.load %arg1[%c0, %c0_0, %c0_1, %c0_2] : memref<1x2x3x256xbf16, #tpu.memory_space<vmem>>, vector<1x2x3x256xbf16>
    %1 = vector.shape_cast %0 : vector<1x2x3x256xbf16> to vector<2x3x256xbf16>
    %cst = arith.constant 0.000000e+00 : bf16
    %2 = vector.broadcast %cst : bf16 to vector<1x3x256xbf16>
    %3 = vector.extract_strided_slice %1 {offsets = [0, 0, 0], sizes = [1, 3, 256], strides = [1, 1, 1]} : vector<2x3x256xbf16> to vector<1x3x256xbf16>
    %4 = tpu.concatenate %2, %3 in 0 : vector<1x3x256xbf16>, vector<1x3x256xbf16> -> vector<2x3x256xbf16>
    %cst_3 = arith.constant 0.000000e+00 : f32
    %5 = vector.broadcast %cst_3 : f32 to vector<4x128xf32>
    %6 = vector.extract_strided_slice %4 {offsets = [0, 0, 0], sizes = [2, 2, 256], strides = [1, 1, 1]} : vector<2x3x256xbf16> to vector<2x2x256xbf16>
    %7 = vector.shape_cast %6 : vector<2x2x256xbf16> to vector<4x256xbf16>
    %c0_4 = arith.constant 0 : index
    %c0_5 = arith.constant 0 : index
    %c0_6 = arith.constant 0 : index
    %8 = vector.load %arg2[%c0_4, %c0_5, %c0_6] : memref<4x256x128xbf16, #tpu.memory_space<vmem>>, vector<1x256x128xbf16>
    %9 = vector.shape_cast %8 : vector<1x256x128xbf16> to vector<256x128xbf16>
    %cst_7 = arith.constant dense<0.000000e+00> : vector<4x128xf32>
    %10 = tpu.matmul %7, %9, %cst_7 {dimension_numbers = #tpu.dot_dimension_numbers<[1], [0], [0], [1], [0, 0, 1, 1], [], []>} : vector<4x256xbf16>, vector<256x128xbf16>, vector<4x128xf32> -> vector<4x128xf32>
    %11 = arith.addf %5, %10 : vector<4x128xf32>
    %12 = vector.extract_strided_slice %4 {offsets = [0, 1, 0], sizes = [2, 2, 256], strides = [1, 1, 1]} : vector<2x3x256xbf16> to vector<2x2x256xbf16>
    %13 = vector.shape_cast %12 : vector<2x2x256xbf16> to vector<4x256xbf16>
    %c1 = arith.constant 1 : index
    %c0_8 = arith.constant 0 : index
    %c0_9 = arith.constant 0 : index
    %14 = vector.load %arg2[%c1, %c0_8, %c0_9] : memref<4x256x128xbf16, #tpu.memory_space<vmem>>, vector<1x256x128xbf16>
    %15 = vector.shape_cast %14 : vector<1x256x128xbf16> to vector<256x128xbf16>
    %cst_10 = arith.constant dense<0.000000e+00> : vector<4x128xf32>
    %16 = tpu.matmul %13, %15, %cst_10 {dimension_numbers = #tpu.dot_dimension_numbers<[1], [0], [0], [1], [0, 0, 1, 1], [], []>} : vector<4x256xbf16>, vector<256x128xbf16>, vector<4x128xf32> -> vector<4x128xf32>
    %17 = arith.addf %11, %16 : vector<4x128xf32>
    %18 = vector.extract_strided_slice %1 {offsets = [0, 0, 0], sizes = [2, 2, 256], strides = [1, 1, 1]} : vector<2x3x256xbf16> to vector<2x2x256xbf16>
    %19 = vector.shape_cast %18 : vector<2x2x256xbf16> to vector<4x256xbf16>
    %c2 = arith.constant 2 : index
    %c0_11 = arith.constant 0 : index
    %c0_12 = arith.constant 0 : index
    %20 = vector.load %arg2[%c2, %c0_11, %c0_12] : memref<4x256x128xbf16, #tpu.memory_space<vmem>>, vector<1x256x128xbf16>
    %21 = vector.shape_cast %20 : vector<1x256x128xbf16> to vector<256x128xbf16>
    %cst_13 = arith.constant dense<0.000000e+00> : vector<4x128xf32>
    %22 = tpu.matmul %19, %21, %cst_13 {dimension_numbers = #tpu.dot_dimension_numbers<[1], [0], [0], [1], [0, 0, 1, 1], [], []>} : vector<4x256xbf16>, vector<256x128xbf16>, vector<4x128xf32> -> vector<4x128xf32>
    %23 = arith.addf %17, %22 : vector<4x128xf32>
    %24 = vector.extract_strided_slice %1 {offsets = [0, 1, 0], sizes = [2, 2, 256], strides = [1, 1, 1]} : vector<2x3x256xbf16> to vector<2x2x256xbf16>
    %25 = vector.shape_cast %24 : vector<2x2x256xbf16> to vector<4x256xbf16>
    %c3 = arith.constant 3 : index
    %c0_14 = arith.constant 0 : index
    %c0_15 = arith.constant 0 : index
    %26 = vector.load %arg2[%c3, %c0_14, %c0_15] : memref<4x256x128xbf16, #tpu.memory_space<vmem>>, vector<1x256x128xbf16>
    %27 = vector.shape_cast %26 : vector<1x256x128xbf16> to vector<256x128xbf16>
    %cst_16 = arith.constant dense<0.000000e+00> : vector<4x128xf32>
    %28 = tpu.matmul %25, %27, %cst_16 {dimension_numbers = #tpu.dot_dimension_numbers<[1], [0], [0], [1], [0, 0, 1, 1], [], []>} : vector<4x256xbf16>, vector<256x128xbf16>, vector<4x128xf32> -> vector<4x128xf32>
    %29 = arith.addf %23, %28 : vector<4x128xf32>
    %cst_17 = arith.constant dense<0.000000e+00> : vector<128xf32>
    %30 = vector.multi_reduction <add>, %29, %cst_17 [0] : vector<4x128xf32> to vector<128xf32>
    %31 = vector.shape_cast %30 : vector<128xf32> to vector<1x128xf32>
    %cst_18 = arith.constant 4.000000e+00 : f32
    %32 = vector.broadcast %cst_18 : f32 to vector<1x128xf32>
    %33 = arith.divf %31, %32 : vector<1x128xf32>
    %c0_19 = arith.constant 0 : index
    %c0_20 = arith.constant 0 : index
    %34 = vector.load %arg3[%c0_19, %c0_20] : memref<1x128xf32, #tpu.memory_space<vmem>>, vector<1x128xf32>
    %35 = arith.addf %33, %34 : vector<1x128xf32>
    %c0_21 = arith.constant 0 : index
    %c0_22 = arith.constant 0 : index
    %36 = vector.load %arg4[%c0_21, %c0_22] : memref<128x20xf32, #tpu.memory_space<vmem>>, vector<128x20xf32>
    %cst_23 = arith.constant dense<0.000000e+00> : vector<1x20xf32>
    %37 = tpu.matmul %35, %36, %cst_23 {dimension_numbers = #tpu.dot_dimension_numbers<[1], [0], [0], [1], [0, 0, 1, 1], [], []>} : vector<1x128xf32>, vector<128x20xf32>, vector<1x20xf32> -> vector<1x20xf32>
    %c0_24 = arith.constant 0 : index
    %c0_25 = arith.constant 0 : index
    %38 = vector.load %arg5[%c0_24, %c0_25] : memref<1x20xf32, #tpu.memory_space<vmem>>, vector<1x20xf32>
    %39 = arith.addf %37, %38 : vector<1x20xf32>
    %40 = arith.negf %39 : vector<1x20xf32>
    %41 = math.exp %40 : vector<1x20xf32>
    %cst_26 = arith.constant 1.000000e+00 : f32
    %42 = vector.broadcast %cst_26 : f32 to vector<1x20xf32>
    %43 = arith.addf %42, %41 : vector<1x20xf32>
    %44 = arith.divf %42, %43 : vector<1x20xf32>
    %45 = vector.shape_cast %44 : vector<1x20xf32> to vector<1x1x20xf32>
    %c0_27 = arith.constant 0 : index
    %c0_28 = arith.constant 0 : index
    %c0_29 = arith.constant 0 : index
    %46 = vector.load %arg6[%c0_27, %c0_28, %c0_29] : memref<1x1x20xf32, #tpu.memory_space<vmem>>, vector<1x1x20xf32>
    tpu.vector_store %arg6[%c0_27, %c0_28, %c0_29], %45 {strides = array<i32>} : memref<1x1x20xf32, #tpu.memory_space<vmem>>, vector<1x1x20xf32>,
    return
  }
  func.func @transform_0(%arg0: i32) -> (i32, i32, i32, i32) {
    %c0_i32 = arith.constant 0 : i32
    %c0_i32_0 = arith.constant 0 : i32
    %c0_i32_1 = arith.constant 0 : i32
    %c0_i32_2 = arith.constant 0 : i32
    return %arg0, %c0_i32, %c0_i32_0, %c0_i32_1 : i32, i32, i32, i32
  }
  func.func @transform_1(%arg0: i32) -> (i32, i32, i32) {
    %c0_i32 = arith.constant 0 : i32
    %c0_i32_0 = arith.constant 0 : i32
    %c0_i32_1 = arith.constant 0 : i32
    %c0_i32_2 = arith.constant 0 : i32
    return %c0_i32, %c0_i32_0, %c0_i32_1 : i32, i32, i32
  }
  func.func @transform_2(%arg0: i32) -> (i32, i32) {
    %c0_i32 = arith.constant 0 : i32
    %c0_i32_0 = arith.constant 0 : i32
    %c0_i32_1 = arith.constant 0 : i32
    return %c0_i32, %c0_i32_0 : i32, i32
  }
  func.func @transform_3(%arg0: i32) -> (i32, i32) {
    %c0_i32 = arith.constant 0 : i32
    %c0_i32_0 = arith.constant 0 : i32
    %c0_i32_1 = arith.constant 0 : i32
    return %c0_i32, %c0_i32_0 : i32, i32
  }
  func.func @transform_4(%arg0: i32) -> (i32, i32) {
    %c0_i32 = arith.constant 0 : i32
    %c0_i32_0 = arith.constant 0 : i32
    %c0_i32_1 = arith.constant 0 : i32
    return %c0_i32, %c0_i32_0 : i32, i32
  }
  func.func @transform_5(%arg0: i32) -> (i32, i32, i32) {
    %c0_i32 = arith.constant 0 : i32
    %c0_i32_0 = arith.constant 0 : i32
    %c0_i32_1 = arith.constant 0 : i32
    return %arg0, %c0_i32, %c0_i32_0 : i32, i32, i32
  }
}

</mosaic_0001>

<bundles_post_ra>
// kernel: point_gen_forward.4
= control target key start
LH: loop header
LB: loop body
LE: loop exit
PB: predicated region body
PF: predicated region fallthrough
CT: control target
= control target key end

     0   :  { %s2595_s17 = smov 0   ;;  %s2597_s18 = smov 0   ;;  %s3350_s0 = inlined_call_operand.<no memory space> [shape: f32[1], index: 0, kind: input, shape index: {}]   ;;  %s3351_s1 = inlined_call_operand.vmem [shape: bf16[2,16,17,12], index: 1, kind: input, shape index: {}]   ;;  %s3352_s2 = inlined_call_operand.vmem [shape: bf16[4,12,16], index: 2, kind: input, shape index: {}]   ;;  %s3353_s3 = inlined_call_operand.vmem [shape: f32[1,16], index: 3, kind: input, shape index: {}]   ;;  %s3354_s4 = inlined_call_operand.vmem [shape: bf16[2,256,16], index: 4, kind: output, shape index: {}]  }
   0x1   :  { %9 = sst [smem:[#allocation3]] %s3350_s0  ;;  %s2599_s19 = smov 0  }
   0x2 LB: > { %s27_s0 = sadd.s32 1, %s2560_s18  ;;  %p2109_p0 = scmp.ge.s32.totalorder %s2564_s19, 1  ;;  %s2564_s19 = sphi %s2599_s19, %s15_s19   ;;  %s2560_s18 = sphi %s2597_s18, %s3396_s18   ;;  %s2556_s17 = sphi %s2595_s17, %s3395_s17  }
   0x3   : > { %p29_p1 = scmp.ge.s32.totalorder %s27_s0, 2  ;;  %p185_p2 = scmp.lt.s32.totalorder %s2564_s19, 3 }
   0x5   : > { %s3398_s0 = smov (%p29_p1, %s27_s0), 0  ;;  %p186_p3 = pnand %p2109_p0, %p185_p2 }
   0x7   : > { %189 = sbr.rel (%p186_p3) target bundleno = 373 (0x175), region = 36 }
   0xc   : > { %vm809_vm0 = vcmask 1045504   ;;  %p221_p4 = scmp.lt.s32.totalorder %s2556_s17, 1  ;;  %v2523_v0 = vld [vmem:[%s3352_s2] sm:$0x3f]   ;;  %v2524_v1 = vld [vmem:[%s3352_s2 + $0x8] sm:$0x3f]  }
   0xd   : > { %vm246_vm1 = vcmask 93184   ;;  %2494 = vmatprep.subr.msk.bf16.mxu1 %vm809_vm0, %v2523_v0  ;;  %v1108_v2 = vsel %vm809_vm0, %v2523_v0, 0  ;;  %v2566_v3 = vmov 0   ;;  %vm249_vm2 = vcmask 90112   ;;  %v252_v4 = vld [vmem:[#allocation2 + $0x8] sm:$0x1]  ;;  %2493 = vmatprep.subr.msk.bf16.mxu0 %vm809_vm0, %v2524_v1 }
   0xe   : > { %s3400_s17 = smov (!%p221_p4, %s2556_s17), 1  ;;  %247 = vst.msk [vmem:[#allocation2] sm:$0xf] %vm246_vm1, %v2566_v3  ;;  %248 = vst.msk [vmem:[#allocation2 + $0x4] sm:$0xf] %vm246_vm1, %v2566_v3  ;;  %2392 = vmatpush3.bf16.msra.mxu1 %v1108_v2  ;;  %v811_v5 = vsel %vm809_vm0, %v2524_v1, 0 }
   0xf   : > { %vm250_vm3 = vsmask.f32 256  ;;  %s2497_s24 = smul.u32 192, %s3400_s17  ;;  %2358 = vmatpush3.bf16.msra.mxu0 %v811_v5  ;;  %v2526_v8 = vld [vmem:[%s3352_s2 + $0x10] sm:$0x3f]   ;;  %vm760_vm7 = vcmask 97280  }
  0x10   : > { %vm2628_vm4 = vmand %vm249_vm2, %vm250_vm3  ;;  %vm317_vm5 = vsmask.f32 3328  ;;  %vm318_vm6 = vsmask.f32 7440  ;;  %2495 = vmatprep.subr.msk.bf16.mxu0 %vm809_vm0, %v2526_v8  ;;  %v2527_v19 = vld [vmem:[%s3352_s2 + $0x18] sm:$0x3f]  }
  0x11   : > { %v253_v7 = vsel %vm2628_vm4, 0, %v252_v4  ;;  %s2637_s27 = scalar_lea.vmem %s3351_s1, %s2497_s24  ;;  %2496 = vmatprep.subr.msk.bf16.mxu1 %vm809_vm0, %v2527_v19  ;;  %vm2666_vm8 = vmor %vm317_vm5, %vm318_vm6  ;;  %v1288_v46 = vsel %vm809_vm0, %v2526_v8, 0  ;;  %v1522_v47 = vsel %vm809_vm0, %v2527_v19, 0  ;;  %s1756_s6 = sld [smem:[#allocation3]]  ;;  %vm1982_vm10 = vcmask 125952  }
  0x12   : > { %254 = vst [vmem:[#allocation2 + $0x8] sm:$0x1] %v253_v7  ;;  %v255_v9 = vld [vmem:[%s2637_s27] sm:$0xf]  ;;  %v2644_v10 = vld [vmem:[%s2637_s27 + $0xb4] sm:$0xf] }
  0x13   : > { %v2647_v11 = vld [vmem:[%s2637_s27 + $0xb8] sm:$0xf]  ;;  %v256_v12 = vld [vmem:[%s2637_s27 + $0x4] sm:$0xf]  ;;  %v345_v13 = vshrl.u32 %v255_v9, 16  ;;  %v348_v14 = vshll.u32 %v255_v9, 16 }
  0x14   : > { %v257_v15 = vld [vmem:[%s2637_s27 + $0x8] sm:$0x1]  ;;  %v354_v16 = vshll.u32 %v256_v12, 16  ;;  %v358_v17 = vshrl.u32 %v256_v12, 16  ;;  %v2655_v24 = vcombine.low %v255_v9, %v256_v12  ;;  %v258_v33 = vld [vmem:[%s2637_s27 + $0xc] sm:$0xf] }
  0x15   : > { %v364_v18 = vshll.u32 %v257_v15, 16  ;;  %v303_v20 = vld [vmem:[#allocation2] sm:$0xf]  ;;  %v304_v21 = vld [vmem:[#allocation2 + $0x4] sm:$0xf]  ;;  %v347_v22 = vrot.slane %v345_v13, 4 }
  0x16   : > { %v350_v23 = vrot.slane %v348_v14, 5  ;;  %307 = vst.msk [vmem:[#allocation2] sm:$0xf] %vm246_vm1, %v2644_v10  ;;  %308 = vst.msk [vmem:[#allocation2 + $0x4] sm:$0xf] %vm246_vm1, %v2647_v11  ;;  %v321_v25 = vshrl.u32 %v303_v20, 16  ;;  %v2148_v28 = vcombine.low %v303_v20, %v304_v21 }
  0x17   : > { %v324_v26 = vshll.u32 %v303_v20, 16  ;;  %v334_v27 = vshrl.u32 %v304_v21, 16  ;;  %v356_v29 = vrot.slane %v354_v16, 5  ;;  %v360_v30 = vrot.slane %v358_v17, 4  ;;  %v259_v44 = vld [vmem:[%s2637_s27 + $0x10] sm:$0xf] }
  0x18   : > { %v330_v31 = vshll.u32 %v304_v21, 16  ;;  %v351_v32 = vor.u32 %v350_v23, %v347_v22  ;;  %2393 = vmatprep.mubr.msk.bf16.mxu1 %vm760_vm7, %v2148_v28  ;;  %v323_v36 = vrot.slane %v321_v25, 4  ;;  %v366_v39 = vrot.slane %v364_v18, 5  ;;  %v261_v57 = vld [vmem:[%s2637_s27 + $0x18] sm:$0xf]  ;;  %s2256_s9 = sshll.u32 %s3400_s17, 7 }
  0x19   : > { %v305_v34 = vld [vmem:[#allocation2 + $0x8] sm:$0x1]  ;;  %v326_v37 = vrot.slane %v324_v26, 5  ;;  %v336_v38 = vrot.slane %v334_v27, 4  ;;  %2394 = vmatmul.mubr.msk.bf16.vlgmr.msra.gmra.mxu1 %vm760_vm7, %v2655_v24  ;;  %v361_v43 = vor.u32 %v360_v30, %v356_v29  ;;  %v369_v48 = vshrl.u32 %v258_v33, 16  ;;  %s3121_s12 = scalar_lea.vmem %s3354_s4, %s2256_s9 }
  0x1a   : > { %v332_v40 = vrot.slane %v330_v31, 5  ;;  %v340_v41 = vshll.u32 %v305_v34, 16  ;;  %v352_v42 = vrot.slane %v351_v32, 4  ;;  %2460 = vmatpush3.bf16.msra.mxu1 %v1522_v47  ;;  %v372_v55 = vshll.u32 %v258_v33, 16  ;;  %v262_v62 = vld [vmem:[%s2637_s27 + $0x1c] sm:$0xf] }
  0x1b   : > { %v327_v45 = vor.u32 %v326_v37, %v323_v36  ;;  %v362_v52 = vrot.slane %v361_v43, 4  ;;  %v371_v54 = vrot.slane %v369_v48, 4  ;;  %v378_v56 = vshll.u32 %v259_v44, 16  ;;  %v260_v3 = vld [vmem:[%s2637_s27 + $0x14] sm:$0x1] }
  0x1c   : > { %v337_v49 = vor.u32 %v336_v38, %v332_v40  ;;  %v342_v50 = vrot.slane %v340_v41, 5  ;;  %v357_v51 = vsel %vm2666_vm8, %v352_v42, %v356_v29  ;;  %v382_v60 = vshrl.u32 %v259_v44, 16  ;;  %v263_v9 = vld [vmem:[%s2637_s27 + $0x20] sm:$0x1]  ;;  %v264_v16 = vld [vmem:[%s2637_s27 + $0x24] sm:$0xf] }
  0x1d   : > { %v328_v53 = vrot.slane %v327_v45, 4  ;;  %v367_v59 = vsel %vm2666_vm8, %v362_v52, %v366_v39  ;;  %v2680_v61 = vcombine.low %v258_v33, %v259_v44  ;;  %v374_v1 = vrot.slane %v372_v55, 5  ;;  %v265_v26 = vld [vmem:[%s2637_s27 + $0x28] sm:$0xf]  ;;  %v268_v45 = vld [vmem:[%s2637_s27 + $0x34] sm:$0xf] }
  0x1e   : > { %v338_v58 = vrot.slane %v337_v49, 4  ;;  %v2685_v0 = vcombine.low %v357_v51, %v367_v59  ;;  %v380_v2 = vrot.slane %v378_v56, 5  ;;  %v384_v5 = vrot.slane %v382_v60, 4  ;;  %v269_v55 = vld [vmem:[%s2637_s27 + $0x38] sm:$0x1] }
  0x1f   : > { %v333_v63 = vsel %vm2666_vm8, %v328_v53, %v332_v40  ;;  %2397 = vmatprep.mubr.msk.bf16.mxu1 %vm760_vm7, %v2680_v61  ;;  %v393_v7 = vshrl.u32 %v261_v57, 16  ;;  %v396_v8 = vshll.u32 %v261_v57, 16  ;;  %v402_v13 = vshll.u32 %v262_v62, 16  ;;  %v267_v40 = vld [vmem:[%s2637_s27 + $0x30] sm:$0xf] }
  0x20   : > { %v343_v4 = vsel %vm2666_vm8, %v338_v58, %v342_v50  ;;  %v406_v14 = vshrl.u32 %v262_v62, 16  ;;  %v2693_v15 = vcombine.low %v261_v57, %v262_v62  ;;  %v375_v19 = vor.u32 %v374_v1, %v371_v54  ;;  %v266_v50 = vld [vmem:[%s2637_s27 + $0x2c] sm:$0x1]  ;;  %v270_v60 = vld [vmem:[%s2637_s27 + $0x3c] sm:$0xf] }
  0x21   : > { %v2115_v12 = vcombine.low %v333_v63, %v343_v4  ;;  %v395_v17 = vrot.slane %v393_v7, 4  ;;  %v398_v18 = vrot.slane %v396_v8, 5  ;;  %v385_v20 = vor.u32 %v384_v5, %v380_v2  ;;  %v271_v8 = vld [vmem:[%s2637_s27 + $0x40] sm:$0xf] }
  0x22   : > { %v404_v21 = vrot.slane %v402_v13, 5  ;;  %v408_v22 = vrot.slane %v406_v14, 4  ;;  %2398 = vmatmul.mubr.msk.bf16.gmra.mxu1 %vm760_vm7, %v2693_v15  ;;  %v388_v23 = vshll.u32 %v260_v3, 16  ;;  %v412_v25 = vshll.u32 %v263_v9, 16 }
  0x23   : > { %2359 = vmatprep.mubr.msk.bf16.mxu0 %vm760_vm7, %v2115_v12  ;;  %v376_v27 = vrot.slane %v375_v19, 4  ;;  %v386_v28 = vrot.slane %v385_v20, 4  ;;  %v399_v29 = vor.u32 %v398_v18, %v395_v17  ;;  %v417_v30 = vshrl.u32 %v264_v16, 16 }
  0x24   : > { %2360 = vmatmul.mubr.msk.bf16.vlgmr.msra.gmra.mxu0 %vm760_vm7, %v2685_v0  ;;  %v390_v31 = vrot.slane %v388_v23, 5  ;;  %v409_v32 = vor.u32 %v408_v22, %v404_v21  ;;  %v414_v33 = vrot.slane %v412_v25, 5  ;;  %v420_v34 = vshll.u32 %v264_v16, 16  ;;  %v273_v25 = vld [vmem:[%s2637_s27 + $0x48] sm:$0xf] }
  0x25   : > { %2426 = vmatpush3.bf16.msra.mxu0 %v1288_v46  ;;  %v381_v36 = vsel %vm2666_vm8, %v376_v27, %v380_v2  ;;  %v400_v37 = vrot.slane %v399_v29, 4  ;;  %v419_v38 = vrot.slane %v417_v30, 4  ;;  %v426_v39 = vshll.u32 %v265_v26, 16  ;;  %v274_v30 = vld [vmem:[%s2637_s27 + $0x4c] sm:$0xf] }
  0x26   : > { %v391_v41 = vsel %vm2666_vm8, %v386_v28, %v390_v31  ;;  %v410_v42 = vrot.slane %v409_v32, 4  ;;  %v422_v43 = vrot.slane %v420_v34, 5  ;;  %v430_v44 = vshrl.u32 %v265_v26, 16 }
  0x27   : > { %v2708_v46 = vcombine.low %v381_v36, %v391_v41  ;;  %v405_v47 = vsel %vm2666_vm8, %v400_v37, %v404_v21  ;;  %v428_v48 = vrot.slane %v426_v39, 5  ;;  %v2712_v49 = vcombine.low %v264_v16, %v265_v26  ;;  %v272_v36 = vld [vmem:[%s2637_s27 + $0x44] sm:$0x1]  ;;  %v275_v41 = vld [vmem:[%s2637_s27 + $0x50] sm:$0x1] }
  0x28   : > { %v415_v51 = vsel %vm2666_vm8, %v410_v42, %v414_v33  ;;  %v432_v52 = vrot.slane %v430_v44, 4  ;;  %v441_v53 = vshrl.u32 %v267_v40, 16  ;;  %v444_v54 = vshll.u32 %v267_v40, 16 }
  0x29   : > { %2363 = vmatprep.mubr.msk.bf16.mxu0 %vm760_vm7, %v2708_v46  ;;  %v2720_v56 = vcombine.low %v405_v47, %v415_v51  ;;  %2401 = vmatprep.mubr.msk.bf16.mxu1 %vm760_vm7, %v2712_v49  ;;  %v450_v57 = vshll.u32 %v268_v45, 16  ;;  %v454_v58 = vshrl.u32 %v268_v45, 16  ;;  %v2724_v59 = vcombine.low %v267_v40, %v268_v45  ;;  %v276_v47 = vld [vmem:[%s2637_s27 + $0x54] sm:$0xf] }
  0x2a   : > { %v443_v62 = vrot.slane %v441_v53, 4  ;;  %v446_v63 = vrot.slane %v444_v54, 5  ;;  %v423_v1 = vor.u32 %v422_v43, %v419_v38  ;;  %v433_v2 = vor.u32 %v432_v52, %v428_v48 }
  0x2b   : > { %v452_v3 = vrot.slane %v450_v57, 5  ;;  %v456_v4 = vrot.slane %v454_v58, 4  ;;  %2402 = vmatmul.mubr.msk.bf16.gmra.mxu1 %vm760_vm7, %v2724_v59  ;;  %v436_v5 = vshll.u32 %v266_v50, 16  ;;  %v460_v7 = vshll.u32 %v269_v55, 16  ;;  %v277_v58 = vld [vmem:[%s2637_s27 + $0x58] sm:$0xf] }
  0x2c   : > { %2364 = vmatmul.mubr.msk.bf16.gmra.mxu0 %vm760_vm7, %v2720_v56  ;;  %v424_v9 = vrot.slane %v423_v1, 4  ;;  %v434_v12 = vrot.slane %v433_v2, 4  ;;  %v447_v13 = vor.u32 %v446_v63, %v443_v62  ;;  %v465_v14 = vshrl.u32 %v270_v60, 16 }
  0x2d   : > { %v438_v16 = vrot.slane %v436_v5, 5  ;;  %v457_v17 = vor.u32 %v456_v4, %v452_v3  ;;  %v462_v18 = vrot.slane %v460_v7, 5  ;;  %v468_v19 = vshll.u32 %v270_v60, 16 }
  0x2e   : > { %v429_v20 = vsel %vm2666_vm8, %v424_v9, %v428_v48  ;;  %v448_v21 = vrot.slane %v447_v13, 4  ;;  %v467_v22 = vrot.slane %v465_v14, 4  ;;  %v474_v23 = vshll.u32 %v271_v8, 16  ;;  %v279_v13 = vld [vmem:[%s2637_s27 + $0x60] sm:$0xf] }
  0x2f   : > { %v439_v26 = vsel %vm2666_vm8, %v434_v12, %v438_v16  ;;  %v458_v27 = vrot.slane %v457_v17, 4  ;;  %v470_v28 = vrot.slane %v468_v19, 5  ;;  %v478_v29 = vshrl.u32 %v271_v8, 16  ;;  %v280_v19 = vld [vmem:[%s2637_s27 + $0x64] sm:$0xf] }
  0x30   : > { %v2738_v31 = vcombine.low %v429_v20, %v439_v26  ;;  %v453_v32 = vsel %vm2666_vm8, %v448_v21, %v452_v3  ;;  %v476_v33 = vrot.slane %v474_v23, 5  ;;  %v2742_v34 = vcombine.low %v270_v60, %v271_v8 }
  0x31   : > { %v463_v37 = vsel %vm2666_vm8, %v458_v27, %v462_v18  ;;  %v480_v38 = vrot.slane %v478_v29, 4  ;;  %v489_v39 = vshrl.u32 %v273_v25, 16  ;;  %v492_v40 = vshll.u32 %v273_v25, 16 }
  0x32   : > { %2367 = vmatprep.mubr.msk.bf16.mxu0 %vm760_vm7, %v2738_v31  ;;  %v2750_v42 = vcombine.low %v453_v32, %v463_v37  ;;  %2405 = vmatprep.mubr.msk.bf16.mxu1 %vm760_vm7, %v2742_v34  ;;  %v498_v43 = vshll.u32 %v274_v30, 16  ;;  %v502_v44 = vshrl.u32 %v274_v30, 16  ;;  %v2754_v45 = vcombine.low %v273_v25, %v274_v30  ;;  %v278_v25 = vld [vmem:[%s2637_s27 + $0x5c] sm:$0x1]  ;;  %v281_v30 = vld [vmem:[%s2637_s27 + $0x68] sm:$0x1] }
  0x33   : > { %v491_v48 = vrot.slane %v489_v39, 4  ;;  %v494_v50 = vrot.slane %v492_v40, 5  ;;  %v471_v51 = vor.u32 %v470_v28, %v467_v22  ;;  %v481_v52 = vor.u32 %v480_v38, %v476_v33  ;;  %v282_v38 = vld [vmem:[%s2637_s27 + $0x6c] sm:$0xf] }
  0x34   : > { %2368 = vmatmul.mubr.msk.bf16.gmra.mxu0 %vm760_vm7, %v2750_v42  ;;  %v500_v53 = vrot.slane %v498_v43, 5  ;;  %v504_v54 = vrot.slane %v502_v44, 4  ;;  %2406 = vmatmul.mubr.msk.bf16.gmra.mxu1 %vm760_vm7, %v2754_v45  ;;  %v484_v55 = vshll.u32 %v272_v36, 16  ;;  %v508_v57 = vshll.u32 %v275_v41, 16 }
  0x35   : > { %v472_v60 = vrot.slane %v471_v51, 4  ;;  %v482_v62 = vrot.slane %v481_v52, 4  ;;  %v495_v63 = vor.u32 %v494_v50, %v491_v48  ;;  %v513_v1 = vshrl.u32 %v276_v47, 16  ;;  %v283_v51 = vld [vmem:[%s2637_s27 + $0x70] sm:$0xf] }
  0x36   : > { %v486_v2 = vrot.slane %v484_v55, 5  ;;  %v505_v3 = vor.u32 %v504_v54, %v500_v53  ;;  %v510_v4 = vrot.slane %v508_v57, 5  ;;  %v516_v5 = vshll.u32 %v276_v47, 16 }
  0x37   : > { %v477_v7 = vsel %vm2666_vm8, %v472_v60, %v476_v33  ;;  %v496_v8 = vrot.slane %v495_v63, 4  ;;  %v515_v9 = vrot.slane %v513_v1, 4  ;;  %v522_v12 = vshll.u32 %v277_v58, 16 }
  0x38   : > { %v487_v14 = vsel %vm2666_vm8, %v482_v62, %v486_v2  ;;  %v506_v16 = vrot.slane %v505_v3, 4  ;;  %v518_v17 = vrot.slane %v516_v5, 5  ;;  %v526_v18 = vshrl.u32 %v277_v58, 16 }
  0x39   : > { %v2768_v20 = vcombine.low %v477_v7, %v487_v14  ;;  %v501_v21 = vsel %vm2666_vm8, %v496_v8, %v500_v53  ;;  %v524_v22 = vrot.slane %v522_v12, 5  ;;  %v2772_v23 = vcombine.low %v276_v47, %v277_v58  ;;  %v286_v12 = vld [vmem:[%s2637_s27 + $0x7c] sm:$0xf] }
  0x3a   : > { %v511_v26 = vsel %vm2666_vm8, %v506_v16, %v510_v4  ;;  %v528_v27 = vrot.slane %v526_v18, 4  ;;  %v537_v28 = vshrl.u32 %v279_v13, 16  ;;  %v540_v29 = vshll.u32 %v279_v13, 16  ;;  %v285_v4 = vld [vmem:[%s2637_s27 + $0x78] sm:$0xf] }
  0x3b   : > { %2371 = vmatprep.mubr.msk.bf16.mxu0 %vm760_vm7, %v2768_v20  ;;  %v2780_v32 = vcombine.low %v501_v21, %v511_v26  ;;  %2409 = vmatprep.mubr.msk.bf16.mxu1 %vm760_vm7, %v2772_v23  ;;  %v546_v33 = vshll.u32 %v280_v19, 16  ;;  %v550_v36 = vshrl.u32 %v280_v19, 16  ;;  %v2784_v37 = vcombine.low %v279_v13, %v280_v19  ;;  %v284_v18 = vld [vmem:[%s2637_s27 + $0x74] sm:$0x1]  ;;  %v287_v26 = vld [vmem:[%s2637_s27 + $0x80] sm:$0x1] }
  0x3c   : > { %v539_v39 = vrot.slane %v537_v28, 4  ;;  %v542_v40 = vrot.slane %v540_v29, 5  ;;  %v519_v41 = vor.u32 %v518_v17, %v515_v9  ;;  %v529_v43 = vor.u32 %v528_v27, %v524_v22 }
  0x3d   : > { %2372 = vmatmul.mubr.msk.bf16.gmra.mxu0 %vm760_vm7, %v2780_v32  ;;  %v548_v44 = vrot.slane %v546_v33, 5  ;;  %v552_v47 = vrot.slane %v550_v36, 4  ;;  %2410 = vmatmul.mubr.msk.bf16.gmra.mxu1 %vm760_vm7, %v2784_v37  ;;  %v532_v48 = vshll.u32 %v278_v25, 16  ;;  %v556_v50 = vshll.u32 %v281_v30, 16  ;;  %v288_v33 = vld [vmem:[%s2637_s27 + $0x84] sm:$0xf] }
  0x3e   : > { %v520_v52 = vrot.slane %v519_v41, 4  ;;  %v530_v53 = vrot.slane %v529_v43, 4  ;;  %v543_v54 = vor.u32 %v542_v40, %v539_v39  ;;  %v561_v55 = vshrl.u32 %v282_v38, 16 }
  0x3f   : > { %v534_v57 = vrot.slane %v532_v48, 5  ;;  %v553_v58 = vor.u32 %v552_v47, %v548_v44  ;;  %v558_v60 = vrot.slane %v556_v50, 5  ;;  %v564_v62 = vshll.u32 %v282_v38, 16  ;;  %v289_v48 = vld [vmem:[%s2637_s27 + $0x88] sm:$0xf] }
  0x40   : > { %v525_v63 = vsel %vm2666_vm8, %v520_v52, %v524_v22  ;;  %v544_v1 = vrot.slane %v543_v54, 4  ;;  %v563_v2 = vrot.slane %v561_v55, 4  ;;  %v570_v3 = vshll.u32 %v283_v51, 16 }
  0x41   : > { %v535_v5 = vsel %vm2666_vm8, %v530_v53, %v534_v57  ;;  %v554_v7 = vrot.slane %v553_v58, 4  ;;  %v566_v8 = vrot.slane %v564_v62, 5  ;;  %v574_v9 = vshrl.u32 %v283_v51, 16 }
  0x42   : > { %v2798_v13 = vcombine.low %v525_v63, %v535_v5  ;;  %v549_v14 = vsel %vm2666_vm8, %v544_v1, %v548_v44  ;;  %v572_v16 = vrot.slane %v570_v3, 5  ;;  %v2802_v17 = vcombine.low %v282_v38, %v283_v51 }
  0x43   : > { %v559_v19 = vsel %vm2666_vm8, %v554_v7, %v558_v60  ;;  %v576_v21 = vrot.slane %v574_v9, 4  ;;  %v585_v22 = vshrl.u32 %v285_v4, 16  ;;  %v588_v25 = vshll.u32 %v285_v4, 16 }
  0x44   : > { %2375 = vmatprep.mubr.msk.bf16.mxu0 %vm760_vm7, %v2798_v13  ;;  %v2810_v27 = vcombine.low %v549_v14, %v559_v19  ;;  %2413 = vmatprep.mubr.msk.bf16.mxu1 %vm760_vm7, %v2802_v17  ;;  %v594_v28 = vshll.u32 %v286_v12, 16  ;;  %v598_v29 = vshrl.u32 %v286_v12, 16  ;;  %v2814_v30 = vcombine.low %v285_v4, %v286_v12 }
  0x45   : > { %v587_v36 = vrot.slane %v585_v22, 4  ;;  %v590_v38 = vrot.slane %v588_v25, 5  ;;  %v567_v39 = vor.u32 %v566_v8, %v563_v2  ;;  %v577_v40 = vor.u32 %v576_v21, %v572_v16  ;;  %v291_v2 = vld [vmem:[%s2637_s27 + $0x90] sm:$0xf]  ;;  %v292_v8 = vld [vmem:[%s2637_s27 + $0x94] sm:$0xf] }
  0x46   : > { %2376 = vmatmul.mubr.msk.bf16.gmra.mxu0 %vm760_vm7, %v2810_v27  ;;  %v596_v41 = vrot.slane %v594_v28, 5  ;;  %v600_v43 = vrot.slane %v598_v29, 4  ;;  %2414 = vmatmul.mubr.msk.bf16.gmra.mxu1 %vm760_vm7, %v2814_v30  ;;  %v580_v44 = vshll.u32 %v284_v18, 16  ;;  %v604_v47 = vshll.u32 %v287_v26, 16  ;;  %v290_v18 = vld [vmem:[%s2637_s27 + $0x8c] sm:$0x1] }
  0x47   : > { %v568_v50 = vrot.slane %v567_v39, 4  ;;  %v578_v51 = vrot.slane %v577_v40, 4  ;;  %v591_v52 = vor.u32 %v590_v38, %v587_v36  ;;  %v609_v53 = vshrl.u32 %v288_v33, 16  ;;  %v293_v26 = vld [vmem:[%s2637_s27 + $0x98] sm:$0x1] }
  0x48   : > { %v582_v54 = vrot.slane %v580_v44, 5  ;;  %v601_v55 = vor.u32 %v600_v43, %v596_v41  ;;  %v606_v57 = vrot.slane %v604_v47, 5  ;;  %v612_v58 = vshll.u32 %v288_v33, 16  ;;  %v294_v38 = vld [vmem:[%s2637_s27 + $0x9c] sm:$0xf] }
  0x49   : > { %v573_v60 = vsel %vm2666_vm8, %v568_v50, %v572_v16  ;;  %v592_v62 = vrot.slane %v591_v52, 4  ;;  %v611_v63 = vrot.slane %v609_v53, 4  ;;  %v618_v1 = vshll.u32 %v289_v48, 16 }
  0x4a   : > { %v583_v3 = vsel %vm2666_vm8, %v578_v51, %v582_v54  ;;  %v602_v4 = vrot.slane %v601_v55, 4  ;;  %v614_v5 = vrot.slane %v612_v58, 5  ;;  %v622_v7 = vshrl.u32 %v289_v48, 16  ;;  %v295_v51 = vld [vmem:[%s2637_s27 + $0xa0] sm:$0xf] }
  0x4b   : > { %v2828_v9 = vcombine.low %v573_v60, %v583_v3  ;;  %v597_v12 = vsel %vm2666_vm8, %v592_v62, %v596_v41  ;;  %v620_v14 = vrot.slane %v618_v1, 5  ;;  %v2832_v16 = vcombine.low %v288_v33, %v289_v48 }
  0x4c   : > { %v607_v19 = vsel %vm2666_vm8, %v602_v4, %v606_v57  ;;  %v624_v21 = vrot.slane %v622_v7, 4  ;;  %v633_v22 = vshrl.u32 %v291_v2, 16  ;;  %v636_v25 = vshll.u32 %v291_v2, 16  ;;  %v297_v4 = vld [vmem:[%s2637_s27 + $0xa8] sm:$0xf] }
  0x4d   : > { %2379 = vmatprep.mubr.msk.bf16.mxu0 %vm760_vm7, %v2828_v9  ;;  %v2840_v28 = vcombine.low %v597_v12, %v607_v19  ;;  %2417 = vmatprep.mubr.msk.bf16.mxu1 %vm760_vm7, %v2832_v16  ;;  %v642_v29 = vshll.u32 %v292_v8, 16  ;;  %v646_v33 = vshrl.u32 %v292_v8, 16  ;;  %v2844_v36 = vcombine.low %v291_v2, %v292_v8 }
  0x4e   : > { %v635_v39 = vrot.slane %v633_v22, 4  ;;  %v638_v40 = vrot.slane %v636_v25, 5  ;;  %v615_v41 = vor.u32 %v614_v5, %v611_v63  ;;  %v625_v43 = vor.u32 %v624_v21, %v620_v14 }
  0x4f   : > { %2380 = vmatmul.mubr.msk.bf16.gmra.mxu0 %vm760_vm7, %v2840_v28  ;;  %v644_v44 = vrot.slane %v642_v29, 5  ;;  %v648_v47 = vrot.slane %v646_v33, 4  ;;  %2418 = vmatmul.mubr.msk.bf16.gmra.mxu1 %vm760_vm7, %v2844_v36  ;;  %v628_v48 = vshll.u32 %v290_v18, 16  ;;  %v652_v50 = vshll.u32 %v293_v26, 16  ;;  %v298_v18 = vld [vmem:[%s2637_s27 + $0xac] sm:$0xf] }
  0x50   : > { %v616_v52 = vrot.slane %v615_v41, 4  ;;  %v626_v53 = vrot.slane %v625_v43, 4  ;;  %v639_v54 = vor.u32 %v638_v40, %v635_v39  ;;  %v657_v55 = vshrl.u32 %v294_v38, 16  ;;  %v299_v40 = vld [vmem:[%s2637_s27 + $0xb0] sm:$0x1] }
  0x51   : > { %v630_v57 = vrot.slane %v628_v48, 5  ;;  %v649_v58 = vor.u32 %v648_v47, %v644_v44  ;;  %v654_v60 = vrot.slane %v652_v50, 5  ;;  %v660_v62 = vshll.u32 %v294_v38, 16  ;;  %v312_v47 = vld [vmem:[#allocation2 + $0x8] sm:$0x1] }
  0x52   : > { %v621_v63 = vsel %vm2666_vm8, %v616_v52, %v620_v14  ;;  %v640_v1 = vrot.slane %v639_v54, 4  ;;  %v659_v2 = vrot.slane %v657_v55, 4  ;;  %v666_v3 = vshll.u32 %v295_v51, 16  ;;  %v296_v14 = vld [vmem:[%s2637_s27 + $0xa4] sm:$0x1] }
  0x53   : > { %v631_v5 = vsel %vm2666_vm8, %v626_v53, %v630_v57  ;;  %v650_v7 = vrot.slane %v649_v58, 4  ;;  %v662_v8 = vrot.slane %v660_v62, 5  ;;  %v670_v12 = vshrl.u32 %v295_v51, 16  ;;  %v302_v58 = vld [vmem:[%s2637_s27 + $0xbc] sm:$0x1] }
  0x54   : > { %v2858_v19 = vcombine.low %v621_v63, %v631_v5  ;;  %v645_v21 = vsel %vm2666_vm8, %v640_v1, %v644_v44  ;;  %v668_v22 = vrot.slane %v666_v3, 5  ;;  %v2862_v25 = vcombine.low %v294_v38, %v295_v51 }
  0x55   : > { %v655_v26 = vsel %vm2666_vm8, %v650_v7, %v654_v60  ;;  %v672_v29 = vrot.slane %v670_v12, 4  ;;  %v681_v33 = vshrl.u32 %v297_v4, 16  ;;  %v684_v39 = vshll.u32 %v297_v4, 16 }
  0x56   : > { %2383 = vmatprep.mubr.msk.bf16.mxu0 %vm760_vm7, %v2858_v19  ;;  %v2870_v41 = vcombine.low %v645_v21, %v655_v26  ;;  %2421 = vmatprep.mubr.msk.bf16.mxu1 %vm760_vm7, %v2862_v25  ;;  %v690_v43 = vshll.u32 %v298_v18, 16  ;;  %v694_v38 = vshrl.u32 %v298_v18, 16  ;;  %v2874_v44 = vcombine.low %v297_v4, %v298_v18 }
  0x57   : > { %v683_v48 = vrot.slane %v681_v33, 4  ;;  %v686_v50 = vrot.slane %v684_v39, 5  ;;  %v663_v51 = vor.u32 %v662_v8, %v659_v2  ;;  %v673_v52 = vor.u32 %v672_v29, %v668_v22 }
  0x58   : > { %2384 = vmatmul.mubr.msk.bf16.gmra.mxu0 %vm760_vm7, %v2870_v41  ;;  %v692_v53 = vrot.slane %v690_v43, 5  ;;  %v696_v54 = vrot.slane %v694_v38, 4  ;;  %2422 = vmatmul.mubr.msk.bf16.gmra.mxu1 %vm760_vm7, %v2874_v44  ;;  %v676_v55 = vshll.u32 %v296_v14, 16  ;;  %v700_v57 = vshll.u32 %v299_v40, 16 }
  0x59   : > { %v664_v60 = vrot.slane %v663_v51, 4  ;;  %v674_v62 = vrot.slane %v673_v52, 4  ;;  %v687_v63 = vor.u32 %v686_v50, %v683_v48  ;;  %2461 = vmatprep.mubr.msk.bf16.mxu1 %vm760_vm7, %v2685_v0  ;;  %v313_v1 = vsel %vm2628_vm4, %v302_v58, %v312_v47 }
  0x5a   : > { %v678_v2 = vrot.slane %v676_v55, 5  ;;  %v697_v3 = vor.u32 %v696_v54, %v692_v53  ;;  %v702_v4 = vrot.slane %v700_v57, 5  ;;  %314 = vst [vmem:[#allocation2 + $0x8] sm:$0x1] %v313_v1 }
  0x5b   : > { %v669_v5 = vsel %vm2666_vm8, %v664_v60, %v668_v22  ;;  %v688_v7 = vrot.slane %v687_v63, 4 }
  0x5c   : > { %v679_v8 = vsel %vm2666_vm8, %v674_v62, %v678_v2  ;;  %v698_v12 = vrot.slane %v697_v3, 4 }
  0x5d   : > { %v2129_v18 = vcombine.low %v669_v5, %v679_v8  ;;  %v693_v21 = vsel %vm2666_vm8, %v688_v7, %v692_v53 }
  0x5e   : > { %v703_v6 = vsel %vm2666_vm8, %v698_v12, %v702_v4 }
  0x5f   : > { %2387 = vmatprep.mubr.msk.bf16.mxu0 %vm760_vm7, %v2129_v18  ;;  %v2130_v0 = vcombine.low %v693_v21, %v703_v6 }
  0x60   : > { %2462 = vmatmul.mubr.msk.bf16.vlgmr.msra.gmra.mxu1 %vm760_vm7, %v2708_v46  ;;  %v1497_v46 = vshrl.u32 %v2647_v11, 16 }
  0x61   : > { %2388 = vmatmul.mubr.msk.bf16.gmra.mxu0 %vm760_vm7, %v2130_v0  ;;  %2465 = vmatprep.mubr.msk.bf16.mxu1 %vm760_vm7, %v2720_v56 }
  0x62   : > { %2427 = vmatprep.mubr.msk.bf16.mxu0 %vm760_vm7, %v2655_v24  ;;  %v1484_v24 = vshrl.u32 %v2644_v10, 16 }
  0x68   : > { %2466 = vmatmul.mubr.msk.bf16.gmra.mxu1 %vm760_vm7, %v2738_v31  ;;  %v1499_v31 = vrot.slane %v1497_v46, 4 }
  0x69   : > { %2428 = vmatmul.mubr.msk.bf16.vlgmr.msra.gmra.mxu0 %vm760_vm7, %v2680_v61  ;;  %2469 = vmatprep.mubr.msk.bf16.mxu1 %vm760_vm7, %v2750_v42  ;;  %v1487_v61 = vshll.u32 %v2644_v10, 16 }
  0x6a   : > { %2431 = vmatprep.mubr.msk.bf16.mxu0 %vm760_vm7, %v2693_v15  ;;  %v1493_v15 = vshll.u32 %v2647_v11, 16 }
  0x6b   : > { %v1489_v56 = vrot.slane %v1487_v61, 5 }
  0x70   : > { %2470 = vmatmul.mubr.msk.bf16.gmra.mxu1 %vm760_vm7, %v2768_v20 }
  0x71   : > { %2432 = vmatmul.mubr.msk.bf16.gmra.mxu0 %vm760_vm7, %v2712_v49  ;;  %2473 = vmatprep.mubr.msk.bf16.mxu1 %vm760_vm7, %v2780_v32  ;;  %v1486_v49 = vrot.slane %v1484_v24, 4 }
  0x72   : > { %2435 = vmatprep.mubr.msk.bf16.mxu0 %vm760_vm7, %v2724_v59  ;;  %v1495_v59 = vrot.slane %v1493_v15, 5 }
  0x74   : > { %v1500_v42 = vor.u32 %v1499_v31, %v1495_v59 }
  0x78   : > { %2474 = vmatmul.mubr.msk.bf16.gmra.mxu1 %vm760_vm7, %v2798_v13 }
  0x79   : > { %2436 = vmatmul.mubr.msk.bf16.gmra.mxu0 %vm760_vm7, %v2742_v34  ;;  %2477 = vmatprep.mubr.msk.bf16.mxu1 %vm760_vm7, %v2810_v27  ;;  %v1490_v34 = vor.u32 %v1489_v56, %v1486_v49  ;;  %v2183_v27 = vcombine.low %v2644_v10, %v2647_v11 }
  0x7a   : > { %2439 = vmatprep.mubr.msk.bf16.mxu0 %vm760_vm7, %v2754_v45  ;;  %v1503_v45 = vshll.u32 %v302_v58, 16 }
  0x7b   : > { %v1491_v20 = vrot.slane %v1490_v34, 4 }
  0x7c   : > { %v1505_v32 = vrot.slane %v1503_v45, 5 }
  0x80   : > { %2478 = vmatmul.mubr.msk.bf16.gmra.mxu1 %vm760_vm7, %v2828_v9 }
  0x81   : > { %2440 = vmatmul.mubr.msk.bf16.gmra.mxu0 %vm760_vm7, %v2772_v23  ;;  %2481 = vmatprep.mubr.msk.bf16.mxu1 %vm760_vm7, %v2840_v28  ;;  %v1501_v23 = vrot.slane %v1500_v42, 4 }
  0x82   : > { %2443 = vmatprep.mubr.msk.bf16.mxu0 %vm760_vm7, %v2784_v37  ;;  %v1496_v37 = vsel %vm2666_vm8, %v1491_v20, %v1495_v59 }
  0x83   : > { %v1506_v13 = vsel %vm2666_vm8, %v1501_v23, %v1505_v32 }
  0x88   : > { %2482 = vmatmul.mubr.msk.bf16.gmra.mxu1 %vm760_vm7, %v2858_v19 }
  0x89   : > { %2444 = vmatmul.mubr.msk.bf16.gmra.mxu0 %vm760_vm7, %v2802_v17  ;;  %2485 = vmatprep.mubr.msk.bf16.mxu1 %vm760_vm7, %v2870_v41  ;;  %v2203_v17 = vcombine.low %v1496_v37, %v1506_v13 }
  0x8a   : > { %2447 = vmatprep.mubr.msk.bf16.mxu0 %vm760_vm7, %v2814_v30 }
  0x90   : > { %2486 = vmatmul.mubr.msk.bf16.gmra.mxu1 %vm760_vm7, %v2129_v18 }
  0x91   : > { %2448 = vmatmul.mubr.msk.bf16.gmra.mxu0 %vm760_vm7, %v2832_v16  ;;  %2489 = vmatprep.mubr.msk.bf16.mxu1 %vm760_vm7, %v2130_v0 }
  0x92   : > { %2451 = vmatprep.mubr.msk.bf16.mxu0 %vm760_vm7, %v2844_v36 }
  0x98   : > { %2490 = vmatmul.mubr.msk.bf16.gmra.mxu1 %vm760_vm7, %v2203_v17 }
  0x99   : > { %2452 = vmatmul.mubr.msk.bf16.gmra.mxu0 %vm760_vm7, %v2862_v25 }
  0x9a   : > { %2455 = vmatprep.mubr.msk.bf16.mxu0 %vm760_vm7, %v2874_v44 }
  0xa1   : > { %2456 = vmatmul.mubr.msk.bf16.gmra.mxu0 %vm760_vm7, %v2183_v27 }
  0xd9   : > { %v2963_v30 = vpop.f32.mrf.mxu1 }
  0xdb   : > { %v2965_v35 = vpop.f32.mrf.mxu1 }
  0xdd   : > { %v2967_v9 = vpop.f32.mrf.mxu1 }
  0xdf   : > { %v2969_v16 = vpop.f32.mrf.mxu1 }
  0xe2   : > { %v2971_v28 = vpop.f32.mrf.mxu1 }
  0xe4   : > { %v2973_v36 = vpop.f32.mrf.mxu0  ;;  %v2975_v19 = vpop.f32.mrf.mxu1 }
  0xe6   : > { %v2977_v22 = vpop.f32.mrf.mxu0  ;;  %v2979_v25 = vpop.f32.mrf.mxu1 }
  0xe8   : > { %v2981_v10 = vpop.f32.mrf.mxu0  ;;  %v2983_v11 = vpop.f32.mrf.mxu1 }
  0xea   : > { %v2985_v14 = vpop.f32.mrf.mxu0 }
  0xeb   : > { %v2989_v29 = vpop.f32.mrf.mxu1 }
  0xec   : > { %v2987_v26 = vpop.f32.mrf.mxu0 }
  0xed   : > { %v2993_v39 = vpop.f32.mrf.mxu1 }
  0xee   : > { %v2991_v33 = vpop.f32.mrf.mxu0 }
  0xef   : > { %v2997_v41 = vpop.f32.mrf.mxu1 }
  0xf0   : > { %v2995_v40 = vpop.f32.mrf.mxu0 }
  0xf1   : > { %v3001_v38 = vpop.f32.mrf.mxu1 }
  0xf2   : > { %v2999_v43 = vpop.f32.mrf.mxu0 }
  0xf4   : > { %v3003_v44 = vpop.f32.mrf.mxu0  ;;  %v3005_v47 = vpop.f32.mrf.mxu1 }
  0xf6   : > { %v3007_v48 = vpop.f32.mrf.mxu0  ;;  %v3009_v50 = vpop.f32.mrf.mxu1 }
  0xf8   : > { %v3011_v51 = vpop.f32.mrf.mxu0  ;;  %v3013_v52 = vpop.f32.mrf.mxu1 }
  0xfa   : > { %v3015_v53 = vpop.f32.mrf.mxu0  ;;  %v3017_v54 = vpop.f32.mrf.mxu1 }
  0xfd   : > { %v3019_v55 = vpop.f32.mrf.mxu0  ;;  %v3021_v57 = vpop.f32.mrf.mxu1 }
  0xff   : > { %v3023_v58 = vpop.f32.mrf.mxu0  ;;  %v3025_v60 = vpop.f32.mrf.mxu1 }
 0x101   : > { %v3027_v62 = vpop.f32.mrf.mxu0  ;;  %v3029_v63 = vpop.f32.mrf.mxu1 }
 0x103   : > { %v3031_v1 = vpop.f32.mrf.mxu0  ;;  %v3033_v2 = vpop.f32.mrf.mxu1 }
 0x106   : > { %v3035_v3 = vpop.f32.mrf.mxu0  ;;  %v3037_v4 = vpop.f32.mrf.mxu1 }
 0x108   : > { %v3039_v5 = vpop.f32.mrf.mxu0  ;;  %v3041_v7 = vpop.f32.mrf.mxu1 }
 0x10a   : > { %v3043_v8 = vpop.f32.mrf.mxu0  ;;  %v3045_v12 = vpop.f32.mrf.mxu1 }
 0x10c   : > { %v3047_v18 = vpop.f32.mrf.mxu0  ;;  %v3049_v21 = vpop.f32.mrf.mxu1 }
 0x10d   : > { %3359 = vst [vmem:[#allocation4_spill] sm:$0xff] %v3049_v21  ;;  %v1148_v21 = vadd.f32 %v2969_v16, %v2985_v14 }
 0x10f   : > { %v3051_v6 = vpop.f32.mrf.mxu0  ;;  %v3053_v0 = vpop.f32.mrf.mxu1 }
 0x110   : > { %3360 = vst [vmem:[#allocation5_spill] sm:$0xff] %v3053_v0 }
 0x111   : > { %v3055_v24 = vpop.f32.mrf.mxu0  ;;  %v3057_v61 = vpop.f32.mrf.mxu1 }
 0x112   : > { %3361 = vst [vmem:[#allocation6_spill] sm:$0xff] %v3057_v61 }
 0x113   : > { %v3059_v15 = vpop.f32.mrf.mxu0  ;;  %v3061_v46 = vpop.f32.mrf.mxu1 }
 0x114   : > { %3362 = vst [vmem:[#allocation7_spill] sm:$0xff] %v3061_v46 }
 0x115   : > { %v3063_v49 = vpop.f32.mrf.mxu0  ;;  %v3065_v56 = vpop.f32.mrf.mxu1 }
 0x116   : > { %3363 = vst [vmem:[#allocation8_spill] sm:$0xff] %v3063_v49  ;;  %3364 = vst [vmem:[#allocation9_spill] sm:$0xff] %v3065_v56 }
 0x118   : > { %v3067_v59 = vpop.f32.mrf.mxu0  ;;  %v3069_v31 = vpop.f32.mrf.mxu1 }
 0x119   : > { %3365 = vst [vmem:[#allocation10_spill] sm:$0xff] %v3067_v59  ;;  %3366 = vst [vmem:[#allocation11_spill] sm:$0xff] %v3069_v31 }
 0x11a   : > { %v3071_v34 = vpop.f32.mrf.mxu0  ;;  %v3073_v42 = vpop.f32.mrf.mxu1 }
 0x11b   : > { %3367 = vst [vmem:[#allocation12_spill] sm:$0xff] %v3071_v34  ;;  %3368 = vst [vmem:[#allocation13_spill] sm:$0xff] %v3073_v42 }
 0x11c   : > { %v3075_v45 = vpop.f32.mrf.mxu0  ;;  %v3077_v20 = vpop.f32.mrf.mxu1 }
 0x11d   : > { %3369 = vst [vmem:[#allocation14_spill] sm:$0xff] %v3075_v45  ;;  %3370 = vst [vmem:[#allocation15_spill] sm:$0xff] %v3077_v20  ;;  %v1153_v20 = vadd.f32 %v2963_v30, %v2973_v36  ;;  %v3102_v36 = vstv %s1756_s6 }
 0x11e   : > { %v3079_v23 = vpop.f32.mrf.mxu0  ;;  %v3081_v32 = vpop.f32.mrf.mxu1 }
 0x11f   : > { %3371 = vst [vmem:[#allocation16_spill] sm:$0xff] %v3079_v23  ;;  %3372 = vst [vmem:[#allocation17_spill] sm:$0xff] %v3081_v32  ;;  %v1145_v32 = vadd.f32 %v2965_v35, %v2977_v22 }
 0x120   : > { %v2463_v37 = vpop.f32.mrf.mxu1 }
 0x121   : > { %v3083_v13 = vpop.f32.mrf.mxu0 }
 0x122   : > { %3373 = vst [vmem:[#allocation18_spill] sm:$0xff] %v3083_v13  ;;  %v1558_v17 = vpop.f32.mrf.mxu1 }
 0x123   : > { %v3085_v27 = vpop.f32.mrf.mxu0 }
 0x124   : > { %3374 = vst [vmem:[#allocation19_spill] sm:$0xff] %v3085_v27  ;;  %v2464_v56 = vpop.f32.mrf.mxu1  ;;  %v3098_v27 = vld [vmem:[%s3353_s3] ss:$0 sm:$0xff] }
 0x125   : > { %v3087_v31 = vpop.f32.mrf.mxu0 }
 0x126   : > { %3375 = vst [vmem:[#allocation20_spill] sm:$0xff] %v3087_v31  ;;  %v1561_v46 = vpop.f32.mrf.mxu1 }
 0x127   : > { %v3089_v42 = vpop.f32.mrf.mxu0 }
 0x128   : > { %3376 = vst [vmem:[#allocation21_spill] sm:$0xff] %v3089_v42  ;;  %v2467_v45 = vpop.f32.mrf.mxu1  ;;  %v1156_v42 = vadd.f32 %v2967_v9, %v2981_v10 }
 0x129   : > { %v2429_v23 = vpop.f32.mrf.mxu0 }
 0x12a   : > { %v1453_v13 = vadd.f32 %v2429_v23, %v1153_v20  ;;  %v1574_v61 = vpop.f32.mrf.mxu1 }
 0x12b   : > { %v1324_v31 = vpop.f32.mrf.mxu0 }
 0x12c   : > { %v1687_v34 = vadd.f32 %v2463_v37, %v1453_v13  ;;  %v1451_v0 = vadd.f32 %v1324_v31, %v1145_v32  ;;  %v2468_v30 = vpop.f32.mrf.mxu1 }
 0x12d   : > { %v2430_v59 = vpop.f32.mrf.mxu0 }
 0x12e   : > { %v1726_v35 = vadd.f32 %v3098_v27, %v1687_v34  ;;  %v1685_v22 = vadd.f32 %v1558_v17, %v1451_v0  ;;  %v1454_v20 = vadd.f32 %v2430_v59, %v1156_v42  ;;  %v3105_v23 = vpop.f32.mrf.mxu1  ;;  %v1169_v34 = vadd.f32 %v2971_v28, %v2987_v26 }
 0x12f   : > { %v1327_v49 = vpop.f32.mrf.mxu0  ;;  %v1161_v0 = vadd.f32 %v2975_v19, %v2991_v33  ;;  %v1172_v28 = vadd.f32 %v2979_v25, %v2995_v40  ;;  %v1164_v25 = vadd.f32 %v2983_v11, %v2999_v43 }
 0x130   : > { %vm1759_vm9 = vcmp.gt.f32.partialorder %v1726_v35, 0.0  ;;  %v1792_v9 = vmul.f32 %v3102_v36, %v1726_v35  ;;  %v1724_v10 = vadd.f32 %v3098_v27, %v1685_v22  ;;  %v1688_v31 = vadd.f32 %v2464_v56, %v1454_v20  ;;  %v3112_v32 = vpop.f32.mrf.mxu1 }
 0x131   : > { %v1452_v59 = vadd.f32 %v1327_v49, %v1148_v21  ;;  %v2433_v42 = vpop.f32.mrf.mxu0 }
 0x132   : > { %v1824_v16 = vsel %vm1759_vm9, %v1726_v35, %v1792_v9  ;;  %vm1757_vm11 = vcmp.gt.f32.partialorder %v1724_v10, 0.0  ;;  %v1790_v14 = vmul.f32 %v3102_v36, %v1724_v10  ;;  %v1727_v56 = vadd.f32 %v3098_v27, %v1688_v31  ;;  %v3125_v37 = vpop.f32.mrf.mxu1 }
 0x133   : > { %v2259_v19 = vpack.c.bf16 %v1824_v16, %v1824_v16  ;;  %v1686_v26 = vadd.f32 %v1561_v46, %v1452_v59  ;;  %v1457_v33 = vadd.f32 %v2433_v42, %v1169_v34  ;;  %v1340_v21 = vpop.f32.mrf.mxu0 }
 0x134   : > { %v1822_v49 = vsel %vm1757_vm11, %v1724_v10, %v1790_v14  ;;  %vm1760_vm12 = vcmp.gt.f32.partialorder %v1727_v56, 0.0  ;;  %v1793_v13 = vmul.f32 %v3102_v36, %v1727_v56  ;;  %v1455_v17 = vadd.f32 %v1340_v21, %v1161_v0  ;;  %v2472_v35 = vpop.f32.mrf.mxu1 }
 0x135   : > { %1985 = vst.msk [vmem:[%s3121_s12 + $0x8] sm:$0xf] %vm1982_vm10, %v2259_v19  ;;  %v2257_v22 = vpack.c.bf16 %v1822_v49, %v1822_v49  ;;  %v1725_v20 = vadd.f32 %v3098_v27, %v1686_v26  ;;  %v1691_v9 = vadd.f32 %v2467_v45, %v1457_v33  ;;  %v2434_v31 = vpop.f32.mrf.mxu0  ;;  %v1185_v45 = vadd.f32 %v2989_v29, %v3003_v44 }
 0x136   : > { %v1825_v40 = vsel %vm1760_vm12, %v1727_v56, %v1793_v13  ;;  %v1689_v46 = vadd.f32 %v1574_v61, %v1455_v17  ;;  %v1458_v34 = vadd.f32 %v2434_v31, %v1172_v28  ;;  %v3135_v10 = vpop.f32.mrf.mxu1  ;;  %v1177_v56 = vadd.f32 %v2993_v39, %v3007_v48 }
 0x137   : > { %1983 = vst.msk [vmem:[%s3121_s12] sm:$0xf] %vm1982_vm10, %v2257_v22  ;;  %v2260_v0 = vpack.c.bf16 %v1825_v40, %v1825_v40  ;;  %vm1758_vm13 = vcmp.gt.f32.partialorder %v1725_v20, 0.0  ;;  %v1791_v59 = vmul.f32 %v3102_v36, %v1725_v20  ;;  %v1730_v42 = vadd.f32 %v3098_v27, %v1691_v9  ;;  %v1343_v16 = vpop.f32.mrf.mxu0 }
 0x138   : > { %v1728_v11 = vadd.f32 %v3098_v27, %v1689_v46  ;;  %v1692_v43 = vadd.f32 %v2468_v30, %v1458_v34  ;;  %v1456_v14 = vadd.f32 %v1343_v16, %v1164_v25  ;;  %v3144_v61 = vpop.f32.mrf.mxu1  ;;  %v1188_v21 = vadd.f32 %v2997_v41, %v3011_v51 }
 0x139   : > { %1986 = vst.msk [vmem:[%s3121_s12 + $0xc] sm:$0xf] %vm1982_vm10, %v2260_v0  ;;  %v1823_v28 = vsel %vm1758_vm13, %v1725_v20, %v1791_v59  ;;  %vm1763_vm14 = vcmp.gt.f32.partialorder %v1730_v42, 0.0  ;;  %v1796_v19 = vmul.f32 %v3102_v36, %v1730_v42  ;;  %v2437_v26 = vpop.f32.mrf.mxu0 }
 0x13a   : > { %v2258_v33 = vpack.c.bf16 %v1823_v28, %v1823_v28  ;;  %vm1761_vm15 = vcmp.gt.f32.partialorder %v1728_v11, 0.0  ;;  %v1794_v29 = vmul.f32 %v3102_v36, %v1728_v11  ;;  %v1731_v44 = vadd.f32 %v3098_v27, %v1692_v43  ;;  %v3153_v30 = vpop.f32.mrf.mxu1 }
 0x13b   : > { %v1828_v39 = vsel %vm1763_vm14, %v1730_v42, %v1796_v19  ;;  %v1690_v48 = vadd.f32 %v3105_v23, %v1456_v14  ;;  %v1461_v49 = vadd.f32 %v2437_v26, %v1185_v45  ;;  %v1356_v13 = vpop.f32.mrf.mxu0  ;;  %v1180_v23 = vadd.f32 %v3001_v38, %v3015_v53 }
 0x13c   : > { %1984 = vst.msk [vmem:[%s3121_s12 + $0x4] sm:$0xf] %vm1982_vm10, %v2258_v33  ;;  %v2263_v17 = vpack.c.bf16 %v1828_v39, %v1828_v39  ;;  %v1826_v22 = vsel %vm1761_vm15, %v1728_v11, %v1794_v29  ;;  %vm1764_vm0 = vcmp.gt.f32.partialorder %v1731_v44, 0.0  ;;  %v1797_v20 = vmul.f32 %v3102_v36, %v1731_v44  ;;  %v2476_v9 = vpop.f32.mrf.mxu1 }
 0x13d   : > { %v2261_v31 = vpack.c.bf16 %v1826_v22, %v1826_v22  ;;  %v1729_v25 = vadd.f32 %v3098_v27, %v1690_v48  ;;  %v1695_v41 = vadd.f32 %v3112_v32, %v1461_v49  ;;  %v1459_v51 = vadd.f32 %v1356_v13, %v1177_v56  ;;  %v2438_v40 = vpop.f32.mrf.mxu0 }
 0x13e   : > { %1989 = vst.msk [vmem:[%s3121_s12 + $0x18] sm:$0xf] %vm1982_vm10, %v2263_v17  ;;  %v1829_v46 = vsel %vm1764_vm0, %v1731_v44, %v1797_v20  ;;  %v1462_v34 = vadd.f32 %v2438_v40, %v1188_v21  ;;  %v3167_v0 = vpop.f32.mrf.mxu1  ;;  %v1201_v43 = vadd.f32 %v3005_v47, %v3019_v55  ;;  %v1193_v47 = vadd.f32 %v3009_v50, %v3023_v58 }
 0x13f   : > { %1987 = vst.msk [vmem:[%s3121_s12 + $0x10] sm:$0xf] %vm1982_vm10, %v2261_v31  ;;  %v2264_v59 = vpack.c.bf16 %v1829_v46, %v1829_v46  ;;  %vm1762_vm1 = vcmp.gt.f32.partialorder %v1729_v25, 0.0  ;;  %v1795_v42 = vmul.f32 %v3102_v36, %v1729_v25  ;;  %v1734_v32 = vadd.f32 %v3098_v27, %v1695_v41  ;;  %v1359_v16 = vpop.f32.mrf.mxu0 }
 0x140   : > { %v1693_v45 = vadd.f32 %v3125_v37, %v1459_v51  ;;  %v1696_v11 = vadd.f32 %v2472_v35, %v1462_v34  ;;  %v1460_v38 = vadd.f32 %v1359_v16, %v1180_v23  ;;  %v3174_v53 = vpop.f32.mrf.mxu1  ;;  %v1204_v55 = vadd.f32 %v3013_v52, %v3027_v62 }
 0x141   : > { %1990 = vst.msk [vmem:[%s3121_s12 + $0x1c] sm:$0xf] %vm1982_vm10, %v2264_v59  ;;  %v1827_v14 = vsel %vm1762_vm1, %v1729_v25, %v1795_v42  ;;  %vm1767_vm2 = vcmp.gt.f32.partialorder %v1734_v32, 0.0  ;;  %v1800_v56 = vmul.f32 %v3102_v36, %v1734_v32  ;;  %v2441_v28 = vpop.f32.mrf.mxu0  ;;  %v1196_v13 = vadd.f32 %v3017_v54, %v3031_v1 }
 0x142   : > { %v2262_v19 = vpack.c.bf16 %v1827_v14, %v1827_v14  ;;  %v1732_v26 = vadd.f32 %v3098_v27, %v1693_v45  ;;  %v1735_v37 = vadd.f32 %v3098_v27, %v1696_v11  ;;  %v1694_v35 = vadd.f32 %v3135_v10, %v1460_v38  ;;  %v3184_v33 = vpop.f32.mrf.mxu1 }
 0x143   : > { %v1832_v29 = vsel %vm1767_vm2, %v1734_v32, %v1800_v56  ;;  %v1465_v44 = vadd.f32 %v2441_v28, %v1201_v43  ;;  %v1372_v21 = vpop.f32.mrf.mxu0  ;;  %v1217_v17 = vadd.f32 %v3021_v57, %v3035_v3  ;;  %v1209_v23 = vadd.f32 %v3025_v60, %v3039_v5 }
 0x144   : > { %1988 = vst.msk [vmem:[%s3121_s12 + $0x14] sm:$0xf] %vm1982_vm10, %v2262_v19  ;;  %v2267_v39 = vpack.c.bf16 %v1832_v29, %v1832_v29  ;;  %vm1765_vm3 = vcmp.gt.f32.partialorder %v1732_v26, 0.0  ;;  %v1798_v48 = vmul.f32 %v3102_v36, %v1732_v26  ;;  %vm1768_vm4 = vcmp.gt.f32.partialorder %v1735_v37, 0.0  ;;  %v3193_v10 = vpop.f32.mrf.mxu1 }
 0x145   : > { %v1801_v49 = vmul.f32 %v3102_v36, %v1735_v37  ;;  %v1733_v50 = vadd.f32 %v3098_v27, %v1694_v35  ;;  %v1699_v58 = vadd.f32 %v3144_v61, %v1465_v44  ;;  %v1463_v52 = vadd.f32 %v1372_v21, %v1193_v47  ;;  %v2442_v62 = vpop.f32.mrf.mxu0 }
 0x146   : > { %1993 = vst.msk [vmem:[%s3121_s12 + $0x28] sm:$0xf] %vm1982_vm10, %v2267_v39  ;;  %v1830_v22 = vsel %vm1765_vm3, %v1732_v26, %v1798_v48  ;;  %v1466_v20 = vadd.f32 %v2442_v62, %v1204_v55  ;;  %v3204_v31 = vpop.f32.mrf.mxu1  ;;  %v1220_v46 = vadd.f32 %v3029_v63, %v3043_v8  ;;  %v1212_v60 = vadd.f32 %v3033_v2, %v3047_v18 }
 0x147   : > { %v2265_v25 = vpack.c.bf16 %v1830_v22, %v1830_v22  ;;  %v1833_v41 = vsel %vm1768_vm4, %v1735_v37, %v1801_v49  ;;  %vm1766_vm5 = vcmp.gt.f32.partialorder %v1733_v50, 0.0  ;;  %v1799_v61 = vmul.f32 %v3102_v36, %v1733_v50  ;;  %v1375_v51 = vpop.f32.mrf.mxu0 }
 0x148   : > { %v2268_v40 = vpack.c.bf16 %v1833_v41, %v1833_v41  ;;  %v1738_v54 = vadd.f32 %v3098_v27, %v1699_v58  ;;  %v1697_v1 = vadd.f32 %v3153_v30, %v1463_v52  ;;  %v1700_v57 = vadd.f32 %v2476_v9, %v1466_v20  ;;  %v3209_v3 = vpop.f32.mrf.mxu1  ;;  %v3378_v41 = vld [vmem:[#allocation4_spill] sm:$0xff] }
 0x149   : > { %1991 = vst.msk [vmem:[%s3121_s12 + $0x20] sm:$0xf] %vm1982_vm10, %v2265_v25  ;;  %v1831_v34 = vsel %vm1766_vm5, %v1733_v50, %v1799_v61  ;;  %v1464_v59 = vadd.f32 %v1375_v51, %v1196_v13  ;;  %v2445_v42 = vpop.f32.mrf.mxu0  ;;  %v1233_v49 = vadd.f32 %v3037_v4, %v3051_v6  ;;  %v1225_v50 = vadd.f32 %v3041_v7, %v3055_v24  ;;  %v3377_v25 = vld [vmem:[#allocation8_spill] sm:$0xff] }
 0x14a   : > { %1994 = vst.msk [vmem:[%s3121_s12 + $0x2c] sm:$0xf] %vm1982_vm10, %v2268_v40  ;;  %v2266_v32 = vpack.c.bf16 %v1831_v34, %v1831_v34  ;;  %vm1771_vm6 = vcmp.gt.f32.partialorder %v1738_v54, 0.0  ;;  %v1804_v30 = vmul.f32 %v3102_v36, %v1738_v54  ;;  %v1736_v9 = vadd.f32 %v3098_v27, %v1697_v1  ;;  %v3221_v16 = vpop.f32.mrf.mxu1 }
 0x14b   : > { %v1739_v63 = vadd.f32 %v3098_v27, %v1700_v57  ;;  %v1698_v5 = vadd.f32 %v3167_v0, %v1464_v59  ;;  %v1469_v8 = vadd.f32 %v2445_v42, %v1217_v17  ;;  %v1388_v45 = vpop.f32.mrf.mxu0  ;;  %v1236_v20 = vadd.f32 %v3045_v12, %v3059_v15  ;;  %v3379_v59 = vld [vmem:[#allocation10_spill] sm:$0xff]  ;;  %v3380_v42 = vld [vmem:[#allocation5_spill] sm:$0xff] }
 0x14c   : > { %1992 = vst.msk [vmem:[%s3121_s12 + $0x24] sm:$0xf] %vm1982_vm10, %v2266_v32  ;;  %v1836_v11 = vsel %vm1771_vm6, %v1738_v54, %v1804_v30  ;;  %vm1769_vm7 = vcmp.gt.f32.partialorder %v1736_v9, 0.0  ;;  %v1802_v38 = vmul.f32 %v3102_v36, %v1736_v9  ;;  %v1467_v43 = vadd.f32 %v1388_v45, %v1209_v23  ;;  %v3230_v14 = vpop.f32.mrf.mxu1  ;;  %v3381_v30 = vld [vmem:[#allocation12_spill] sm:$0xff] }
 0x14d   : > { %v2271_v56 = vpack.c.bf16 %v1836_v11, %v1836_v11  ;;  %vm1772_vm8 = vcmp.gt.f32.partialorder %v1739_v63, 0.0  ;;  %v1805_v2 = vmul.f32 %v3102_v36, %v1739_v63  ;;  %v1737_v18 = vadd.f32 %v3098_v27, %v1698_v5  ;;  %v2446_v28 = vpop.f32.mrf.mxu0  ;;  %v3383_v11 = vld [vmem:[#allocation14_spill] sm:$0xff] }
 0x14e   : > { %v1834_v0 = vsel %vm1769_vm7, %v1736_v9, %v1802_v38  ;;  %v1703_v19 = vadd.f32 %v3174_v53, %v1469_v8  ;;  %v1701_v26 = vadd.f32 %v3184_v33, %v1467_v43  ;;  %v1470_v37 = vadd.f32 %v2446_v28, %v1220_v46  ;;  %v3236_v35 = vpop.f32.mrf.mxu1  ;;  %v3382_v9 = vld [vmem:[#allocation6_spill] sm:$0xff]  ;;  %v3384_v38 = vld [vmem:[#allocation7_spill] sm:$0xff] }
 0x14f   : > { %1997 = vst.msk [vmem:[%s3121_s12 + $0x38] sm:$0xf] %vm1982_vm10, %v2271_v56  ;;  %v2269_v47 = vpack.c.bf16 %v1834_v0, %v1834_v0  ;;  %v1837_v55 = vsel %vm1772_vm8, %v1739_v63, %v1805_v2  ;;  %vm1770_vm9 = vcmp.gt.f32.partialorder %v1737_v18, 0.0  ;;  %v1803_v29 = vmul.f32 %v3102_v36, %v1737_v18  ;;  %v1391_v44 = vpop.f32.mrf.mxu0 }
 0x150   : > { %v2272_v21 = vpack.c.bf16 %v1837_v55, %v1837_v55  ;;  %v1742_v39 = vadd.f32 %v3098_v27, %v1703_v19  ;;  %v1740_v53 = vadd.f32 %v3098_v27, %v1701_v26  ;;  %v1704_v33 = vadd.f32 %v3193_v10, %v1470_v37  ;;  %v2487_v48 = vpop.f32.mrf.mxu1 }
 0x151   : > { %1995 = vst.msk [vmem:[%s3121_s12 + $0x30] sm:$0xf] %vm1982_vm10, %v2269_v47  ;;  %v1835_v58 = vsel %vm1770_vm9, %v1737_v18, %v1803_v29  ;;  %v1468_v52 = vadd.f32 %v1391_v44, %v1212_v60  ;;  %v2449_v62 = vpop.f32.mrf.mxu0  ;;  %v1228_v61 = vadd.f32 %v3378_v41, %v3377_v25  ;;  %v1249_v32 = vadd.f32 %v3380_v42, %v3379_v59 }
 0x152   : > { %1998 = vst.msk [vmem:[%s3121_s12 + $0x3c] sm:$0xf] %vm1982_vm10, %v2272_v21  ;;  %v2270_v13 = vpack.c.bf16 %v1835_v58, %v1835_v58  ;;  %vm1775_vm11 = vcmp.gt.f32.partialorder %v1742_v39, 0.0  ;;  %v1808_v17 = vmul.f32 %v3102_v36, %v1742_v39  ;;  %vm1773_vm12 = vcmp.gt.f32.partialorder %v1740_v53, 0.0  ;;  %v1654_v10 = vpop.f32.mrf.mxu1 }
 0x153   : > { %v1806_v22 = vmul.f32 %v3102_v36, %v1740_v53  ;;  %v1743_v4 = vadd.f32 %v3098_v27, %v1704_v33  ;;  %v1702_v7 = vadd.f32 %v3204_v31, %v1468_v52  ;;  %v1473_v6 = vadd.f32 %v2449_v62, %v1233_v49  ;;  %v1404_v24 = vpop.f32.mrf.mxu0 }
 0x154   : > { %1996 = vst.msk [vmem:[%s3121_s12 + $0x34] sm:$0xf] %vm1982_vm10, %v2270_v13  ;;  %v1840_v51 = vsel %vm1775_vm11, %v1742_v39, %v1808_v17  ;;  %v1471_v40 = vadd.f32 %v1404_v24, %v1225_v50  ;;  %v2488_v23 = vpop.f32.mrf.mxu1  ;;  %v1241_v60 = vadd.f32 %v3382_v9, %v3381_v30  ;;  %v1252_v43 = vadd.f32 %v3384_v38, %v3383_v11  ;;  %v3394_v11 = vld [vmem:[#allocation17_spill] sm:$0xff] }
 0x155   : > { %v2275_v54 = vpack.c.bf16 %v1840_v51, %v1840_v51  ;;  %v1838_v1 = vsel %vm1773_vm12, %v1740_v53, %v1806_v22  ;;  %vm1776_vm13 = vcmp.gt.f32.partialorder %v1743_v4, 0.0  ;;  %v1809_v57 = vmul.f32 %v3102_v36, %v1743_v4  ;;  %v2450_v31 = vpop.f32.mrf.mxu0 }
 0x156   : > { %v2273_v46 = vpack.c.bf16 %v1838_v1, %v1838_v1  ;;  %v1741_v34 = vadd.f32 %v3098_v27, %v1702_v7  ;;  %v1707_v12 = vadd.f32 %v3209_v3, %v1473_v6  ;;  %v1705_v15 = vadd.f32 %v3221_v16, %v1471_v40  ;;  %v1657_v0 = vpop.f32.mrf.mxu1  ;;  %v3387_v7 = vld [vmem:[#allocation18_spill] sm:$0xff]  ;;  %v3388_v6 = vld [vmem:[#allocation11_spill] sm:$0xff] }
 0x157   : > { %2001 = vst.msk [vmem:[%s3121_s12 + $0x48] sm:$0xf] %vm1982_vm10, %v2275_v54  ;;  %v1841_v63 = vsel %vm1776_vm13, %v1743_v4, %v1809_v57  ;;  %v1474_v5 = vadd.f32 %v2450_v31, %v1236_v20  ;;  %v1407_v8 = vpop.f32.mrf.mxu0  ;;  %v3386_v4 = vld [vmem:[#allocation9_spill] sm:$0xff]  ;;  %v1265_v24 = vadd.f32 %v3388_v6, %v3387_v7 }
 0x158   : > { %1999 = vst.msk [vmem:[%s3121_s12 + $0x40] sm:$0xf] %vm1982_vm10, %v2273_v46  ;;  %v2276_v45 = vpack.c.bf16 %v1841_v63, %v1841_v63  ;;  %vm1774_vm14 = vcmp.gt.f32.partialorder %v1741_v34, 0.0  ;;  %v1807_v3 = vmul.f32 %v3102_v36, %v1741_v34  ;;  %v1746_v16 = vadd.f32 %v3098_v27, %v1707_v12  ;;  %v2491_v52 = vpop.f32.mrf.mxu1  ;;  %v3389_v46 = vld [vmem:[#allocation19_spill] sm:$0xff] }
 0x159   : > { %v1744_v56 = vadd.f32 %v3098_v27, %v1705_v15  ;;  %v1708_v2 = vadd.f32 %v3230_v14, %v1474_v5  ;;  %v1472_v18 = vadd.f32 %v1407_v8, %v1228_v61  ;;  %v2453_v28 = vpop.f32.mrf.mxu0  ;;  %v3391_v8 = vld [vmem:[#allocation20_spill] sm:$0xff] }
 0x15a   : > { %2002 = vst.msk [vmem:[%s3121_s12 + $0x4c] sm:$0xf] %vm1982_vm10, %v2276_v45  ;;  %v1839_v19 = vsel %vm1774_vm14, %v1741_v34, %v1807_v3  ;;  %vm1779_vm15 = vcmp.gt.f32.partialorder %v1746_v16, 0.0  ;;  %v1812_v26 = vmul.f32 %v3102_v36, %v1746_v16  ;;  %v1477_v37 = vadd.f32 %v2453_v28, %v1249_v32  ;;  %v1670_v57 = vpop.f32.mrf.mxu1  ;;  %v3390_v34 = vld [vmem:[#allocation13_spill] sm:$0xff]  ;;  %v3392_v45 = vld [vmem:[#allocation15_spill] sm:$0xff] }
 0x15b   : > { %v2274_v47 = vpack.c.bf16 %v1839_v19, %v1839_v19  ;;  %vm1777_vm0 = vcmp.gt.f32.partialorder %v1744_v56, 0.0  ;;  %v1810_v55 = vmul.f32 %v3102_v36, %v1744_v56  ;;  %v1747_v29 = vadd.f32 %v3098_v27, %v1708_v2  ;;  %v1420_v44 = vpop.f32.mrf.mxu0 }
 0x15c   : > { %v1844_v21 = vsel %vm1779_vm15, %v1746_v16, %v1812_v26  ;;  %v1706_v14 = vadd.f32 %v3236_v35, %v1472_v18  ;;  %v1711_v39 = vadd.f32 %v2487_v48, %v1477_v37  ;;  %v1475_v53 = vadd.f32 %v1420_v44, %v1241_v60  ;;  %v3385_v35 = vld [vmem:[#allocation16_spill] sm:$0xff]  ;;  %v3393_v16 = vld [vmem:[#allocation21_spill] sm:$0xff] }
 0x15d   : > { %2000 = vst.msk [vmem:[%s3121_s12 + $0x44] sm:$0xf] %vm1982_vm10, %v2274_v47  ;;  %v2279_v33 = vpack.c.bf16 %v1844_v21, %v1844_v21  ;;  %v1842_v49 = vsel %vm1777_vm0, %v1744_v56, %v1810_v55  ;;  %vm1780_vm1 = vcmp.gt.f32.partialorder %v1747_v29, 0.0  ;;  %v1813_v50 = vmul.f32 %v3102_v36, %v1747_v29  ;;  %v2454_v58 = vpop.f32.mrf.mxu0  ;;  %v2492_v56 = vpop.f32.mrf.mxu1 }
 0x15e   : > { %v2277_v62 = vpack.c.bf16 %v1842_v49, %v1842_v49  ;;  %v1745_v13 = vadd.f32 %v3098_v27, %v1706_v14  ;;  %v1750_v17 = vadd.f32 %v3098_v27, %v1711_v39  ;;  %v1709_v22 = vadd.f32 %v1654_v10, %v1475_v53 }
 0x15f   : > { %v1244_v48 = vadd.f32 %v3386_v4, %v3385_v35  ;;  %2005 = vst.msk [vmem:[%s3121_s12 + $0x58] sm:$0xf] %vm1982_vm10, %v2279_v33  ;;  %v1845_v20 = vsel %vm1780_vm1, %v1747_v29, %v1813_v50  ;;  %v1478_v25 = vadd.f32 %v2454_v58, %v1252_v43  ;;  %v1423_v41 = vpop.f32.mrf.mxu0  ;;  %v1257_v12 = vadd.f32 %v3390_v34, %v3389_v46  ;;  %v1673_v33 = vpop.f32.mrf.mxu1 }
 0x160   : > { %2003 = vst.msk [vmem:[%s3121_s12 + $0x50] sm:$0xf] %vm1982_vm10, %v2277_v62  ;;  %v2280_v61 = vpack.c.bf16 %v1845_v20, %v1845_v20  ;;  %vm1778_vm2 = vcmp.gt.f32.partialorder %v1745_v13, 0.0  ;;  %v1811_v51 = vmul.f32 %v3102_v36, %v1745_v13  ;;  %vm1783_vm3 = vcmp.gt.f32.partialorder %v1750_v17, 0.0 }
 0x161   : > { %v1816_v10 = vmul.f32 %v3102_v36, %v1750_v17  ;;  %v1748_v40 = vadd.f32 %v3098_v27, %v1709_v22  ;;  %v1712_v54 = vadd.f32 %v2488_v23, %v1478_v25  ;;  %v1476_v1 = vadd.f32 %v1423_v41, %v1244_v48  ;;  %v2457_v31 = vpop.f32.mrf.mxu0 }
 0x162   : > { %2006 = vst.msk [vmem:[%s3121_s12 + $0x5c] sm:$0xf] %vm1982_vm10, %v2280_v61  ;;  %v1843_v15 = vsel %vm1778_vm2, %v1745_v13, %v1811_v51  ;;  %v1481_v59 = vadd.f32 %v2457_v31, %v1265_v24  ;;  %v1268_v3 = vadd.f32 %v3392_v45, %v3391_v8  ;;  %v1260_v38 = vadd.f32 %v3394_v11, %v3393_v16 }
 0x163   : > { %v2278_v42 = vpack.c.bf16 %v1843_v15, %v1843_v15  ;;  %v1848_v32 = vsel %vm1783_vm3, %v1750_v17, %v1816_v10  ;;  %vm1781_vm4 = vcmp.gt.f32.partialorder %v1748_v40, 0.0  ;;  %v1814_v30 = vmul.f32 %v3102_v36, %v1748_v40  ;;  %v1436_v9 = vpop.f32.mrf.mxu0 }
 0x164   : > { %v2283_v60 = vpack.c.bf16 %v1848_v32, %v1848_v32  ;;  %v1751_v23 = vadd.f32 %v3098_v27, %v1712_v54  ;;  %v1710_v63 = vadd.f32 %v1657_v0, %v1476_v1  ;;  %v1715_v5 = vadd.f32 %v2491_v52, %v1481_v59 }
 0x165   : > { %2004 = vst.msk [vmem:[%s3121_s12 + $0x54] sm:$0xf] %vm1982_vm10, %v2278_v42  ;;  %v1846_v43 = vsel %vm1781_vm4, %v1748_v40, %v1814_v30  ;;  %v1479_v2 = vadd.f32 %v1436_v9, %v1257_v12  ;;  %v2458_v18 = vpop.f32.mrf.mxu0 }
 0x166   : > { %2009 = vst.msk [vmem:[%s3121_s12 + $0x68] sm:$0xf] %vm1982_vm10, %v2283_v60  ;;  %v2281_v28 = vpack.c.bf16 %v1846_v43, %v1846_v43  ;;  %vm1784_vm5 = vcmp.gt.f32.partialorder %v1751_v23, 0.0  ;;  %v1817_v0 = vmul.f32 %v3102_v36, %v1751_v23  ;;  %v1749_v19 = vadd.f32 %v3098_v27, %v1710_v63 }
 0x167   : > { %v1754_v26 = vadd.f32 %v3098_v27, %v1715_v5  ;;  %v1713_v37 = vadd.f32 %v1670_v57, %v1479_v2  ;;  %v1482_v47 = vadd.f32 %v2458_v18, %v1268_v3  ;;  %v1439_v55 = vpop.f32.mrf.mxu0 }
 0x168   : > { %2007 = vst.msk [vmem:[%s3121_s12 + $0x60] sm:$0xf] %vm1982_vm10, %v2281_v28  ;;  %v1849_v29 = vsel %vm1784_vm5, %v1751_v23, %v1817_v0  ;;  %vm1782_vm6 = vcmp.gt.f32.partialorder %v1749_v19, 0.0  ;;  %v1815_v44 = vmul.f32 %v3102_v36, %v1749_v19  ;;  %v1480_v21 = vadd.f32 %v1439_v55, %v1260_v38 }
 0x169   : > { %v2284_v14 = vpack.c.bf16 %v1849_v29, %v1849_v29  ;;  %vm1787_vm7 = vcmp.gt.f32.partialorder %v1754_v26, 0.0  ;;  %v1820_v39 = vmul.f32 %v3102_v36, %v1754_v26  ;;  %v1752_v53 = vadd.f32 %v3098_v27, %v1713_v37 }
 0x16a   : > { %v1847_v49 = vsel %vm1782_vm6, %v1749_v19, %v1815_v44  ;;  %v1716_v50 = vadd.f32 %v2492_v56, %v1482_v47  ;;  %v1714_v58 = vadd.f32 %v1673_v33, %v1480_v21 }
 0x16b   : > { %2010 = vst.msk [vmem:[%s3121_s12 + $0x6c] sm:$0xf] %vm1982_vm10, %v2284_v14  ;;  %v2282_v52 = vpack.c.bf16 %v1847_v49, %v1847_v49  ;;  %v1852_v62 = vsel %vm1787_vm7, %v1754_v26, %v1820_v39  ;;  %vm1785_vm8 = vcmp.gt.f32.partialorder %v1752_v53, 0.0  ;;  %v1818_v13 = vmul.f32 %v3102_v36, %v1752_v53 }
 0x16c   : > { %v2287_v17 = vpack.c.bf16 %v1852_v62, %v1852_v62  ;;  %v1755_v22 = vadd.f32 %v3098_v27, %v1716_v50  ;;  %v1753_v35 = vadd.f32 %v3098_v27, %v1714_v58 }
 0x16d   : > { %2008 = vst.msk [vmem:[%s3121_s12 + $0x64] sm:$0xf] %vm1982_vm10, %v2282_v52  ;;  %v1850_v4 = vsel %vm1785_vm8, %v1752_v53, %v1818_v13 }
 0x16e   : > { %2013 = vst.msk [vmem:[%s3121_s12 + $0x78] sm:$0xf] %vm1982_vm10, %v2287_v17  ;;  %v2285_v48 = vpack.c.bf16 %v1850_v4, %v1850_v4  ;;  %vm1788_vm9 = vcmp.gt.f32.partialorder %v1755_v22, 0.0  ;;  %v1821_v7 = vmul.f32 %v3102_v36, %v1755_v22  ;;  %vm1786_vm11 = vcmp.gt.f32.partialorder %v1753_v35, 0.0 }
 0x16f   : > { %v1819_v6 = vmul.f32 %v3102_v36, %v1753_v35 }
 0x170   : > { %2011 = vst.msk [vmem:[%s3121_s12 + $0x70] sm:$0xf] %vm1982_vm10, %v2285_v48  ;;  %v1853_v24 = vsel %vm1788_vm9, %v1755_v22, %v1821_v7 }
 0x171   : > { %v2288_v20 = vpack.c.bf16 %v1853_v24, %v1853_v24  ;;  %v1851_v25 = vsel %vm1786_vm11, %v1753_v35, %v1819_v6 }
 0x172   : > { %v2286_v41 = vpack.c.bf16 %v1851_v25, %v1851_v25 }
 0x173   : > { %2014 = vst.msk [vmem:[%s3121_s12 + $0x7c] sm:$0xf] %vm1982_vm10, %v2288_v20 }
 0x174   : > { %2012 = vst.msk [vmem:[%s3121_s12 + $0x74] sm:$0xf] %vm1982_vm10, %v2286_v41 }
 0x175 PF: > { %s15_s19 = sadd.s32 1, %s2564_s19   ;;  %s3395_s17 = smov %s2560_s18 }
 0x176   : > { %p12_p5 = scmp.ge.s32.totalorder %s15_s19, 4   ;;  %s3396_s18 = smov %s3398_s0 }
 0x178   :  { %14 = sbr.rel (!%p12_p5) target bundleno = 2 (0x2), region = 73 }

// kernel: point_gen_forward.5
= control target key start
LH: loop header
LB: loop body
LE: loop exit
PB: predicated region body
PF: predicated region fallthrough
CT: control target
= control target key end

     0   :  { %s1377_s17 = smov 0   ;;  %s1379_s18 = smov 0   ;;  %s1631_s0 = inlined_call_operand.<no memory space> [shape: f32[1], index: 0, kind: input, shape index: {}]   ;;  %s1632_s1 = inlined_call_operand.vmem [shape: bf16[2,8,9,64], index: 1, kind: input, shape index: {}]   ;;  %s1633_s2 = inlined_call_operand.vmem [shape: bf16[4,64,32], index: 2, kind: input, shape index: {}]   ;;  %s1634_s3 = inlined_call_operand.vmem [shape: f32[1,32], index: 3, kind: input, shape index: {}]   ;;  %s1635_s4 = inlined_call_operand.vmem [shape: bf16[2,64,32], index: 4, kind: output, shape index: {}]  }
   0x1   :  { %9 = sst [smem:[#allocation3]] %s1631_s0  ;;  %s1381_s19 = smov 0  }
   0x2 LB: > { %s27_s0 = sadd.s32 1, %s1342_s18  ;;  %p1084_p0 = scmp.ge.s32.totalorder %s1346_s19, 1  ;;  %s1346_s19 = sphi %s1381_s19, %s15_s19   ;;  %s1342_s18 = sphi %s1379_s18, %s1641_s18   ;;  %s1338_s17 = sphi %s1377_s17, %s1640_s17  }
   0x3   : > { %p29_p1 = scmp.ge.s32.totalorder %s27_s0, 2  ;;  %p185_p2 = scmp.lt.s32.totalorder %s1346_s19, 3 }
   0x5   : > { %s1643_s0 = smov (%p29_p1, %s27_s0), 0  ;;  %p186_p3 = pnand %p1084_p0, %p185_p2 }
   0x6   : > { %p221_p4 = scmp.lt.s32.totalorder (!%p186_p3), %s1338_s17, 1  ;;  %s923_s7 = sld [smem:[#allocation3]] (!%p186_p3) }
   0x7   : > { %189 = sbr.rel (%p186_p3) target bundleno = 273 (0x111), region = 36 }
   0xc   : > { %v1303_v0 = vld [vmem:[%s1633_s2 + $0x18] sm:$0xff]   ;;  %vm246_vm0 = vcmask 519168   ;;  %v1305_v2 = vld [vmem:[%s1633_s2 + $0x10] sm:$0xff]   ;;  %s1645_s17 = smov (!%p221_p4, %s1338_s17), 1  ;;  %v1307_v4 = vld [vmem:[%s1633_s2 + $0x8] sm:$0xff]   ;;  %v1348_v5 = vmov 0  }
   0xd   : > { %v1304_v1 = vld [vmem:[%s1633_s2 + $0x38] sm:$0xff]   ;;  %1230 = vmatprep.subr.bf16.mxu1 %v1303_v0  ;;  %v1306_v3 = vld [vmem:[%s1633_s2 + $0x30] sm:$0xff]   ;;  %s1172_s30 = sshll.u32 %s1645_s17, 6  ;;  %247 = vst.msk [vmem:[#allocation2] sm:$0xf] %vm246_vm0, %v1348_v5  ;;  %v1308_v6 = vld [vmem:[%s1633_s2 + $0x28] sm:$0xff]  }
   0xe   : > { %1214 = vmatprep.subr.bf16.mxu0 %v1304_v1  ;;  %1231 = vmatpush3.bf16.msra.mxu1 %v1303_v0  ;;  %s1420_s9 = scalar_lea.vmem %s1632_s1, %s1172_s30  ;;  %vm448_vm1 = vcmask 523264   ;;  %v1309_v7 = vld [vmem:[%s1633_s2] sm:$0xff]   ;;  %vm248_vm2 = vcmask 516096   ;;  %vm249_vm3 = vsmask.f32 256  ;;  %v1312_v22 = vld [vmem:[%s1633_s2 + $0x78] sm:$0xff]  }
   0xf   : > { %1215 = vmatpush3.bf16.msra.mxu0 %v1304_v1  ;;  %1232 = vmatprep.subr.bf16.mxu1 %v1305_v2  ;;  %v1426_v8 = vld [vmem:[%s1420_s9] sm:$0xf]  ;;  %v1429_v9 = vld [vmem:[%s1420_s9 + $0x8] sm:$0xf]  ;;  %v1435_v11 = vld [vmem:[%s1420_s9 + $0x38] sm:$0xf] }
  0x10   : > { %1216 = vmatprep.subr.bf16.mxu0 %v1306_v3  ;;  %v1310_v10 = vld [vmem:[%s1633_s2 + $0x20] sm:$0xff]   ;;  %v306_v12 = vshrl.u32 %v1426_v8, 16  ;;  %v309_v13 = vshll.u32 %v1426_v8, 16  ;;  %v320_v14 = vshrl.u32 %v1429_v9, 16  ;;  %v1441_v16 = vld [vmem:[%s1420_s9 + $0x10] sm:$0xf]  ;;  %vm1443_vm4 = vmand %vm248_vm2, %vm249_vm3 }
  0x11   : > { %v251_v18 = vld [vmem:[#allocation2 + $0x4] sm:$0x1]  ;;  %vm288_vm5 = vsmask.f32 3328  ;;  %v257_v25 = vld [vmem:[%s1420_s9 + $0xc] sm:$0x1]  ;;  %v1110_v28 = vcombine.low %v1429_v9, %v1441_v16 }
  0x12   : > { %1233 = vmatpush3.bf16.msra.mxu1 %v1305_v2  ;;  %v252_v23 = vsel %vm1443_vm4, 0, %v251_v18  ;;  %v255_v24 = vld [vmem:[%s1420_s9 + $0x4] sm:$0x1]  ;;  %v259_v26 = vld [vmem:[%s1420_s9 + $0x14] sm:$0x1]  ;;  %v1461_v27 = vld [vmem:[%s1633_s2 + $0x58] sm:$0xff]  }
  0x13   : > { %1217 = vmatpush3.bf16.msra.mxu0 %v1306_v3  ;;  %1234 = vmatprep.subr.bf16.mxu1 %v1307_v4  ;;  %253 = vst [vmem:[#allocation2 + $0x4] sm:$0x1] %v252_v23  ;;  %v1467_v29 = vld [vmem:[%s1420_s9 + $0x18] sm:$0xf]  ;;  %vm289_vm6 = vsmask.f32 7440 }
  0x14   : > { %1218 = vmatprep.subr.bf16.mxu0 %v1308_v6  ;;  %v270_v15 = vld [vmem:[#allocation2] sm:$0xf]  ;;  %v261_v32 = vld [vmem:[%s1420_s9 + $0x1c] sm:$0x1]  ;;  %v308_v33 = vrot.slane %v306_v12, 4  ;;  %v311_v34 = vrot.slane %v309_v13, 5  ;;  %vm1480_vm7 = vmor %vm288_vm5, %vm289_vm6 }
  0x15   : > { %273 = vst.msk [vmem:[#allocation2] sm:$0xf] %vm246_vm0, %v1435_v11  ;;  %v292_v19 = vshrl.u32 %v270_v15, 16  ;;  %v295_v20 = vshll.u32 %v270_v15, 16  ;;  %v1109_v21 = vcombine.low %v270_v15, %v1426_v8  ;;  %v315_v35 = vshll.u32 %v255_v24, 16  ;;  %v1314_v41 = vld [vmem:[%s1633_s2 + $0x70] sm:$0xff]  }
  0x16   : > { %1235 = vmatpush3.bf16.msra.mxu1 %v1307_v4  ;;  %v322_v36 = vrot.slane %v320_v14, 4  ;;  %v323_v38 = vshll.u32 %v1429_v9, 16  ;;  %v329_v39 = vshll.u32 %v257_v25, 16  ;;  %v334_v40 = vshrl.u32 %v1441_v16, 16  ;;  %v1487_v62 = vld [vmem:[%s1420_s9 + $0x20] sm:$0xf] }
  0x17   : > { %1219 = vmatpush3.bf16.msra.mxu0 %v1308_v6  ;;  %1236 = vmatprep.subr.bf16.mxu1 %v1309_v7  ;;  %v294_v30 = vrot.slane %v292_v19, 4  ;;  %v297_v31 = vrot.slane %v295_v20, 5  ;;  %v312_v42 = vor.u32 %v311_v34, %v308_v33  ;;  %v317_v43 = vrot.slane %v315_v35, 5  ;;  %v1490_v63 = vld [vmem:[%s1420_s9 + $0x28] sm:$0xf]  ;;  %v1315_v23 = vld [vmem:[%s1633_s2 + $0x50] sm:$0xff]  }
  0x18   : > { %1220 = vmatprep.subr.bf16.mxu0 %v1310_v10  ;;  %1238 = vmatprep.mubr.msk.bf16.mxu1 %vm448_vm1, %v1109_v21  ;;  %v337_v44 = vshll.u32 %v1441_v16, 16  ;;  %v343_v45 = vshll.u32 %v259_v26, 16  ;;  %v325_v47 = vrot.slane %v323_v38, 5  ;;  %v331_v48 = vrot.slane %v329_v39, 5  ;;  %v1498_v4 = vld [vmem:[%s1420_s9 + $0x30] sm:$0xf] }
  0x19   : > { %v298_v37 = vor.u32 %v297_v31, %v294_v30  ;;  %v336_v49 = vrot.slane %v334_v40, 4  ;;  %v313_v51 = vrot.slane %v312_v42, 4  ;;  %v348_v54 = vshrl.u32 %v1467_v29, 16  ;;  %v1318_v12 = vld [vmem:[%s1633_s2 + $0x68] sm:$0xff]   ;;  %v263_v19 = vld [vmem:[%s1420_s9 + $0x24] sm:$0x1] }
  0x1a   : > { %1237 = vmatpush3.bf16.msra.mxu1 %v1309_v7  ;;  %v339_v52 = vrot.slane %v337_v44, 5  ;;  %v345_v53 = vrot.slane %v343_v45, 5  ;;  %v271_v55 = vld [vmem:[#allocation2 + $0x4] sm:$0x1]  ;;  %v326_v56 = vor.u32 %v325_v47, %v322_v36  ;;  %v351_v57 = vshll.u32 %v1467_v29, 16  ;;  %s1173_s10 = sshll.u32 %s1645_s17, 5 }
  0x1b   : > { %1221 = vmatpush3.bf16.msra.mxu0 %v1310_v10  ;;  %1262 = vmatprep.subr.bf16.mxu1 %v1312_v22  ;;  %v299_v46 = vrot.slane %v298_v37, 4  ;;  %v357_v58 = vshll.u32 %v261_v32, 16  ;;  %v301_v59 = vshll.u32 %v271_v55, 16  ;;  %v350_v61 = vrot.slane %v348_v54, 4  ;;  %v265_v31 = vld [vmem:[%s1420_s9 + $0x2c] sm:$0x1]  ;;  %s1591_s13 = scalar_lea.vmem %s1635_s4, %s1173_s10 }
  0x1c   : > { %1246 = vmatprep.subr.bf16.mxu0 %v1461_v27  ;;  %v340_v60 = vor.u32 %v339_v52, %v336_v49  ;;  %v1494_v0 = vsel %vm1480_vm7, %v313_v51, %v317_v43  ;;  %v327_v1 = vrot.slane %v326_v56, 4  ;;  %v353_v2 = vrot.slane %v351_v57, 5  ;;  %v267_v32 = vld [vmem:[%s1420_s9 + $0x34] sm:$0x1]  ;;  %v1320_v37 = vld [vmem:[%s1633_s2 + $0x60] sm:$0xff]  }
  0x1d   : > { %1239 = vmatmul.mubr.msk.bf16.vlgmr.msra.gmra.mxu1 %vm448_vm1, %v1110_v28  ;;  %v362_v3 = vshrl.u32 %v1487_v62, 16  ;;  %v303_v5 = vrot.slane %v301_v59, 5  ;;  %v365_v7 = vshll.u32 %v1487_v62, 16  ;;  %v1111_v10 = vcombine.low %v1467_v29, %v1487_v62  ;;  %v269_v52 = vld [vmem:[%s1420_s9 + $0x3c] sm:$0x1]  ;;  %v1321_v17 = vld [vmem:[%s1633_s2 + $0x40] sm:$0xff]  }
  0x1e   : > { %1263 = vmatpush3.bf16.msra.mxu1 %v1312_v22  ;;  %v341_v6 = vrot.slane %v340_v60, 4  ;;  %v332_v13 = vsel %vm1480_vm7, %v327_v1, %v331_v48  ;;  %v354_v14 = vor.u32 %v353_v2, %v350_v61  ;;  %v376_v15 = vshrl.u32 %v1490_v63, 16  ;;  %v277_v54 = vld [vmem:[#allocation2 + $0x4] sm:$0x1] }
  0x1f   : > { %1264 = vmatprep.subr.bf16.mxu1 %v1314_v41  ;;  %v379_v18 = vshll.u32 %v1490_v63, 16  ;;  %v304_v20 = vsel %vm1480_vm7, %v299_v46, %v303_v5  ;;  %v359_v22 = vrot.slane %v357_v58, 5  ;;  %1242 = vmatprep.mubr.msk.bf16.mxu1 %vm448_vm1, %v1111_v10  ;;  %v390_v24 = vshrl.u32 %v1498_v4, 16  ;;  %v1319_v46 = vld [vmem:[%s1633_s2 + $0x48] sm:$0xff]  }
  0x20   : > { %v1515_v21 = vsel %vm1480_vm7, %v341_v6, %v345_v53  ;;  %v355_v25 = vrot.slane %v354_v14, 4  ;;  %v1097_v26 = vcombine.low %v304_v20, %v1494_v0  ;;  %v393_v30 = vshll.u32 %v1498_v4, 16 }
  0x21   : > { %v1098_v28 = vcombine.low %v332_v13, %v1515_v21  ;;  %v1112_v33 = vcombine.low %v1490_v63, %v1498_v4  ;;  %v364_v34 = vrot.slane %v362_v3, 4  ;;  %v367_v35 = vrot.slane %v365_v7, 5 }
  0x22   : > { %1265 = vmatpush3.bf16.msra.mxu1 %v1314_v41  ;;  %v371_v36 = vshll.u32 %v263_v19, 16  ;;  %1222 = vmatprep.mubr.msk.bf16.mxu0 %vm448_vm1, %v1097_v26  ;;  %v1149_v38 = vcombine.low %v1494_v0, %v332_v13  ;;  %v378_v39 = vrot.slane %v376_v15, 4  ;;  %v381_v40 = vrot.slane %v379_v18, 5 }
  0x23   : > { %1266 = vmatprep.subr.bf16.mxu1 %v1318_v12  ;;  %v385_v41 = vshll.u32 %v265_v31, 16  ;;  %v360_v42 = vsel %vm1480_vm7, %v355_v25, %v359_v22  ;;  %1223 = vmatmul.mubr.msk.bf16.vlgmr.msra.gmra.mxu0 %vm448_vm1, %v1098_v28  ;;  %v368_v43 = vor.u32 %v367_v35, %v364_v34  ;;  %v392_v45 = vrot.slane %v390_v24, 4 }
  0x24   : > { %v373_v44 = vrot.slane %v371_v36, 5  ;;  %1247 = vmatpush3.bf16.msra.mxu0 %v1461_v27  ;;  %v382_v47 = vor.u32 %v381_v40, %v378_v39  ;;  %v395_v49 = vrot.slane %v393_v30, 5  ;;  %v399_v51 = vshll.u32 %v267_v32, 16 }
  0x25   : > { %1243 = vmatmul.mubr.msk.bf16.gmra.mxu1 %vm448_vm1, %v1112_v33  ;;  %v387_v48 = vrot.slane %v385_v41, 5  ;;  %1248 = vmatprep.subr.bf16.mxu0 %v1315_v23  ;;  %v369_v53 = vrot.slane %v368_v43, 4  ;;  %v772_v55 = vshrl.u32 %v1435_v11, 16  ;;  %v775_v56 = vshll.u32 %v1435_v11, 16  ;;  %v1580_v41 = vld [vmem:[%s1634_s3] ss:$0 sm:$0xff] }
  0x26   : > { %1267 = vmatpush3.bf16.msra.mxu1 %v1318_v12  ;;  %v781_v57 = vshll.u32 %v269_v52, 16  ;;  %v383_v27 = vrot.slane %v382_v47, 4  ;;  %v396_v58 = vor.u32 %v395_v49, %v392_v45  ;;  %v401_v59 = vrot.slane %v399_v51, 5  ;;  %1270 = vmatprep.mubr.msk.bf16.mxu1 %vm448_vm1, %v1149_v38 }
  0x27   : > { %1268 = vmatprep.subr.bf16.mxu1 %v1320_v37  ;;  %v278_v60 = vsel %vm1443_vm4, %v269_v52, %v277_v54  ;;  %v1150_v61 = vcombine.low %v1515_v21, %v360_v42  ;;  %v374_v0 = vsel %vm1480_vm7, %v369_v53, %v373_v44  ;;  %v774_v1 = vrot.slane %v772_v55, 4 }
  0x28   : > { %279 = vst [vmem:[#allocation2 + $0x4] sm:$0x1] %v278_v60  ;;  %v777_v2 = vrot.slane %v775_v56, 5  ;;  %1249 = vmatpush3.bf16.msra.mxu0 %v1315_v23  ;;  %v1099_v3 = vcombine.low %v360_v42, %v374_v0  ;;  %v388_v5 = vsel %vm1480_vm7, %v383_v27, %v387_v48  ;;  %v397_v6 = vrot.slane %v396_v58, 4 }
  0x29   : > { %1250 = vmatprep.subr.bf16.mxu0 %v1319_v46  ;;  %v1151_v7 = vcombine.low %v374_v0, %v388_v5  ;;  %v783_v12 = vrot.slane %v781_v57, 5  ;;  %v1129_v14 = vcombine.low %v1426_v8, %v1429_v9  ;;  %v1130_v8 = vcombine.low %v1441_v16, %v1467_v29 }
  0x2a   : > { %1269 = vmatpush3.bf16.msra.mxu1 %v1320_v37  ;;  %v778_v10 = vor.u32 %v777_v2, %v774_v1  ;;  %1226 = vmatprep.mubr.msk.bf16.mxu0 %vm448_vm1, %v1099_v3  ;;  %v402_v13 = vsel %vm1480_vm7, %v397_v6, %v401_v59  ;;  %v1131_v9 = vcombine.low %v1487_v62, %v1490_v63  ;;  %vm981_vm9 = vcmask 257024  }
  0x2b   : > { %v1100_v15 = vcombine.low %v388_v5, %v402_v13  ;;  %v1132_v50 = vcombine.low %v1498_v4, %v1435_v11 }
  0x2c   : > { %v779_v18 = vrot.slane %v778_v10, 4  ;;  %1251 = vmatpush3.bf16.msra.mxu0 %v1319_v46  ;;  %v1582_v46 = vstv %s923_s7 }
  0x2d   : > { %1271 = vmatmul.mubr.msk.bf16.vlgmr.msra.gmra.mxu1 %vm448_vm1, %v1150_v61  ;;  %1227 = vmatmul.mubr.msk.bf16.gmra.mxu0 %vm448_vm1, %v1100_v15 }
  0x2e   : > { %1274 = vmatprep.mubr.msk.bf16.mxu1 %vm448_vm1, %v1151_v7  ;;  %1252 = vmatprep.subr.bf16.mxu0 %v1321_v17  ;;  %v784_v19 = vsel %vm1480_vm7, %v779_v18, %v783_v12 }
  0x2f   : > { %1254 = vmatprep.mubr.msk.bf16.mxu0 %vm448_vm1, %v1129_v14  ;;  %v1152_v20 = vcombine.low %v402_v13, %v784_v19 }
  0x30   : > { %1253 = vmatpush3.bf16.msra.mxu0 %v1321_v17 }
  0x35   : > { %1275 = vmatmul.mubr.msk.bf16.gmra.mxu1 %vm448_vm1, %v1152_v20  ;;  %1255 = vmatmul.mubr.msk.bf16.vlgmr.msra.gmra.mxu0 %vm448_vm1, %v1130_v8 }
  0x36   : > { %1258 = vmatprep.mubr.msk.bf16.mxu0 %vm448_vm1, %v1131_v9 }
  0x3d   : > { %1259 = vmatmul.mubr.msk.bf16.gmra.mxu0 %vm448_vm1, %v1132_v50 }
  0xdd   : > { %v1240_v21 = vpop.f32.mrf.mxu1 }
  0xdf   : > { %v616_v22 = vpop.f32.mrf.mxu1 }
  0xe1   : > { %v1241_v23 = vpop.f32.mrf.mxu1 }
  0xe3   : > { %v619_v24 = vpop.f32.mrf.mxu1  ;;  %v1224_v25 = vpop.f32.mrf.mxu0 }
  0xe4   : > { %v625_v36 = vadd.f32 %v1240_v21, %v1224_v25 }
  0xe5   : > { %v1244_v16 = vpop.f32.mrf.mxu1  ;;  %v495_v29 = vpop.f32.mrf.mxu0 }
  0xe6   : > { %v617_v38 = vadd.f32 %v616_v22, %v495_v29 }
  0xe7   : > { %v632_v26 = vpop.f32.mrf.mxu1  ;;  %v1225_v62 = vpop.f32.mrf.mxu0 }
  0xe8   : > { %v628_v43 = vadd.f32 %v1241_v23, %v1225_v62 }
  0xe9   : > { %v1245_v63 = vpop.f32.mrf.mxu1  ;;  %v498_v28 = vpop.f32.mrf.mxu0 }
  0xea   : > { %v620_v53 = vadd.f32 %v619_v24, %v498_v28 }
  0xeb   : > { %v635_v30 = vpop.f32.mrf.mxu1 }
  0xed   : > { %v1272_v31 = vpop.f32.mrf.mxu1  ;;  %v1228_v32 = vpop.f32.mrf.mxu0 }
  0xee   : > { %v641_v27 = vadd.f32 %v1244_v16, %v1228_v32 }
  0xef   : > { %v869_v33 = vpop.f32.mrf.mxu1  ;;  %v511_v34 = vpop.f32.mrf.mxu0 }
  0xf0   : > { %v633_v58 = vadd.f32 %v632_v26, %v511_v34 }
  0xf1   : > { %v1229_v35 = vpop.f32.mrf.mxu0  ;;  %v1273_v11 = vpop.f32.mrf.mxu1 }
  0xf2   : > { %v644_v3 = vadd.f32 %v1245_v63, %v1229_v35 }
  0xf3   : > { %v514_v4 = vpop.f32.mrf.mxu0  ;;  %v872_v40 = vpop.f32.mrf.mxu1 }
  0xf4   : > { %v636_v20 = vadd.f32 %v635_v30, %v514_v4 }
  0xf5   : > { %v1256_v37 = vpop.f32.mrf.mxu0  ;;  %v1276_v52 = vpop.f32.mrf.mxu1 }
  0xf6   : > { %v765_v39 = vadd.f32 %v1256_v37, %v625_v36 }
  0xf7   : > { %v732_v42 = vpop.f32.mrf.mxu0  ;;  %v885_v2 = vpop.f32.mrf.mxu1 }
  0xf8   : > { %v902_v44 = vadd.f32 %v1272_v31, %v765_v39  ;;  %v763_v45 = vadd.f32 %v732_v42, %v617_v38 }
  0xf9   : > { %v1257_v47 = vpop.f32.mrf.mxu0  ;;  %v1277_v50 = vpop.f32.mrf.mxu1 }
  0xfa   : > { %v917_v48 = vadd.f32 %v1580_v41, %v902_v44  ;;  %v900_v49 = vadd.f32 %v869_v33, %v763_v45  ;;  %v766_v51 = vadd.f32 %v1257_v47, %v628_v43 }
  0xfb   : > { %v735_v54 = vpop.f32.mrf.mxu0  ;;  %v888_v32 = vpop.f32.mrf.mxu1 }
  0xfc   : > { %vm926_vm8 = vcmp.gt.f32.partialorder %v917_v48, 0.0  ;;  %v935_v55 = vmul.f32 %v1582_v46, %v917_v48  ;;  %v915_v56 = vadd.f32 %v1580_v41, %v900_v49  ;;  %v903_v57 = vadd.f32 %v1273_v11, %v766_v51 }
  0xfd   : > { %v764_v59 = vadd.f32 %v735_v54, %v620_v53  ;;  %v1260_v60 = vpop.f32.mrf.mxu0 }
  0xfe   : > { %v943_v61 = vsel %vm926_vm8, %v917_v48, %v935_v55  ;;  %vm924_vm10 = vcmp.gt.f32.partialorder %v915_v56, 0.0  ;;  %v933_v0 = vmul.f32 %v1582_v46, %v915_v56  ;;  %v918_v1 = vadd.f32 %v1580_v41, %v903_v57 }
  0xff   : > { %v1176_v5 = vpack.c.bf16 %v943_v61, %v943_v61  ;;  %v901_v6 = vadd.f32 %v872_v40, %v764_v59  ;;  %v769_v17 = vadd.f32 %v1260_v60, %v641_v27  ;;  %v748_v7 = vpop.f32.mrf.mxu0 }
 0x100   : > { %v941_v10 = vsel %vm924_vm10, %v915_v56, %v933_v0  ;;  %vm927_vm11 = vcmp.gt.f32.partialorder %v918_v1, 0.0  ;;  %v936_v12 = vmul.f32 %v1582_v46, %v918_v1  ;;  %v767_v13 = vadd.f32 %v748_v7, %v633_v58 }
 0x101   : > { %984 = vst.msk [vmem:[%s1591_s13 + $0x8] sm:$0xf] %vm981_vm9, %v1176_v5  ;;  %v1174_v14 = vpack.c.bf16 %v941_v10, %v941_v10  ;;  %v916_v15 = vadd.f32 %v1580_v41, %v901_v6  ;;  %v906_v18 = vadd.f32 %v1276_v52, %v769_v17  ;;  %v1261_v19 = vpop.f32.mrf.mxu0 }
 0x102   : > { %v944_v8 = vsel %vm927_vm11, %v918_v1, %v936_v12  ;;  %v904_v9 = vadd.f32 %v885_v2, %v767_v13  ;;  %v770_v21 = vadd.f32 %v1261_v19, %v644_v3 }
 0x103   : > { %982 = vst.msk [vmem:[%s1591_s13] sm:$0xf] %vm981_vm9, %v1174_v14  ;;  %v1177_v22 = vpack.c.bf16 %v944_v8, %v944_v8  ;;  %vm925_vm12 = vcmp.gt.f32.partialorder %v916_v15, 0.0  ;;  %v934_v23 = vmul.f32 %v1582_v46, %v916_v15  ;;  %v921_v24 = vadd.f32 %v1580_v41, %v906_v18  ;;  %v751_v25 = vpop.f32.mrf.mxu0 }
 0x104   : > { %v919_v16 = vadd.f32 %v1580_v41, %v904_v9  ;;  %v907_v29 = vadd.f32 %v1277_v50, %v770_v21  ;;  %v768_v26 = vadd.f32 %v751_v25, %v636_v20 }
 0x105   : > { %985 = vst.msk [vmem:[%s1591_s13 + $0xc] sm:$0xf] %vm981_vm9, %v1177_v22  ;;  %v942_v62 = vsel %vm925_vm12, %v916_v15, %v934_v23  ;;  %vm930_vm13 = vcmp.gt.f32.partialorder %v921_v24, 0.0  ;;  %v939_v63 = vmul.f32 %v1582_v46, %v921_v24 }
 0x106   : > { %v1175_v28 = vpack.c.bf16 %v942_v62, %v942_v62  ;;  %vm928_vm14 = vcmp.gt.f32.partialorder %v919_v16, 0.0  ;;  %v937_v30 = vmul.f32 %v1582_v46, %v919_v16  ;;  %v922_v31 = vadd.f32 %v1580_v41, %v907_v29 }
 0x107   : > { %v947_v33 = vsel %vm930_vm13, %v921_v24, %v939_v63  ;;  %v905_v34 = vadd.f32 %v888_v32, %v768_v26 }
 0x108   : > { %983 = vst.msk [vmem:[%s1591_s13 + $0x4] sm:$0xf] %vm981_vm9, %v1175_v28  ;;  %v1180_v35 = vpack.c.bf16 %v947_v33, %v947_v33  ;;  %v945_v11 = vsel %vm928_vm14, %v919_v16, %v937_v30  ;;  %vm931_vm15 = vcmp.gt.f32.partialorder %v922_v31, 0.0  ;;  %v940_v4 = vmul.f32 %v1582_v46, %v922_v31 }
 0x109   : > { %v1178_v36 = vpack.c.bf16 %v945_v11, %v945_v11  ;;  %v920_v37 = vadd.f32 %v1580_v41, %v905_v34 }
 0x10a   : > { %988 = vst.msk [vmem:[%s1591_s13 + $0x18] sm:$0xf] %vm981_vm9, %v1180_v35  ;;  %v948_v38 = vsel %vm931_vm15, %v922_v31, %v940_v4 }
 0x10b   : > { %986 = vst.msk [vmem:[%s1591_s13 + $0x10] sm:$0xf] %vm981_vm9, %v1178_v36  ;;  %v1181_v39 = vpack.c.bf16 %v948_v38, %v948_v38  ;;  %vm929_vm0 = vcmp.gt.f32.partialorder %v920_v37, 0.0  ;;  %v938_v40 = vmul.f32 %v1582_v46, %v920_v37 }
 0x10d   : > { %989 = vst.msk [vmem:[%s1591_s13 + $0x1c] sm:$0xf] %vm981_vm9, %v1181_v39  ;;  %v946_v42 = vsel %vm929_vm0, %v920_v37, %v938_v40 }
 0x10e   : > { %v1179_v43 = vpack.c.bf16 %v946_v42, %v946_v42 }
 0x110   : > { %987 = vst.msk [vmem:[%s1591_s13 + $0x14] sm:$0xf] %vm981_vm9, %v1179_v43 }
 0x111 PF: > { %s15_s19 = sadd.s32 1, %s1346_s19   ;;  %s1640_s17 = smov %s1342_s18 }
 0x112   : > { %p12_p5 = scmp.ge.s32.totalorder %s15_s19, 4   ;;  %s1641_s18 = smov %s1643_s0 }
 0x114   :  { %14 = sbr.rel (!%p12_p5) target bundleno = 2 (0x2), region = 73 }

// kernel: point_gen_forward.6
= control target key start
LH: loop header
LB: loop body
LE: loop exit
PB: predicated region body
PF: predicated region fallthrough
CT: control target
= control target key end

     0   :  { %s1326_s17 = smov 0   ;;  %s1328_s18 = smov 0   ;;  %s1587_s0 = inlined_call_operand.<no memory space> [shape: f32[1], index: 0, kind: input, shape index: {}]   ;;  %s1588_s1 = inlined_call_operand.vmem [shape: bf16[2,4,5,128], index: 1, kind: input, shape index: {}]   ;;  %s1589_s2 = inlined_call_operand.vmem [shape: bf16[4,128,64], index: 2, kind: input, shape index: {}]   ;;  %s1590_s3 = inlined_call_operand.vmem [shape: f32[1,64], index: 3, kind: input, shape index: {}]   ;;  %s1591_s4 = inlined_call_operand.vmem [shape: bf16[2,16,64], index: 4, kind: output, shape index: {}]  }
   0x1   :  { %9 = sst [smem:[#allocation3]] %s1587_s0  ;;  %s1330_s19 = smov 0  }
   0x2 LB: > { %s27_s0 = sadd.s32 1, %s1289_s18  ;;  %p999_p0 = scmp.ge.s32.totalorder %s1293_s19, 1  ;;  %s1293_s19 = sphi %s1330_s19, %s15_s19   ;;  %s1289_s18 = sphi %s1328_s18, %s1601_s18   ;;  %s1285_s17 = sphi %s1326_s17, %s1600_s17  }
   0x3   : > { %p29_p1 = scmp.ge.s32.totalorder %s27_s0, 2  ;;  %p184_p2 = scmp.lt.s32.totalorder %s1293_s19, 3 }
   0x5   : > { %s1603_s0 = smov (%p29_p1, %s27_s0), 0  ;;  %p185_p3 = pnand %p999_p0, %p184_p2 }
   0x6   : > { %p219_p4 = scmp.lt.s32.totalorder (!%p185_p3), %s1285_s17, 1  ;;  %s889_s16 = sld [smem:[#allocation3]] (!%p185_p3) }
   0x7   : > { %188 = sbr.rel (%p185_p3) target bundleno = 289 (0x121), region = 36 }
   0xc   : > { %v1236_v0 = vld [vmem:[%s1589_s2 + $0x78] sm:$0xff]   ;;  %v1295_v1 = vmov 0.0   ;;  %v1238_v3 = vld [vmem:[%s1589_s2 + $0x70] sm:$0xff]   ;;  %vm1296_vm0 = vmmov 0   ;;  %v1240_v5 = vld [vmem:[%s1589_s2 + $0x68] sm:$0xff]   ;;  %s1605_s17 = smov (!%p219_p4, %s1285_s17), 1  ;;  %v282_v10 = vlaneseq }
   0xd   : > { %1129 = vmatprep.subr.bf16.mxu0 %v1295_v1  ;;  %1149 = vmatprep.subr.bf16.mxu1 %v1295_v1  ;;  %v1237_v2 = vld [vmem:[%s1589_s2 + $0x38] sm:$0xff]   ;;  %v1239_v4 = vld [vmem:[%s1589_s2 + $0x30] sm:$0xff]   ;;  %v1241_v6 = vld [vmem:[%s1589_s2 + $0x28] sm:$0xff]   ;;  %vm243_vm1 = vcmask 1042432   ;;  %s1089_s12 = sshll.u32 %s1605_s17, 4  ;;  %s1090_s22 = sshll.u32 %s1605_s17, 3 }
   0xe   : > { %1130 = vmatpush3.bf16.msra.mxu0 %v1236_v0  ;;  %1145 = vmatprep.mubr.msk.bf16.mxu0 %vm1296_vm0, %v1295_v1  ;;  %v1242_v7 = vld [vmem:[%s1589_s2 + $0x60] sm:$0xff]   ;;  %v1244_v9 = vld [vmem:[%s1589_s2 + $0x58] sm:$0xff]   ;;  %vm244_vm2 = vsmask.f32 2304  ;;  %s226_s20 = scalar_lea.vmem %s1588_s1, %s1089_s12  ;;  %v1246_v14 = vld [vmem:[%s1589_s2 + $0x50] sm:$0xff]   ;;  %v283_v18 = vshrl.u32 %v282_v10, 7  ;;  %s236_s25 = scalar_lea.vmem %s1591_s4, %s1090_s22 }
   0xf   : > { %1150 = vmatpush3.bf16.msra.mxu1 %v1237_v2  ;;  %1131 = vmatprep.subr.bf16.mxu0 %v1295_v1  ;;  %v1243_v8 = vld [vmem:[%s1589_s2 + $0x20] sm:$0xff]   ;;  %v1245_v11 = vld [vmem:[%s1589_s2 + $0x18] sm:$0xff]   ;;  %vm1398_vm3 = vmand %vm243_vm1, %vm244_vm2  ;;  %v1297_v16 = vmov 1983009808   ;;  %vm311_vm4 = vsmask.f32 1280 }
  0x10   : > { %1151 = vmatprep.subr.bf16.mxu1 %v1295_v1  ;;  %1165 = vmatprep.mubr.msk.bf16.mxu1 %vm1296_vm0, %v1295_v1  ;;  %v246_v12 = vld [vmem:[#allocation2] sm:$0x7]  ;;  %v280_v17 = vunpack.c.l.s4 %v1297_v16  ;;  %v1247_v19 = vld [vmem:[%s1589_s2 + $0x10] sm:$0xff]   ;;  %v1248_v20 = vld [vmem:[%s1589_s2 + $0x48] sm:$0xff]   ;;  %vm312_vm5 = vsmask.f32 3336 }
  0x11   : > { %v247_v15 = vsel %vm1398_vm3, 0, %v246_v12  ;;  %v1415_v21 = vld [vmem:[%s226_s20] sm:$0x7]  ;;  %v1249_v23 = vld [vmem:[%s1589_s2 + $0x8] sm:$0xff]   ;;  %v1420_v24 = vld [vmem:[%s226_s20 + $0x4] sm:$0x7] }
  0x12   : > { %1132 = vmatpush3.bf16.msra.mxu0 %v1238_v3  ;;  %248 = vst [vmem:[#allocation2] sm:$0x7] %v247_v15  ;;  %v281_v22 = vunpack.c.0.s8 %v280_v17  ;;  %v1422_v25 = vld [vmem:[%s226_s20 + $0x8] sm:$0x7]  ;;  %v1250_v27 = vld [vmem:[%s1589_s2 + $0x40] sm:$0xff]   ;;  %vm1446_vm8 = vmor %vm311_vm4, %vm312_vm5  ;;  %v623_v60 = vcombine.low %v1415_v21, %v1420_v24  ;;  %vm905_vm12 = vcmask 519168  }
  0x13   : > { %1152 = vmatpush3.bf16.msra.mxu1 %v1239_v4  ;;  %1133 = vmatprep.subr.bf16.mxu0 %v1295_v1  ;;  %v1431_v28 = vld [vmem:[%s226_s20 + $0xc] sm:$0x7]  ;;  %vm314_vm6 = vsmask.f32 5392  ;;  %v1251_v31 = vld [vmem:[%s1589_s2] sm:$0xff]   ;;  %v499_v32 = vcombine.low %v1420_v24, %v1422_v25  ;;  %v1262_v48 = vld [vmem:[%s1589_s2 + $0xd8] sm:$0xff]  }
  0x14   : > { %1153 = vmatprep.subr.bf16.mxu1 %v1295_v1  ;;  %v1424_v26 = vsub.s32 %v281_v22, %v283_v18  ;;  %vm316_vm7 = vsmask.f32 7448  ;;  %vm1459_vm9 = vmor %vm1446_vm8, %vm314_vm6  ;;  %v1254_v22 = vld [vmem:[%s1589_s2 + $0xf8] sm:$0xff]  }
  0x15   : > { %vm1467_vm10 = vmor %vm1459_vm9, %vm316_vm7 }
  0x16   : > { %1134 = vmatpush3.bf16.msra.mxu0 %v1240_v5  ;;  %v293_v29 = vrot.slane %v1415_v21, %v1424_v26  ;;  %v301_v30 = vrot.slane %v1420_v24, %v1424_v26  ;;  %v309_v36 = vrot.slane %v1422_v25, %v1424_v26 }
  0x17   : > { %1154 = vmatpush3.bf16.msra.mxu1 %v1241_v6  ;;  %1135 = vmatprep.subr.bf16.mxu0 %v1295_v1 }
  0x18   : > { %1155 = vmatprep.subr.bf16.mxu1 %v1295_v1  ;;  %v294_v34 = vcombine.high %v293_v29, %v293_v29  ;;  %v302_v35 = vcombine.high %v301_v30, %v301_v30  ;;  %v333_v38 = vshrl.u32 %v293_v29, 16  ;;  %v336_v41 = vshll.u32 %v293_v29, 16 }
  0x19   : > { %v253_v33 = vld [vmem:[#allocation2] sm:$0x7]  ;;  %v347_v42 = vshrl.u32 %v301_v30, 16  ;;  %v310_v43 = vcombine.high %v309_v36, %v309_v36  ;;  %v350_v46 = vshll.u32 %v301_v30, 16  ;;  %v361_v62 = vshrl.u32 %v309_v36, 16 }
  0x1a   : > { %1136 = vmatpush3.bf16.msra.mxu0 %v1242_v7  ;;  %v257_v39 = vsel %vm1398_vm3, %v1431_v28, %v253_v33  ;;  %v285_v40 = vrot.slane %v253_v33, %v1424_v26  ;;  %v335_v44 = vrot.slane %v333_v38, 6  ;;  %v342_v45 = vshll.u32 %v294_v34, 16  ;;  %v1256_v34 = vld [vmem:[%s1589_s2 + $0xf0] sm:$0xff]  }
  0x1b   : > { %1156 = vmatpush3.bf16.msra.mxu1 %v1243_v8  ;;  %1137 = vmatprep.subr.bf16.mxu0 %v1295_v1  ;;  %258 = vst [vmem:[#allocation2] sm:$0x7] %v257_v39  ;;  %v338_v51 = vrot.slane %v336_v41, 7  ;;  %v349_v53 = vrot.slane %v347_v42, 6  ;;  %v352_v54 = vrot.slane %v350_v46, 7  ;;  %v356_v55 = vshll.u32 %v302_v35, 16 }
  0x1c   : > { %1157 = vmatprep.subr.bf16.mxu1 %v1295_v1  ;;  %v286_v47 = vcombine.high %v285_v40, %v285_v40  ;;  %v319_v49 = vshrl.u32 %v285_v40, 16  ;;  %v322_v50 = vshll.u32 %v285_v40, 16  ;;  %v344_v52 = vrot.slane %v342_v45, 7  ;;  %v1253_v35 = vld [vmem:[%s1589_s2 + $0xb8] sm:$0xff]   ;;  %v1258_v40 = vld [vmem:[%s1589_s2 + $0xe8] sm:$0xff]   ;;  %v1255_v41 = vld [vmem:[%s1589_s2 + $0xb0] sm:$0xff]  }
  0x1d   : > { %v339_v59 = vor.u32 %v338_v51, %v335_v44  ;;  %v353_v61 = vor.u32 %v352_v54, %v349_v53  ;;  %v364_v63 = vshll.u32 %v309_v36, 16  ;;  %v370_v0 = vshll.u32 %v310_v43, 16  ;;  %v1260_v44 = vld [vmem:[%s1589_s2 + $0xe0] sm:$0xff]   ;;  %v1257_v45 = vld [vmem:[%s1589_s2 + $0xa8] sm:$0xff]   ;;  %v1264_v51 = vld [vmem:[%s1589_s2 + $0xd0] sm:$0xff]  }
  0x1e   : > { %1138 = vmatpush3.bf16.msra.mxu0 %v1244_v9  ;;  %v321_v56 = vrot.slane %v319_v49, 6  ;;  %v324_v57 = vrot.slane %v322_v50, 7  ;;  %v328_v58 = vshll.u32 %v286_v47, 16  ;;  %v358_v6 = vrot.slane %v356_v55, 7  ;;  %v1259_v49 = vld [vmem:[%s1589_s2 + $0xa0] sm:$0xff]   ;;  %v1266_v55 = vld [vmem:[%s1589_s2 + $0xc8] sm:$0xff]  }
  0x1f   : > { %1158 = vmatpush3.bf16.msra.mxu1 %v1245_v11  ;;  %1139 = vmatprep.subr.bf16.mxu0 %v1295_v1  ;;  %v340_v4 = vrot.slane %v339_v59, 2  ;;  %v354_v5 = vrot.slane %v353_v61, 2  ;;  %v363_v7 = vrot.slane %v361_v62, 6  ;;  %v366_v8 = vrot.slane %v364_v63, 7  ;;  %v1268_v59 = vld [vmem:[%s1589_s2 + $0xc0] sm:$0xff]   ;;  %v1265_v62 = vld [vmem:[%s1589_s2 + $0x88] sm:$0xff]  }
  0x20   : > { %1159 = vmatprep.subr.bf16.mxu1 %v1295_v1  ;;  %v325_v2 = vor.u32 %v324_v57, %v321_v56  ;;  %v330_v3 = vrot.slane %v328_v58, 7  ;;  %v372_v12 = vrot.slane %v370_v0, 7  ;;  %v498_v13 = vcombine.low %v253_v33, %v1415_v21  ;;  %v1263_v56 = vld [vmem:[%s1589_s2 + $0x90] sm:$0xff]   ;;  %v1267_v21 = vld [vmem:[%s1589_s2 + $0x80] sm:$0xff]  }
  0x21   : > { %v1474_v10 = vsel %vm1467_vm10, %v340_v4, %v344_v52  ;;  %v367_v11 = vor.u32 %v366_v8, %v363_v7  ;;  %v1482_v16 = vsel %vm1467_vm10, %v354_v5, %v358_v6  ;;  %v1261_v52 = vld [vmem:[%s1589_s2 + $0x98] sm:$0xff]   ;;  %v624_v61 = vcombine.low %v1422_v25, %v1431_v28 }
  0x22   : > { %1140 = vmatpush3.bf16.msra.mxu0 %v1246_v14  ;;  %v326_v9 = vrot.slane %v325_v2, 2  ;;  %v513_v14 = vrot.slane %v499_v32, %v1424_v26  ;;  %v771_v53 = vcombine.low %v1474_v10, %v1482_v16  ;;  %v631_v0 = vrot.slane %v623_v60, %v1424_v26 }
  0x23   : > { %1160 = vmatpush3.bf16.msra.mxu1 %v1247_v19  ;;  %1141 = vmatprep.subr.bf16.mxu0 %v1295_v1  ;;  %v368_v17 = vrot.slane %v367_v11, 2  ;;  %v506_v19 = vrot.slane %v498_v13, %v1424_v26  ;;  %v638_v2 = vrot.slane %v624_v61, %v1424_v26 }
  0x24   : > { %1161 = vmatprep.subr.bf16.mxu1 %v1295_v1  ;;  %v331_v15 = vsel %vm1467_vm10, %v326_v9, %v330_v3  ;;  %v779_v57 = vrot.slane %v771_v53, %v1424_v26 }
  0x25   : > { %v391_v18 = vcombine.low %v331_v15, %v1474_v10  ;;  %v639_v24 = vcombine.low %v631_v0, %v638_v2 }
  0x26   : > { %1142 = vmatpush3.bf16.msra.mxu0 %v1248_v20  ;;  %v738_v20 = vrot.slane %v1431_v28, %v1424_v26 }
  0x27   : > { %1162 = vmatpush3.bf16.msra.mxu1 %v1249_v23  ;;  %1143 = vmatprep.subr.bf16.mxu0 %v1295_v1  ;;  %v373_v23 = vsel %vm1467_vm10, %v368_v17, %v372_v12  ;;  %v399_v30 = vrot.slane %v391_v18, %v1424_v26  ;;  %v892_v18 = vstv %s889_s16 }
  0x28   : > { %1163 = vmatprep.subr.bf16.mxu1 %v1295_v1  ;;  %v392_v29 = vcombine.low %v1482_v16, %v373_v23  ;;  %v741_v32 = vshrl.u32 %v738_v20, 16  ;;  %v744_v33 = vshll.u32 %v738_v20, 16  ;;  %v739_v37 = vcombine.high %v738_v20, %v738_v20 }
  0x2a   : > { %1144 = vmatpush3.bf16.msra.mxu0 %v1250_v27  ;;  %v514_v27 = vcombine.low %v506_v19, %v513_v14  ;;  %v743_v38 = vrot.slane %v741_v32, 6  ;;  %v746_v39 = vrot.slane %v744_v33, 7  ;;  %v750_v43 = vshll.u32 %v739_v37, 16  ;;  %v1084_v14 = vld [vmem:[%s1590_s3] ss:$0 sm:$0xff] }
  0x2b   : > { %1164 = vmatpush3.bf16.msra.mxu1 %v1251_v31  ;;  %1169 = vmatprep.subr.bf16.mxu0 %v1295_v1  ;;  %v406_v31 = vrot.slane %v392_v29, %v1424_v26 }
  0x2c   : > { %1189 = vmatprep.subr.bf16.mxu1 %v1295_v1  ;;  %v747_v42 = vor.u32 %v746_v39, %v743_v38  ;;  %v752_v47 = vrot.slane %v750_v43, 7 }
  0x2d   : > { %v407_v36 = vcombine.low %v399_v30, %v406_v31 }
  0x2e   : > { %1166 = vmatmul.mubr.bf16.vlgmr.msra.gmra.mxu1 %v514_v27  ;;  %v748_v46 = vrot.slane %v747_v42, 2 }
  0x2f   : > { %1190 = vmatpush3.bf16.msra.mxu1 %v1254_v22  ;;  %1205 = vmatprep.mubr.msk.bf16.mxu1 %vm1296_vm0, %v1295_v1 }
  0x30   : > { %1191 = vmatprep.subr.bf16.mxu1 %v1295_v1  ;;  %1146 = vmatmul.mubr.bf16.vlgmr.msra.gmra.mxu0 %v407_v36  ;;  %v753_v50 = vsel %vm1467_vm10, %v748_v46, %v752_v47 }
  0x31   : > { %1170 = vmatpush3.bf16.msra.mxu0 %v1253_v35  ;;  %1185 = vmatprep.mubr.msk.bf16.mxu0 %vm1296_vm0, %v1295_v1  ;;  %v772_v54 = vcombine.low %v373_v23, %v753_v50 }
  0x32   : > { %1171 = vmatprep.subr.bf16.mxu0 %v1295_v1 }
  0x33   : > { %1192 = vmatpush3.bf16.msra.mxu1 %v1256_v34  ;;  %v786_v58 = vrot.slane %v772_v54, %v1424_v26 }
  0x34   : > { %1193 = vmatprep.subr.bf16.mxu1 %v1295_v1 }
  0x35   : > { %1172 = vmatpush3.bf16.msra.mxu0 %v1255_v41  ;;  %v787_v63 = vcombine.low %v779_v57, %v786_v58 }
  0x36   : > { %1173 = vmatprep.subr.bf16.mxu0 %v1295_v1 }
  0x37   : > { %1194 = vmatpush3.bf16.msra.mxu1 %v1258_v40 }
  0x38   : > { %1195 = vmatprep.subr.bf16.mxu1 %v1295_v1 }
  0x39   : > { %1174 = vmatpush3.bf16.msra.mxu0 %v1257_v45 }
  0x3a   : > { %1175 = vmatprep.subr.bf16.mxu0 %v1295_v1 }
  0x3b   : > { %1196 = vmatpush3.bf16.msra.mxu1 %v1260_v44 }
  0x3c   : > { %1197 = vmatprep.subr.bf16.mxu1 %v1295_v1 }
  0x3d   : > { %1176 = vmatpush3.bf16.msra.mxu0 %v1259_v49 }
  0x3e   : > { %1177 = vmatprep.subr.bf16.mxu0 %v1295_v1 }
  0x3f   : > { %1198 = vmatpush3.bf16.msra.mxu1 %v1262_v48 }
  0x40   : > { %1199 = vmatprep.subr.bf16.mxu1 %v1295_v1 }
  0x41   : > { %1178 = vmatpush3.bf16.msra.mxu0 %v1261_v52 }
  0x42   : > { %1179 = vmatprep.subr.bf16.mxu0 %v1295_v1 }
  0x43   : > { %1200 = vmatpush3.bf16.msra.mxu1 %v1264_v51 }
  0x44   : > { %1201 = vmatprep.subr.bf16.mxu1 %v1295_v1 }
  0x45   : > { %1180 = vmatpush3.bf16.msra.mxu0 %v1263_v56 }
  0x46   : > { %1181 = vmatprep.subr.bf16.mxu0 %v1295_v1 }
  0x47   : > { %1202 = vmatpush3.bf16.msra.mxu1 %v1266_v55 }
  0x48   : > { %1203 = vmatprep.subr.bf16.mxu1 %v1295_v1 }
  0x49   : > { %1182 = vmatpush3.bf16.msra.mxu0 %v1265_v62 }
  0x4a   : > { %1183 = vmatprep.subr.bf16.mxu0 %v1295_v1 }
  0x4b   : > { %1204 = vmatpush3.bf16.msra.mxu1 %v1268_v59 }
  0x4d   : > { %1184 = vmatpush3.bf16.msra.mxu0 %v1267_v21 }
  0x4e   : > { %1206 = vmatmul.mubr.bf16.vlgmr.msra.gmra.mxu1 %v787_v63 }
  0x50   : > { %1186 = vmatmul.mubr.bf16.vlgmr.msra.gmra.mxu0 %v639_v24 }
  0xee   : > { %v598_v25 = vpop.f32.mrf.mxu1 }
  0xf0   : > { %v1167_v28 = vpop.f32.mrf.mxu1  ;;  %v491_v4 = vpop.f32.mrf.mxu0 }
  0xf1   : > { %v599_v10 = vadd.f32 %v598_v25, %v491_v4 }
  0xf2   : > { %v601_v3 = vpop.f32.mrf.mxu1  ;;  %v1147_v6 = vpop.f32.mrf.mxu0 }
  0xf4   : > { %v1168_v5 = vpop.f32.mrf.mxu1  ;;  %v494_v7 = vpop.f32.mrf.mxu0 }
  0xf5   : > { %v602_v16 = vadd.f32 %v601_v3, %v494_v7 }
  0xf6   : > { %v1148_v8 = vpop.f32.mrf.mxu0 }
 0x10e   : > { %v871_v26 = vpop.f32.mrf.mxu1 }
 0x110   : > { %v1207_v9 = vpop.f32.mrf.mxu1  ;;  %v723_v12 = vpop.f32.mrf.mxu0 }
 0x111   : > { %v730_v1 = vadd.f32 %v723_v12, %v599_v10 }
 0x112   : > { %v874_v11 = vpop.f32.mrf.mxu1  ;;  %v1187_v15 = vpop.f32.mrf.mxu0 }
 0x113   : > { %v878_v17 = vadd.f32 %v871_v26, %v730_v1 }
 0x114   : > { %v1208_v13 = vpop.f32.mrf.mxu1  ;;  %v726_v19 = vpop.f32.mrf.mxu0 }
 0x115   : > { %v887_v20 = vadd.f32 %v1084_v14, %v878_v17  ;;  %v731_v22 = vadd.f32 %v726_v19, %v602_v16 }
 0x116   : > { %v1188_v23 = vpop.f32.mrf.mxu0 }
 0x117   : > { %vm890_vm11 = vcmp.gt.f32.partialorder %v887_v20, 0.0  ;;  %v893_v27 = vmul.f32 %v892_v18, %v887_v20  ;;  %v879_v29 = vadd.f32 %v874_v11, %v731_v22 }
 0x119   : > { %v895_v30 = vsel %vm890_vm11, %v887_v20, %v893_v27  ;;  %v888_v31 = vadd.f32 %v1084_v14, %v879_v29 }
 0x11a   : > { %v1091_v32 = vpack.c.bf16 %v895_v30, %v895_v30 }
 0x11b   : > { %vm891_vm13 = vcmp.gt.f32.partialorder %v888_v31, 0.0  ;;  %v894_v33 = vmul.f32 %v892_v18, %v888_v31 }
 0x11c   : > { %906 = vst.msk [vmem:[%s236_s25] sm:$0xf] %vm905_vm12, %v1091_v32 }
 0x11d   : > { %v896_v34 = vsel %vm891_vm13, %v888_v31, %v894_v33 }
 0x11e   : > { %v1092_v35 = vpack.c.bf16 %v896_v34, %v896_v34 }
 0x120   : > { %907 = vst.msk [vmem:[%s236_s25 + $0x4] sm:$0xf] %vm905_vm12, %v1092_v35 }
 0x121 PF: > { %s15_s19 = sadd.s32 1, %s1293_s19   ;;  %s1600_s17 = smov %s1289_s18 }
 0x122   : > { %p12_p5 = scmp.ge.s32.totalorder %s15_s19, 4   ;;  %s1601_s18 = smov %s1603_s0 }
 0x124   :  { %14 = sbr.rel (!%p12_p5) target bundleno = 2 (0x2), region = 73 }

// kernel: point_gen_forward.7
= control target key start
LH: loop header
LB: loop body
LE: loop exit
PB: predicated region body
PF: predicated region fallthrough
CT: control target
= control target key end

     0   :  { %s1719_s18 = smov 0   ;;  %s2027_s0 = inlined_call_operand.vmem [shape: bf16[2,2,3,256], index: 0, kind: input, shape index: {}]   ;;  %s2028_s1 = inlined_call_operand.vmem [shape: bf16[4,256,128], index: 1, kind: input, shape index: {}]   ;;  %s2029_s2 = inlined_call_operand.vmem [shape: f32[1,128], index: 2, kind: input, shape index: {}]   ;;  %s2030_s3 = inlined_call_operand.vmem [shape: f32[128,20], index: 3, kind: input, shape index: {}]   ;;  %s2031_s4 = inlined_call_operand.vmem [shape: f32[1,20], index: 4, kind: input, shape index: {}]   ;;  %s2032_s5 = inlined_call_operand.vmem [shape: f32[2,1,20], index: 5, kind: output, shape index: {}]  }
   0x1 LB: > { %s1279_s19 = sadd.s32 4294967295, %s1682_s18   ;;  %p1283_p0 = scmp.ge.s32.totalorder %s1682_s18, 1  ;;  %s1682_s18 = sphi %s1719_s18, %s15_s18  }
   0x2   : > { %p187_p1 = scmp.lt.s32.totalorder %s1682_s18, 3 }
   0x4   : > { %p188_p2 = pnand %p1283_p0, %p187_p1 }
   0x5   : > { %p213_p3 = scmp.lt.s32.totalorder (!%p188_p2), %s1279_s19, 1 }
   0x6   : > { %191 = sbr.rel (%p188_p2) target bundleno = 526 (0x20e), region = 40 }
   0xb   : > { %v1608_v0 = vld [vmem:[%s2028_s1 + $0xf8] sm:$0xff]   ;;  %v1612_v4 = vld [vmem:[%s2028_s1 + $0xf0] sm:$0xff]   ;;  %v1616_v8 = vld [vmem:[%s2028_s1 + $0xe8] sm:$0xff]   ;;  %s2036_s19 = smov (!%p213_p3, %s1279_s19), 1  ;;  %v228_v29 = vlaneseq  ;;  %v1684_v34 = vmov 1983009808  }
   0xc   : > { %v1609_v1 = vld [vmem:[%s2028_s1 + $0x78] sm:$0xff]   ;;  %1455 = vmatprep.subr.bf16.mxu0 %v1608_v0  ;;  %v1613_v5 = vld [vmem:[%s2028_s1 + $0x70] sm:$0xff]   ;;  %v1617_v9 = vld [vmem:[%s2028_s1 + $0x68] sm:$0xff]   ;;  %s1454_s9 = sshll.u32 %s2036_s19, 3  ;;  %v226_v35 = vunpack.c.l.s4 %v1684_v34  ;;  %v1685_v36 = vmov 1966171168   ;;  %s220_s30 = scalar_lea.vmem %s2032_s5, %s2036_s19 }
   0xd   : > { %v1610_v2 = vld [vmem:[%s2028_s1 + $0xb8] sm:$0xff]   ;;  %1477 = vmatprep.subr.bf16.mxu1 %v1609_v1  ;;  %v1614_v6 = vld [vmem:[%s2028_s1 + $0xb0] sm:$0xff]   ;;  %v1618_v10 = vld [vmem:[%s2028_s1 + $0xa8] sm:$0xff]   ;;  %s1833_s16 = scalar_lea.vmem %s2027_s0, %s1454_s9  ;;  %v229_v33 = vshrl.u32 %v228_v29, 7  ;;  %v236_v37 = vunpack.c.l.s4 %v1685_v36  ;;  %vm312_vm0 = vsmask.f32 256 }
   0xe   : > { %v1611_v3 = vld [vmem:[%s2028_s1 + $0x38] sm:$0xff]   ;;  %1456 = vmatpush3.bf16.msra.mxu0 %v1610_v2  ;;  %v1615_v7 = vld [vmem:[%s2028_s1 + $0x30] sm:$0xff]   ;;  %v1619_v11 = vld [vmem:[%s2028_s1 + $0x28] sm:$0xff]   ;;  %vm313_vm1 = vsmask.f32 1284  ;;  %v227_v39 = vunpack.c.0.s8 %v226_v35  ;;  %v1686_v40 = vmov 0  }
   0xf   : > { %1478 = vmatpush3.bf16.msra.mxu1 %v1611_v3  ;;  %1457 = vmatprep.subr.bf16.mxu0 %v1612_v4  ;;  %v1620_v12 = vld [vmem:[%s2028_s1 + $0xe0] sm:$0xff]   ;;  %v1624_v16 = vld [vmem:[%s2028_s1 + $0xd8] sm:$0xff]   ;;  %v1628_v20 = vld [vmem:[%s2028_s1 + $0xd0] sm:$0xff]   ;;  %vm315_vm3 = vsmask.f32 2312  ;;  %v234_v41 = vcombine.low %v1686_v40, %v1686_v40  ;;  %v237_v42 = vunpack.c.0.s8 %v236_v37  ;;  %vm1688_vm15 = vmmov 0  }
  0x10   : > { %1479 = vmatprep.subr.bf16.mxu1 %v1613_v5  ;;  %v1621_v13 = vld [vmem:[%s2028_s1 + $0x60] sm:$0xff]   ;;  %v1625_v17 = vld [vmem:[%s2028_s1 + $0x58] sm:$0xff]   ;;  %v1629_v21 = vld [vmem:[%s2028_s1 + $0x50] sm:$0xff]   ;;  %vm317_vm4 = vsmask.f32 3340  ;;  %v230_v44 = vsub.s32 %v227_v39, %v229_v33 }
  0x11   : > { %v1622_v14 = vld [vmem:[%s2028_s1 + $0xa0] sm:$0xff]   ;;  %v1626_v18 = vld [vmem:[%s2028_s1 + $0x98] sm:$0xff]   ;;  %v1630_v22 = vld [vmem:[%s2028_s1 + $0x90] sm:$0xff]   ;;  %vm319_vm7 = vsmask.f32 4368  ;;  %v1839_v45 = vsub.s32 %v237_v42, %v229_v33 }
  0x12   : > { %1458 = vmatpush3.bf16.msra.mxu0 %v1614_v6  ;;  %v1623_v15 = vld [vmem:[%s2028_s1 + $0x20] sm:$0xff]   ;;  %v1627_v19 = vld [vmem:[%s2028_s1 + $0x18] sm:$0xff]   ;;  %v1631_v23 = vld [vmem:[%s2028_s1 + $0x10] sm:$0xff]   ;;  %vm321_vm9 = vsmask.f32 5396 }
  0x13   : > { %1480 = vmatpush3.bf16.msra.mxu1 %v1615_v7  ;;  %1459 = vmatprep.subr.bf16.mxu0 %v1616_v8  ;;  %v1632_v24 = vld [vmem:[%s2028_s1 + $0xc8] sm:$0xff]   ;;  %v1636_v28 = vld [vmem:[%s2028_s1 + $0xc0] sm:$0xff]   ;;  %vm314_vm2 = vmor %vm312_vm0, %vm313_vm1  ;;  %v241_v48 = vrot.slane %v234_v41, %v1839_v45  ;;  %vm323_vm11 = vsmask.f32 6424  ;;  %vm325_vm13 = vsmask.f32 7452 }
  0x14   : > { %1481 = vmatprep.subr.bf16.mxu1 %v1617_v9  ;;  %v1633_v25 = vld [vmem:[%s2028_s1 + $0x48] sm:$0xff]   ;;  %v1637_v30 = vld [vmem:[%s2028_s1 + $0x40] sm:$0xff]   ;;  %vm316_vm5 = vmor %vm314_vm2, %vm315_vm3  ;;  %vm1125_vm0 = vcmask 1043456   ;;  %vm1230_vm1 = vcmask 155648  }
  0x15   : > { %v1634_v26 = vld [vmem:[%s2028_s1 + $0x88] sm:$0xff]   ;;  %v1638_v31 = vld [vmem:[%s2028_s1 + $0x80] sm:$0xff]   ;;  %vm318_vm6 = vmor %vm316_vm5, %vm317_vm4  ;;  %v296_v50 = vcombine.high %v241_v48, %v241_v48  ;;  %v248_v51 = vrot.slane %v241_v48, %v1839_v45 }
  0x16   : > { %1460 = vmatpush3.bf16.msra.mxu0 %v1618_v10  ;;  %v1635_v27 = vld [vmem:[%s2028_s1 + $0x8] sm:$0xff]   ;;  %v1639_v32 = vld [vmem:[%s2028_s1] sm:$0xff]   ;;  %v1640_v43 = vld [vmem:[%s2028_s1 + $0x178] sm:$0xff]  }
  0x17   : > { %1482 = vmatpush3.bf16.msra.mxu1 %v1619_v11  ;;  %1461 = vmatprep.subr.bf16.mxu0 %v1620_v12  ;;  %v222_v38 = vld [vmem:[%s1833_s16] sm:$0xf]  ;;  %v1641_v46 = vld [vmem:[%s2028_s1 + $0x1f8] sm:$0xff]   ;;  %vm320_vm8 = vmor %vm318_vm6, %vm319_vm7  ;;  %v303_v53 = vrot.slane %v296_v50, %v1839_v45  ;;  %v328_v57 = vshrl.u32 %v248_v51, 16 }
  0x18   : > { %1483 = vmatprep.subr.bf16.mxu1 %v1621_v13  ;;  %v231_v47 = vrot.slane %v222_v38, %v230_v44  ;;  %vm322_vm10 = vmor %vm320_vm8, %vm321_vm9  ;;  %v1643_v7 = vld [vmem:[%s2028_s1 + $0x1b8] sm:$0xff]   ;;  %v1645_v9 = vld [vmem:[%s2028_s1 + $0x1f0] sm:$0xff]  }
  0x19   : > { %vm324_vm12 = vmor %vm322_vm10, %vm323_vm11  ;;  %v333_v58 = vshll.u32 %v303_v53, 16  ;;  %v1642_v11 = vld [vmem:[%s2028_s1 + $0x138] sm:$0xff]   ;;  %v1647_v13 = vld [vmem:[%s2028_s1 + $0x1b0] sm:$0xff]  }
  0x1a   : > { %1462 = vmatpush3.bf16.msra.mxu0 %v1622_v14  ;;  %v232_v49 = vcombine.high %v231_v47, %v231_v47  ;;  %vm1849_vm14 = vmor %vm324_vm12, %vm325_vm13  ;;  %v1352_v29 = vld.sshfl [vmem:[%s1833_s16 + $0x4] sm:$0x33 pattern:$0x75316420]  ;;  %v1659_v33 = vld [vmem:[%s2028_s1 + $0x198] sm:$0xff]  }
  0x1b   : > { %1484 = vmatpush3.bf16.msra.mxu1 %v1623_v15  ;;  %1463 = vmatprep.subr.bf16.mxu0 %v1624_v16  ;;  %v335_v63 = vsel %vm1849_vm14, %v328_v57, %v333_v58  ;;  %v1649_v15 = vld [vmem:[%s2028_s1 + $0x1e8] sm:$0xff]   ;;  %v707_v16 = vrot.slane %v222_v38, %v1839_v45  ;;  %v1654_v34 = vld [vmem:[%s2028_s1 + $0x120] sm:$0xff]   ;;  %v1661_v35 = vld [vmem:[%s2028_s1 + $0x1d0] sm:$0xff]  }
  0x1c   : > { %1485 = vmatprep.subr.bf16.mxu1 %v1625_v17  ;;  %v249_v52 = vcombine.low %v231_v47, %v232_v49  ;;  %v1644_v17 = vld [vmem:[%s2028_s1 + $0x170] sm:$0xff]   ;;  %v1656_v39 = vld [vmem:[%s2028_s1 + $0x158] sm:$0xff]   ;;  %v1667_v50 = vld [vmem:[%s2028_s1 + $0x188] sm:$0xff]  }
  0x1d   : > { %v1663_v42 = vld [vmem:[%s2028_s1 + $0x190] sm:$0xff]   ;;  %v1658_v44 = vld [vmem:[%s2028_s1 + $0x118] sm:$0xff]   ;;  %v1669_v53 = vld [vmem:[%s2028_s1 + $0x1c0] sm:$0xff]  }
  0x1e   : > { %1464 = vmatpush3.bf16.msra.mxu0 %v1626_v18  ;;  %v256_v54 = vrot.slane %v249_v52, %v1839_v45  ;;  %v1646_v18 = vld [vmem:[%s2028_s1 + $0x130] sm:$0xff]   ;;  %v1666_v57 = vld [vmem:[%s2028_s1 + $0x108] sm:$0xff]   ;;  %v1668_v58 = vld [vmem:[%s2028_s1 + $0x140] sm:$0xff]  }
  0x1f   : > { %1486 = vmatpush3.bf16.msra.mxu1 %v1627_v19  ;;  %1465 = vmatprep.subr.bf16.mxu0 %v1628_v20  ;;  %v1651_v19 = vld [vmem:[%s2028_s1 + $0x1a8] sm:$0xff]   ;;  %v1653_v20 = vld [vmem:[%s2028_s1 + $0x1e0] sm:$0xff]   ;;  %v1660_v48 = vld [vmem:[%s2028_s1 + $0x150] sm:$0xff]  }
  0x20   : > { %1487 = vmatprep.subr.bf16.mxu1 %v1629_v21  ;;  %v263_v55 = vrot.slane %v256_v54, %v1839_v45  ;;  %v304_v56 = vcombine.high %v256_v54, %v256_v54  ;;  %v910_v21 = vcombine.high %v707_v16, %v707_v16  ;;  %v1662_v52 = vld [vmem:[%s2028_s1 + $0x110] sm:$0xff]   ;;  %v1664_v54 = vld [vmem:[%s2028_s1 + $0x148] sm:$0xff]  }
  0x22   : > { %1466 = vmatpush3.bf16.msra.mxu0 %v1630_v22  ;;  %v311_v60 = vrot.slane %v304_v56, %v1839_v45  ;;  %v337_v61 = vshrl.u32 %v263_v55, 16  ;;  %v539_v62 = vcombine.low %v248_v51, %v263_v55  ;;  %v1648_v22 = vld [vmem:[%s2028_s1 + $0x168] sm:$0xff]   ;;  %v1671_v56 = vld [vmem:[%s2028_s1 + $0x180] sm:$0xff]  }
  0x23   : > { %1488 = vmatpush3.bf16.msra.mxu1 %v1631_v23  ;;  %1467 = vmatprep.subr.bf16.mxu0 %v1632_v24  ;;  %v1650_v23 = vld [vmem:[%s2028_s1 + $0x128] sm:$0xff]   ;;  %v1655_v24 = vld [vmem:[%s2028_s1 + $0x1a0] sm:$0xff]  }
  0x24   : > { %1489 = vmatprep.subr.bf16.mxu1 %v1633_v25  ;;  %v342_v0 = vshll.u32 %v311_v60, 16  ;;  %v546_v1 = vrot.slane %v539_v62, %v1839_v45  ;;  %v913_v25 = vshrl.u32 %v707_v16, 16  ;;  %v1670_v60 = vld [vmem:[%s2028_s1 + $0x100] sm:$0xff]   ;;  %v1152_v62 = vld [vmem:[%s2030_s3 + $0x78] sm:$0xff] }
  0x26   : > { %1468 = vmatpush3.bf16.msra.mxu0 %v1634_v26  ;;  %v344_v2 = vsel %vm1849_vm14, %v337_v61, %v342_v0  ;;  %v547_v3 = vcombine.high %v546_v1, %v546_v1  ;;  %v554_v5 = vrot.slane %v546_v1, %v1839_v45  ;;  %v1657_v26 = vld [vmem:[%s2028_s1 + $0x1d8] sm:$0xff]   ;;  %v1151_v0 = vld [vmem:[%s2030_s3 + $0x70] sm:$0xff]  ;;  %v1150_v1 = vld [vmem:[%s2030_s3 + $0x68] sm:$0xff] }
  0x27   : > { %1490 = vmatpush3.bf16.msra.mxu1 %v1635_v27  ;;  %1469 = vmatprep.subr.bf16.mxu0 %v1636_v28  ;;  %v378_v4 = vcombine.low %v335_v63, %v344_v2  ;;  %v918_v27 = vshll.u32 %v910_v21, 16  ;;  %v1652_v28 = vld [vmem:[%s2028_s1 + $0x160] sm:$0xff]   ;;  %v1687_v63 = vmov 0.0   ;;  %v1148_v2 = vld [vmem:[%s2030_s3 + $0x58] sm:$0xff] }
  0x28   : > { %1491 = vmatprep.subr.bf16.mxu1 %v1637_v30  ;;  %v561_v6 = vrot.slane %v547_v3, %v1839_v45  ;;  %v748_v30 = vcombine.low %v707_v16, %v1352_v29  ;;  %v1147_v3 = vld [vmem:[%s2030_s3 + $0x50] sm:$0xff] }
  0x29   : > { %v385_v8 = vrot.slane %v378_v4, %v1839_v45  ;;  %v920_v38 = vsel %vm1849_vm14, %v913_v25, %v918_v27  ;;  %v1146_v4 = vld [vmem:[%s2030_s3 + $0x48] sm:$0xff] }
  0x2a   : > { %1470 = vmatpush3.bf16.msra.mxu0 %v1638_v31  ;;  %692 = vmatprep.mubr.bf16.mxu1 %v561_v6  ;;  %v911_v31 = vcombine.high %v1352_v29, %v1352_v29  ;;  %v755_v36 = vrot.slane %v748_v30, %v1839_v45  ;;  %v1144_v6 = vld [vmem:[%s2030_s3 + $0x38] sm:$0xff] }
  0x2b   : > { %1492 = vmatpush3.bf16.msra.mxu1 %v1639_v32  ;;  %1499 = vmatprep.subr.bf16.mxu0 %v1640_v43  ;;  %v386_v10 = vcombine.high %v385_v8, %v385_v8  ;;  %v393_v12 = vrot.slane %v385_v8, %v1839_v45  ;;  %v922_v32 = vshrl.u32 %v1352_v29, 16  ;;  %v1142_v8 = vld [vmem:[%s2030_s3 + $0x28] sm:$0xff] }
  0x2c   : > { %1521 = vmatprep.subr.bf16.mxu1 %v1641_v46  ;;  %v927_v37 = vshll.u32 %v911_v31, 16  ;;  %v756_v40 = vcombine.high %v755_v36, %v755_v36  ;;  %v1665_v46 = vld [vmem:[%s2028_s1 + $0x1c8] sm:$0xff]   ;;  %v763_v61 = vrot.slane %v755_v36, %v1839_v45 }
  0x2d   : > { %v400_v14 = vrot.slane %v386_v10, %v1839_v45  ;;  %v1140_v10 = vld [vmem:[%s2030_s3 + $0x18] sm:$0xff] }
  0x2e   : > { %693 = vmatmul.mubr.bf16.vlgmr.msra.gmra.mxu1 %v554_v5  ;;  %v929_v41 = vsel %vm1849_vm14, %v922_v32, %v927_v37  ;;  %v770_v47 = vrot.slane %v756_v40, %v1839_v45  ;;  %v1145_v5 = vld [vmem:[%s2030_s3 + $0x40] sm:$0xff] }
  0x2f   : > { %1522 = vmatpush3.bf16.msra.mxu1 %v1643_v7  ;;  %531 = vmatprep.mubr.bf16.mxu0 %v400_v14  ;;  %v963_v43 = vcombine.low %v920_v38, %v929_v41  ;;  %v1143_v7 = vld [vmem:[%s2030_s3 + $0x30] sm:$0xff] }
  0x30   : > { %1523 = vmatprep.subr.bf16.mxu1 %v1645_v9  ;;  %532 = vmatmul.mubr.bf16.vlgmr.msra.gmra.mxu0 %v393_v12  ;;  %v1141_v9 = vld [vmem:[%s2030_s3 + $0x20] sm:$0xff]  ;;  %v1138_v12 = vld [vmem:[%s2030_s3 + $0x8] sm:$0xff] }
  0x31   : > { %1500 = vmatpush3.bf16.msra.mxu0 %v1642_v11  ;;  %v970_v49 = vrot.slane %v963_v43, %v1839_v45  ;;  %901 = vmatprep.mubr.bf16.mxu0 %v770_v47  ;;  %v1139_v11 = vld [vmem:[%s2030_s3 + $0x10] sm:$0xff] }
  0x32   : > { %1501 = vmatprep.subr.bf16.mxu0 %v1644_v17 }
  0x33   : > { %1524 = vmatpush3.bf16.msra.mxu1 %v1647_v13  ;;  %v971_v51 = vcombine.high %v970_v49, %v970_v49  ;;  %v978_v59 = vrot.slane %v970_v49, %v1839_v45  ;;  %v1137_v13 = vld [vmem:[%s2030_s3] sm:$0xff] }
  0x34   : > { %1525 = vmatprep.subr.bf16.mxu1 %v1649_v15 }
  0x35   : > { %1502 = vmatpush3.bf16.msra.mxu0 %v1646_v18  ;;  %v985_v55 = vrot.slane %v971_v51, %v1839_v45  ;;  %v1149_v45 = vld [vmem:[%s2030_s3 + $0x60] sm:$0xff] }
  0x36   : > { %1503 = vmatprep.subr.bf16.mxu0 %v1648_v22 }
  0x37   : > { %1526 = vmatpush3.bf16.msra.mxu1 %v1651_v19  ;;  %1116 = vmatprep.mubr.bf16.mxu1 %v985_v55 }
  0x38   : > { %1527 = vmatprep.subr.bf16.mxu1 %v1653_v20 }
  0x39   : > { %1504 = vmatpush3.bf16.msra.mxu0 %v1650_v23 }
  0x3a   : > { %1505 = vmatprep.subr.bf16.mxu0 %v1652_v28 }
  0x3b   : > { %1528 = vmatpush3.bf16.msra.mxu1 %v1655_v24 }
  0x3c   : > { %1529 = vmatprep.subr.bf16.mxu1 %v1657_v26 }
  0x3d   : > { %1506 = vmatpush3.bf16.msra.mxu0 %v1654_v34 }
  0x3e   : > { %1507 = vmatprep.subr.bf16.mxu0 %v1656_v39 }
  0x3f   : > { %1530 = vmatpush3.bf16.msra.mxu1 %v1659_v33 }
  0x40   : > { %1531 = vmatprep.subr.bf16.mxu1 %v1661_v35 }
  0x41   : > { %1508 = vmatpush3.bf16.msra.mxu0 %v1658_v44  ;;  %v1135_v44 = vld [vmem:[%s2029_s2] sm:$0x1] }
  0x42   : > { %1509 = vmatprep.subr.bf16.mxu0 %v1660_v48  ;;  %v1153_v48 = vld [vmem:[%s2031_s4] sm:$0x1] }
  0x43   : > { %1532 = vmatpush3.bf16.msra.mxu1 %v1663_v42 }
  0x44   : > { %1533 = vmatprep.subr.bf16.mxu1 %v1665_v46 }
  0x45   : > { %1510 = vmatpush3.bf16.msra.mxu0 %v1662_v52 }
  0x46   : > { %1511 = vmatprep.subr.bf16.mxu0 %v1664_v54 }
  0x47   : > { %1534 = vmatpush3.bf16.msra.mxu1 %v1667_v50 }
  0x48   : > { %1535 = vmatprep.subr.bf16.mxu1 %v1669_v53 }
  0x49   : > { %1512 = vmatpush3.bf16.msra.mxu0 %v1666_v57 }
  0x4a   : > { %1513 = vmatprep.subr.bf16.mxu0 %v1668_v58 }
  0x4b   : > { %1536 = vmatpush3.bf16.msra.mxu1 %v1671_v56 }
  0x4d   : > { %1514 = vmatpush3.bf16.msra.mxu0 %v1670_v60 }
  0x4e   : > { %1117 = vmatmul.mubr.bf16.vlgmr.msra.gmra.mxu1 %v978_v59  ;;  %1560 = vmatprep.subr.mxu0 %v1687_v63 }
  0x50   : > { %902 = vmatmul.mubr.bf16.vlgmr.msra.gmra.mxu0 %v763_v61 }
  0x51   : > { %1561 = vmatpush3.msra.mxu0 %v1152_v62  ;;  %1592 = vmatprep.mubr.msk.f32.mxu0 %vm1688_vm15, %v1687_v63 }
  0x52   : > { %1562 = vmatprep.subr.mxu0 %v1687_v63 }
  0x53   : > { %1563 = vmatpush3.msra.mxu0 %v1151_v0 }
  0x54   : > { %1564 = vmatprep.subr.mxu0 %v1687_v63 }
  0x55   : > { %1565 = vmatpush3.msra.mxu0 %v1150_v1 }
  0x56   : > { %1566 = vmatprep.subr.mxu0 %v1687_v63 }
  0x57   : > { %1567 = vmatpush3.msra.mxu0 %v1149_v45 }
  0x58   : > { %1568 = vmatprep.subr.mxu0 %v1687_v63 }
  0x59   : > { %1569 = vmatpush3.msra.mxu0 %v1148_v2 }
  0x5a   : > { %1570 = vmatprep.subr.mxu0 %v1687_v63 }
  0x5b   : > { %1571 = vmatpush3.msra.mxu0 %v1147_v3 }
  0x5c   : > { %1572 = vmatprep.subr.mxu0 %v1687_v63 }
  0x5d   : > { %1573 = vmatpush3.msra.mxu0 %v1146_v4 }
  0x5e   : > { %1574 = vmatprep.subr.mxu0 %v1687_v63 }
  0x5f   : > { %1575 = vmatpush3.msra.mxu0 %v1145_v5 }
  0x60   : > { %1576 = vmatprep.subr.mxu0 %v1687_v63 }
  0x61   : > { %1577 = vmatpush3.msra.mxu0 %v1144_v6 }
  0x62   : > { %1578 = vmatprep.subr.mxu0 %v1687_v63 }
  0x63   : > { %1579 = vmatpush3.msra.mxu0 %v1143_v7 }
  0x64   : > { %1580 = vmatprep.subr.mxu0 %v1687_v63 }
  0x65   : > { %1581 = vmatpush3.msra.mxu0 %v1142_v8 }
  0x66   : > { %1582 = vmatprep.subr.mxu0 %v1687_v63 }
  0x67   : > { %1583 = vmatpush3.msra.mxu0 %v1141_v9 }
  0x68   : > { %1584 = vmatprep.subr.mxu0 %v1687_v63 }
  0x69   : > { %1585 = vmatpush3.msra.mxu0 %v1140_v10 }
  0x6a   : > { %1586 = vmatprep.subr.mxu0 %v1687_v63 }
  0x6b   : > { %1587 = vmatpush3.msra.mxu0 %v1139_v11 }
  0x6c   : > { %1588 = vmatprep.subr.mxu0 %v1687_v63 }
  0x6d   : > { %1589 = vmatpush3.msra.mxu0 %v1138_v12 }
  0x6e   : > { %1590 = vmatprep.subr.mxu0 %v1687_v63 }
  0x6f   : > { %1591 = vmatpush3.msra.mxu0 %v1137_v13 }
  0xee   : > { %v1493_v14 = vpop.f32.mrf.mxu1 }
  0xf0   : > { %v1494_v15 = vpop.f32.mrf.mxu1  ;;  %v1471_v17 = vpop.f32.mrf.mxu0 }
  0xf1   : > { %v1495_v25 = vadd.f32 %v1494_v15, %v1493_v14 }
  0xf2   : > { %v1496_v16 = vpop.f32.mrf.mxu1  ;;  %v1472_v19 = vpop.f32.mrf.mxu0 }
  0xf3   : > { %v1473_v24 = vadd.f32 %v1472_v19, %v1471_v17 }
  0xf4   : > { %v1497_v18 = vpop.f32.mrf.mxu1  ;;  %v1474_v20 = vpop.f32.mrf.mxu0 }
  0xf5   : > { %v695_v30 = vadd.f32 %v1495_v25, %v1473_v24 }
  0xf6   : > { %v1475_v21 = vpop.f32.mrf.mxu0 }
 0x10e   : > { %v1537_v22 = vpop.f32.mrf.mxu1 }
 0x110   : > { %v1538_v23 = vpop.f32.mrf.mxu1  ;;  %v1515_v27 = vpop.f32.mrf.mxu0 }
 0x111   : > { %v1539_v34 = vadd.f32 %v1538_v23, %v1537_v22 }
 0x112   : > { %v1540_v26 = vpop.f32.mrf.mxu1  ;;  %v1516_v29 = vpop.f32.mrf.mxu0 }
 0x113   : > { %v1517_v31 = vadd.f32 %v1516_v29, %v1515_v27 }
 0x114   : > { %v1541_v28 = vpop.f32.mrf.mxu1  ;;  %v1518_v32 = vpop.f32.mrf.mxu0 }
 0x115   : > { %v909_v33 = vadd.f32 %v1517_v31, %v695_v30 }
 0x116   : > { %v1519_v35 = vpop.f32.mrf.mxu0 }
 0x117   : > { %v1124_v36 = vadd.f32 %v1539_v34, %v909_v33 }
 0x119   : > { %v1126_v37 = vsel %vm1125_vm0, %v1124_v36, 0.0 }
 0x11a   : > { %v1127_v38 = vrot.slane %v1126_v37, 4 }
 0x11c   : > { %v1128_v39 = vadd.f32 %v1127_v38, %v1126_v37 }
 0x11e   : > { %v1129_v40 = vrot.slane %v1128_v39, 2 }
 0x120   : > { %v1130_v41 = vadd.f32 %v1129_v40, %v1128_v39 }
 0x122   : > { %v1131_v42 = vrot.slane %v1130_v41, 1 }
 0x124   : > { %v1132_v43 = vadd.f32 %v1131_v42, %v1130_v41 }
 0x126   : > { %v1134_v46 = vmul.f32 0.25, %v1132_v43 }
 0x128   : > { %v1136_v47 = vadd.f32 %v1135_v44, %v1134_v46 }
 0x12a   : > { %1593 = vmatmul.mubr.f32.vlgmr.msra.gmra.mxu0 %v1136_v47 }
 0x1ea   : > { %v1220_v49 = vpop.f32.mrf.mxu0 }
 0x1eb   : > { %v1221_v50 = vadd.f32 %v1220_v49, %v1153_v48 }
 0x1ec   : > { %v1594_v51 = vpop.f32.mrf.mxu0 }
 0x1ed   : > { %v1451_v52 = vmul.f32 -1.442695, %v1221_v50 }
 0x1ef   : > { %1672 = vpow2.f32 %v1451_v52 }
 0x1fc   : > { %v1673_v53 = vpop.eup %1672 }
 0x1fd   : > { %v1227_v54 = vadd.f32 1.0, %v1673_v53 }
 0x1ff   : > { %1674 = vrcp.f32 %v1227_v54 }
 0x20c   : > { %v1675_v55 = vpop.eup %1674 }
 0x20d   : > { %1231 = vst.msk [vmem:[%s220_s30] sm:$0x1] %vm1230_vm1, %v1675_v55 }
 0x20e PF: > { %s15_s18 = sadd.s32 1, %s1682_s18  }
 0x20f   : > { %p12_p4 = scmp.ge.s32.totalorder %s15_s18, 4  }
 0x211   :  { %14 = sbr.rel (!%p12_p4) target bundleno = 1 (0x1), region = 73 }

</bundles_post_ra>
